<compile_context>
chip_gen: v5e
topology: v5e:2x2
jax: 0.10.0
libtpu: 0.0.40
codegen_flags: <defaults>
</compile_context>

<pallas_src>
import numpy as np
import jax
import jax.numpy as jnp
from jax.experimental import pallas as pl
from jax.experimental.pallas import tpu as pltpu

EPS = 1e-5          # InstanceNorm2d eps
NEG_SLOPE = 0.01    # LeakyReLU default negative slope


# ----------------------------------------------------------------------------
# Host-side constants
# ----------------------------------------------------------------------------

def _phase_scatter_mats(h_lo, w_lo, st, s_stack):
    """st^2 0/1 scatter matrices, one per transposed-conv phase (i, j).
    mats[i*st+j] has shape (s_stack*h_lo*w_lo, s_stack*(st*h_lo)*(st*w_lo)) and
    maps low-res lane (n, yl, xl) -> hi-res lane (n, st*yl+i, st*xl+j)."""
    hw_lo = h_lo * w_lo
    h_hi, w_hi = st * h_lo, st * w_lo
    hw_hi = h_hi * w_hi
    mats = np.zeros((st * st, s_stack * hw_lo, s_stack * hw_hi), np.float32)
    for i in range(st):
        for j in range(st):
            ij = i * st + j
            for n in range(s_stack):
                for yl in range(h_lo):
                    for xl in range(w_lo):
                        q = n * hw_lo + yl * w_lo + xl
                        t = n * hw_hi + (st * yl + i) * w_hi + (st * xl + j)
                        mats[ij, q, t] = 1.0
    return mats


def _tap_offsets(w, k):
    """(lane offset, needs_mask) per (ky, kx) tap of a kxk 'same' conv on a
    row-major flattened image of width w."""
    pad = k // 2
    offs = []
    for ky in range(k):
        for kx in range(k):
            oy, ox = ky - pad, kx - pad
            offs.append((oy * w + ox, not (oy == 0 and ox == 0)))
    return offs


def _tap_masks(h, w, k, s_stack):
    """(k*k, s_stack*h*w) 0/1 validity masks (this IS the 'same' zero padding),
    tiled across the lane-stacked samples."""
    pad = k // 2
    hw = h * w
    yy, xx = np.divmod(np.arange(hw), w)
    rows = []
    for ky in range(k):
        for kx in range(k):
            oy, ox = ky - pad, kx - pad
            valid = ((yy + oy >= 0) & (yy + oy < h) &
                     (xx + ox >= 0) & (xx + ox < w))
            rows.append(valid.astype(np.float32))
    m = np.stack(rows, 0)
    return np.tile(m, (1, s_stack))


def _sample_masks(hw, s_stack):
    """(s_stack, s_stack*hw) 0/1 masks selecting each sample's lane segment."""
    m = np.zeros((s_stack, s_stack * hw), np.float32)
    for n in range(s_stack):
        m[n, n * hw:(n + 1) * hw] = 1.0
    return m


# ----------------------------------------------------------------------------
# Fused whole-decoder kernel (one grid step == one block of lane-stacked samples)
# ----------------------------------------------------------------------------

def _make_decoder_kernel(stage_meta, compute_dtype):
    cdt = compute_dtype

    def _mm(lhs, rhs):
        return jax.lax.dot_general(lhs, rhs, (((1,), (0,)), ((), ())),
                                   preferred_element_type=jnp.float32)

    def _im2col(src_f32, offs, masks, lane_len):
        """src: (C, L) f32 -> (k*k*C, L) patch matrix in the MXU compute dtype.
        Rows ordered (ky,kx) major / channel minor.  Lane shifts use
        pltpu.roll (XLU); out-of-image taps are zeroed via precomputed masks.
        Rolling across sample boundaries is harmless: every cross-boundary lane
        is exactly an out-of-image (masked) tap."""
        pieces = []
        for t, (off, needs_mask) in enumerate(offs):
            if off == 0:
                s = src_f32
            else:
                s = pltpu.roll(src_f32, shift=(-off) % lane_len, axis=1)
            if needs_mask:
                s = s * masks[t:t + 1]
            pieces.append(s)
        return jnp.concatenate(pieces, axis=0).astype(cdt)

    def _inorm_lrelu(acc, gamma, beta, segm, inv_hw):
        """Two-pass InstanceNorm (per sample, per channel, affine) + LeakyReLU.
        acc: (C, S*HW) f32; segm: (S, S*HW) 0/1 sample masks."""
        s_stack = segm.shape[0]
        mean_b = jnp.zeros_like(acc)
        for n in range(s_stack):
            m = segm[n:n + 1]
            mean_b = mean_b + jnp.sum(acc * m, axis=1, keepdims=True) * inv_hw * m
        xc = acc - mean_b
        xc2 = xc * xc
        var_b = jnp.zeros_like(acc)
        for n in range(s_stack):
            m = segm[n:n + 1]
            var_b = var_b + jnp.sum(xc2 * m, axis=1, keepdims=True) * inv_hw * m
        xn = xc * jax.lax.rsqrt(var_b + EPS) * gamma + beta
        return jnp.where(xn > 0, xn, NEG_SLOPE * xn)

    def kernel(*refs):
        out_ref = refs[-1]
        x = refs[0][...]                      # bottleneck, (C, S*hw) f32
        r = 1
        for m in stage_meta:
            st, k, c_skip = m["stride"], m["k"], m["c_skip"]
            n_blocks, s_stack = m["n_blocks"], m["S"]
            hw_hi = m["h"] * m["w"]
            lane_len = s_stack * hw_hi
            offs = m["tap_offsets"]

            skip_ref, tcw_ref, tcb_ref = refs[r], refs[r + 1], refs[r + 2]
            r += 3
            if st > 1:
                pmats_ref = refs[r]
                r += 1
            mask_ref, segm_ref = refs[r], refs[r + 1]
            r += 2

            # ---- ConvTranspose (kernel == stride): one stacked matmul, then a
            #      per-phase 0/1 scatter matmul doing the pixel shuffle
            #      (no o_cat lane-concat relayout, no dense (HW x HW) matrix).
            o_stack = _mm(tcw_ref[...], x.astype(cdt))   # (st*st*Cout, S*hw_lo) f32
            if st > 1:
                up = None
                for ij in range(st * st):
                    piece = o_stack[ij * c_skip:(ij + 1) * c_skip, :].astype(cdt)
                    term = _mm(piece, pmats_ref[ij])     # (Cout, S*hw_hi)
                    up = term if up is None else up + term
            else:
                up = o_stack
            up = up + tcb_ref[...]

            masks = mask_ref[...]                         # (k*k, S*hw_hi) f32
            segm = segm_ref[...]                          # (S, S*hw_hi) f32
            inv_hw = 1.0 / hw_hi

            # ---- conv block 0: torch.cat((up, skip), 1) is a cheap in-VMEM
            #      channel (sublane) concat -> ONE matmul vs the unsplit weight.
            x_cat = jnp.concatenate([up, skip_ref[...]], axis=0)
            w0_ref, b0_ref, g0_ref, be0_ref = refs[r:r + 4]
            r += 4
            acc = _mm(w0_ref[...], _im2col(x_cat, offs, masks, lane_len)) + b0_ref[...]
            x = _inorm_lrelu(acc, g0_ref[...], be0_ref[...], segm, inv_hw)

            # ---- remaining conv blocks of this stage
            for _ in range(n_blocks - 1):
                wb_ref, bb_ref, gb_ref, beb_ref = refs[r:r + 4]
                r += 4
                acc = _mm(wb_ref[...], _im2col(x, offs, masks, lane_len)) + bb_ref[...]
                x = _inorm_lrelu(acc, gb_ref[...], beb_ref[...], segm, inv_hw)

        # ---- fused 1x1 segmentation head
        segw_ref, segb_ref = refs[r], refs[r + 1]
        seg = _mm(segw_ref[...], x.astype(cdt)) + segb_ref[...]
        out_ref[...] = seg.astype(out_ref.dtype)

    return kernel


# ----------------------------------------------------------------------------
# Decoder forward (Pallas path)
# ----------------------------------------------------------------------------

def unet_decoder_seg_forward(skips_nchw, params, compute_dtype=jnp.bfloat16,
                             samples_per_block=None):
    """Fused Pallas implementation of UNetDecoder_Seg.forward.

    skips_nchw: list of NCHW skips, bottleneck last (PyTorch convention).
    Returns NCHW segmentation logits at the highest resolution.

    `samples_per_block` samples are stacked along the lane axis per grid step
    (default: the whole batch -> grid=(1,)).  On v7x, pass batch//2 so the
    grid of 2 "parallel" steps shards across the two TensorCores.
    """
    cdt = compute_dtype
    n_batch = skips_nchw[0].shape[0]
    s_stack = n_batch if samples_per_block is None else int(samples_per_block)
    assert n_batch % s_stack == 0, "batch must be divisible by samples_per_block"
    n_blk = n_batch // s_stack

    spatial = [(s.shape[2], s.shape[3]) for s in skips_nchw]

    def stack_lanes(a_nchw):
        # (N, C, H, W) -> (n_blk, C, s_stack*H*W): host-side layout plumbing so
        # the kernel sees lane-dense (C, S*HW) tiles with zero in-kernel relayout.
        n, c, h, w = a_nchw.shape
        a = a_nchw.reshape(n_blk, s_stack, c, h * w).astype(jnp.float32)
        return jnp.transpose(a, (0, 2, 1, 3)).reshape(n_blk, c, s_stack * h * w)

    stacked = [stack_lanes(s) for s in skips_nchw]

    operands = [stacked[-1]]
    in_specs = [pl.BlockSpec((None,) + stacked[-1].shape[1:], lambda b: (b, 0, 0))]

    def add_param(a):
        a = jnp.asarray(a)
        operands.append(a)
        nd = a.ndim
        # Constant index across the grid -> single-buffer (halves param VMEM).
        in_specs.append(pl.BlockSpec(a.shape, lambda b, nd=nd: (0,) * nd,
                                     pipeline_mode=pl.Buffered(1)))

    stage_meta = []
    for s, stage in enumerate(params["stages"]):
        st = int(stage["stride"])
        skip = stacked[-(s + 2)]
        h_hi, w_hi = spatial[-(s + 2)]
        c_skip = skip.shape[1]
        k = stage["blocks"][0]["w"].shape[0]
        h_lo, w_lo = h_hi // st, w_hi // st

        stage_meta.append(dict(stride=st, k=k, h=h_hi, w=w_hi, S=s_stack,
                               c_skip=c_skip, n_blocks=len(stage["blocks"]),
                               tap_offsets=_tap_offsets(w_hi, k)))

        operands.append(skip)
        in_specs.append(pl.BlockSpec((None, c_skip, s_stack * h_hi * w_hi),
                                     lambda b: (b, 0, 0)))

        # ConvTranspose2d weight (Cin, Cout, st, st) -> rows ordered (i, j, cout)
        tc_w = stage["tc_w"]
        add_param(jnp.transpose(tc_w, (2, 3, 1, 0))
                  .reshape(st * st * c_skip, tc_w.shape[0]).astype(cdt))
        add_param(stage["tc_b"].reshape(c_skip, 1).astype(jnp.float32))
        if st > 1:
            add_param(jnp.asarray(_phase_scatter_mats(h_lo, w_lo, st, s_stack), cdt))
        add_param(jnp.asarray(_tap_masks(h_hi, w_hi, k, s_stack), jnp.float32))
        add_param(jnp.asarray(_sample_masks(h_hi * w_hi, s_stack), jnp.float32))

        for blk in stage["blocks"]:
            w_hwio = blk["w"]                                   # (k, k, Cin, Cout)
            cout = w_hwio.shape[3]
            # (Cout, k*k*Cin): column order matches im2col rows (tap-major,
            # channel-minor); block 0's Cin is the concat [up, skip] order.
            add_param(jnp.transpose(w_hwio, (3, 0, 1, 2)).reshape(cout, -1).astype(cdt))
            add_param(blk["b"].reshape(cout, 1).astype(jnp.float32))
            add_param(blk["gamma"].reshape(cout, 1).astype(jnp.float32))
            add_param(blk["beta"].reshape(cout, 1).astype(jnp.float32))

    add_param(params["seg_w"][:, :, 0, 0].astype(cdt))          # (num_classes, C0)
    add_param(params["seg_b"].reshape(-1, 1).astype(jnp.float32))

    num_classes = params["seg_w"].shape[0]
    h0, w0 = spatial[0]
    lane0 = s_stack * h0 * w0

    out = pl.pallas_call(
        _make_decoder_kernel(stage_meta, cdt),
        out_shape=jax.ShapeDtypeStruct((n_blk, num_classes, lane0), jnp.float32),
        grid=(n_blk,),
        in_specs=in_specs,
        out_specs=pl.BlockSpec((None, num_classes, lane0), lambda b: (b, 0, 0)),
        compiler_params=pltpu.CompilerParams(
            dimension_semantics=("parallel",),       # blocks shard across TCs
            vmem_limit_bytes=32 * 1024 * 1024),      # sized for v7x headroom
    )(*operands)

    # (n_blk, num_classes, S*H0*W0) -> (N, num_classes, H0, W0)
    out = out.reshape(n_blk, num_classes, s_stack, h0 * w0)
    out = jnp.transpose(out, (0, 2, 1, 3)).reshape(n_batch, num_classes, h0, w0)
    return out


# ----------------------------------------------------------------------------
# Pure-JAX reference (PyTorch semantics, NCHW, f32) for correctness check
# ----------------------------------------------------------------------------

def ref_forward(skips_nchw, params):
    lres = skips_nchw[-1]
    for s, stage in enumerate(params["stages"]):
        st = stage["stride"]
        w = stage["tc_w"]                                     # (Cin, Cout, st, st)
        y = jnp.einsum('nchw,cokl->nohkwl', lres, w)
        N, Co, H, _, W, _ = y.shape
        y = y.reshape(N, Co, H * st, W * st) + stage["tc_b"][None, :, None, None]
        x = jnp.concatenate([y, skips_nchw[-(s + 2)]], axis=1)
        for blk in stage["blocks"]:
            w_oihw = jnp.transpose(blk["w"], (3, 2, 0, 1))
            pad = w_oihw.shape[2] // 2
            x = jax.lax.conv_general_dilated(
                x, w_oihw, (1, 1), ((pad, pad), (pad, pad)),
                dimension_numbers=('NCHW', 'OIHW', 'NCHW'))
            x = x + blk["b"][None, :, None, None]
            mean = x.mean(axis=(2, 3), keepdims=True)
            var = ((x - mean) ** 2).mean(axis=(2, 3), keepdims=True)
            xn = (x - mean) / jnp.sqrt(var + EPS)
            xn = xn * blk["gamma"][None, :, None, None] + blk["beta"][None, :, None, None]
            x = jnp.where(xn > 0, xn, NEG_SLOPE * xn)
        lres = x
    seg = jax.lax.conv_general_dilated(
        lres, params["seg_w"], (1, 1), ((0, 0), (0, 0)),
        dimension_numbers=('NCHW', 'OIHW', 'NCHW'))
    return seg + params["seg_b"][None, :, None, None]


# ----------------------------------------------------------------------------
# Deterministic parameter construction (mirrors UNetDecoder_Seg.__init__)
# ----------------------------------------------------------------------------

def init_params(key, output_channels, strides, kernel_sizes,
                n_conv_per_stage, num_classes):
    params = {"stages": []}
    n_stages_encoder = len(output_channels)
    for s in range(1, n_stages_encoder):
        cin_below = output_channels[-s]
        c_skip = output_channels[-(s + 1)]
        st = strides[-s]
        k = kernel_sizes[-(s + 1)]
        key, k1, k2 = jax.random.split(key, 3)
        stage = {
            "stride": st,
            # PyTorch ConvTranspose2d weight layout: (Cin, Cout, kH, kW)
            "tc_w": 0.1 * jax.random.normal(k1, (cin_below, c_skip, st, st), jnp.float32),
            "tc_b": 0.1 * jax.random.normal(k2, (c_skip,), jnp.float32),
            "blocks": [],
        }
        cin = 2 * c_skip   # after concat with skip
        for _ in range(n_conv_per_stage):
            key, kw_, kb_, kg_, kbe_ = jax.random.split(key, 5)
            stage["blocks"].append({
                "w": 0.1 * jax.random.normal(kw_, (k, k, cin, c_skip), jnp.float32),  # HWIO
                "b": 0.1 * jax.random.normal(kb_, (c_skip,), jnp.float32),
                "gamma": 1.0 + 0.1 * jax.random.normal(kg_, (c_skip,), jnp.float32),
                "beta": 0.1 * jax.random.normal(kbe_, (c_skip,), jnp.float32),
            })
            cin = c_skip
        params["stages"].append(stage)
    key, kw_, kb_ = jax.random.split(key, 3)
    # seg_layer: Conv2d(output_channels[0], num_classes, 1, bias=True), OIHW
    params["seg_w"] = 0.1 * jax.random.normal(
        kw_, (num_classes, output_channels[0], 1, 1), jnp.float32)
    params["seg_b"] = 0.1 * jax.random.normal(kb_, (num_classes,), jnp.float32)
    return params


if __name__ == "__main__":
    key = jax.random.PRNGKey(0)

    N = 2
    output_channels = [8, 16, 32]
    strides = [1, 2, 2]
    kernel_sizes = [3, 3, 3]
    n_conv_per_stage = 2
    num_classes = 4
    H = W = 16

    k_in, k_p = jax.random.split(key)
    ks = jax.random.split(k_in, len(output_channels))
    skips = []
    cum = 1
    for i, c in enumerate(output_channels):
        cum *= strides[i]
        hs = H // cum
        skips.append(jax.random.normal(ks[i], (N, c, hs, hs), jnp.float32))

    params = init_params(k_p, output_channels, strides, kernel_sizes,
                         n_conv_per_stage, num_classes)

    ref = jax.block_until_ready(ref_forward(skips, params))

    # 1) exact-semantics check: f32 MXU path vs pure-JAX PyTorch reference
    out_f32 = jax.block_until_ready(
        unet_decoder_seg_forward(skips, params, compute_dtype=jnp.float32))
    assert out_f32.shape == (N, num_classes, H, W), out_f32.shape
    np.testing.assert_allclose(np.asarray(out_f32), np.asarray(ref),
                               rtol=1e-3, atol=1e-3)

    # 2) performance config: bf16 MXU operands, f32 accumulation / epilogues,
    #    whole batch lane-stacked into a single grid step
    out_bf16 = jax.block_until_ready(
        unet_decoder_seg_forward(skips, params, compute_dtype=jnp.bfloat16))
    assert out_bf16.shape == (N, num_classes, H, W), out_bf16.shape
    np.testing.assert_allclose(np.asarray(out_bf16), np.asarray(ref),
                               rtol=5e-2, atol=5e-2)

    print("KERNEL_OK")
</pallas_src>

<mosaic_0001>
module attributes {stable_mosaic.version = 11 : i64} {
  func.func @kernel(%arg0: i32, %arg1: memref<1x32x32xf32, #tpu.memory_space<vmem>>, %arg2: memref<1x16x128xf32, #tpu.memory_space<vmem>>, %arg3: memref<64x32xf32, #tpu.memory_space<vmem>>, %arg4: memref<16x1xf32, #tpu.memory_space<vmem>>, %arg5: memref<4x32x128xf32, #tpu.memory_space<vmem>>, %arg6: memref<9x128xf32, #tpu.memory_space<vmem>>, %arg7: memref<2x128xf32, #tpu.memory_space<vmem>>, %arg8: memref<16x288xf32, #tpu.memory_space<vmem>>, %arg9: memref<16x1xf32, #tpu.memory_space<vmem>>, %arg10: memref<16x1xf32, #tpu.memory_space<vmem>>, %arg11: memref<16x1xf32, #tpu.memory_space<vmem>>, %arg12: memref<16x144xf32, #tpu.memory_space<vmem>>, %arg13: memref<16x1xf32, #tpu.memory_space<vmem>>, %arg14: memref<16x1xf32, #tpu.memory_space<vmem>>, %arg15: memref<16x1xf32, #tpu.memory_space<vmem>>, %arg16: memref<1x8x512xf32, #tpu.memory_space<vmem>>, %arg17: memref<32x16xf32, #tpu.memory_space<vmem>>, %arg18: memref<8x1xf32, #tpu.memory_space<vmem>>, %arg19: memref<4x128x512xf32, #tpu.memory_space<vmem>>, %arg20: memref<9x512xf32, #tpu.memory_space<vmem>>, %arg21: memref<2x512xf32, #tpu.memory_space<vmem>>, %arg22: memref<8x144xf32, #tpu.memory_space<vmem>>, %arg23: memref<8x1xf32, #tpu.memory_space<vmem>>, %arg24: memref<8x1xf32, #tpu.memory_space<vmem>>, %arg25: memref<8x1xf32, #tpu.memory_space<vmem>>, %arg26: memref<8x72xf32, #tpu.memory_space<vmem>>, %arg27: memref<8x1xf32, #tpu.memory_space<vmem>>, %arg28: memref<8x1xf32, #tpu.memory_space<vmem>>, %arg29: memref<8x1xf32, #tpu.memory_space<vmem>>, %arg30: memref<4x8xf32, #tpu.memory_space<vmem>>, %arg31: memref<4x1xf32, #tpu.memory_space<vmem>>, %arg32: memref<1x4x512xf32, #tpu.memory_space<vmem>>) attributes {dimension_semantics = [#tpu.dimension_semantics<parallel>], iteration_bounds = array<i64: 1>, scalar_prefetch = 0 : i64, scratch_operands = 0 : i64, tpu.core_type = #tpu.core_type<tc>, window_params = [{transform_indices = @transform_0, window_bounds = array<i64: 1, 32, 32>}, {transform_indices = @transform_1, window_bounds = array<i64: 1, 16, 128>}, {pipeline_mode = #tpu.pipeline_mode<synchronous>, transform_indices = @transform_2, window_bounds = array<i64: 64, 32>}, {pipeline_mode = #tpu.pipeline_mode<synchronous>, transform_indices = @transform_3, window_bounds = array<i64: 16, 1>}, {pipeline_mode = #tpu.pipeline_mode<synchronous>, transform_indices = @transform_4, window_bounds = array<i64: 4, 32, 128>}, {pipeline_mode = #tpu.pipeline_mode<synchronous>, transform_indices = @transform_5, window_bounds = array<i64: 9, 128>}, {pipeline_mode = #tpu.pipeline_mode<synchronous>, transform_indices = @transform_6, window_bounds = array<i64: 2, 128>}, {pipeline_mode = #tpu.pipeline_mode<synchronous>, transform_indices = @transform_7, window_bounds = array<i64: 16, 288>}, {pipeline_mode = #tpu.pipeline_mode<synchronous>, transform_indices = @transform_8, window_bounds = array<i64: 16, 1>}, {pipeline_mode = #tpu.pipeline_mode<synchronous>, transform_indices = @transform_9, window_bounds = array<i64: 16, 1>}, {pipeline_mode = #tpu.pipeline_mode<synchronous>, transform_indices = @transform_10, window_bounds = array<i64: 16, 1>}, {pipeline_mode = #tpu.pipeline_mode<synchronous>, transform_indices = @transform_11, window_bounds = array<i64: 16, 144>}, {pipeline_mode = #tpu.pipeline_mode<synchronous>, transform_indices = @transform_12, window_bounds = array<i64: 16, 1>}, {pipeline_mode = #tpu.pipeline_mode<synchronous>, transform_indices = @transform_13, window_bounds = array<i64: 16, 1>}, {pipeline_mode = #tpu.pipeline_mode<synchronous>, transform_indices = @transform_14, window_bounds = array<i64: 16, 1>}, {transform_indices = @transform_15, window_bounds = array<i64: 1, 8, 512>}, {pipeline_mode = #tpu.pipeline_mode<synchronous>, transform_indices = @transform_16, window_bounds = array<i64: 32, 16>}, {pipeline_mode = #tpu.pipeline_mode<synchronous>, transform_indices = @transform_17, window_bounds = array<i64: 8, 1>}, {pipeline_mode = #tpu.pipeline_mode<synchronous>, transform_indices = @transform_18, window_bounds = array<i64: 4, 128, 512>}, {pipeline_mode = #tpu.pipeline_mode<synchronous>, transform_indices = @transform_19, window_bounds = array<i64: 9, 512>}, {pipeline_mode = #tpu.pipeline_mode<synchronous>, transform_indices = @transform_20, window_bounds = array<i64: 2, 512>}, {pipeline_mode = #tpu.pipeline_mode<synchronous>, transform_indices = @transform_21, window_bounds = array<i64: 8, 144>}, {pipeline_mode = #tpu.pipeline_mode<synchronous>, transform_indices = @transform_22, window_bounds = array<i64: 8, 1>}, {pipeline_mode = #tpu.pipeline_mode<synchronous>, transform_indices = @transform_23, window_bounds = array<i64: 8, 1>}, {pipeline_mode = #tpu.pipeline_mode<synchronous>, transform_indices = @transform_24, window_bounds = array<i64: 8, 1>}, {pipeline_mode = #tpu.pipeline_mode<synchronous>, transform_indices = @transform_25, window_bounds = array<i64: 8, 72>}, {pipeline_mode = #tpu.pipeline_mode<synchronous>, transform_indices = @transform_26, window_bounds = array<i64: 8, 1>}, {pipeline_mode = #tpu.pipeline_mode<synchronous>, transform_indices = @transform_27, window_bounds = array<i64: 8, 1>}, {pipeline_mode = #tpu.pipeline_mode<synchronous>, transform_indices = @transform_28, window_bounds = array<i64: 8, 1>}, {pipeline_mode = #tpu.pipeline_mode<synchronous>, transform_indices = @transform_29, window_bounds = array<i64: 4, 8>}, {pipeline_mode = #tpu.pipeline_mode<synchronous>, transform_indices = @transform_30, window_bounds = array<i64: 4, 1>}, {transform_indices = @transform_31, window_bounds = array<i64: 1, 4, 512>}]} {
    %c0 = arith.constant 0 : index
    %c0_0 = arith.constant 0 : index
    %c0_1 = arith.constant 0 : index
    %0 = vector.load %arg1[%c0, %c0_0, %c0_1] : memref<1x32x32xf32, #tpu.memory_space<vmem>>, vector<1x32x32xf32>
    %1 = vector.shape_cast %0 : vector<1x32x32xf32> to vector<32x32xf32>
    %c0_2 = arith.constant 0 : index
    %c0_3 = arith.constant 0 : index
    %2 = vector.load %arg3[%c0_2, %c0_3] : memref<64x32xf32, #tpu.memory_space<vmem>>, vector<64x32xf32>
    %cst = arith.constant dense<0.000000e+00> : vector<64x32xf32>
    %3 = tpu.matmul %2, %1, %cst {dimension_numbers = #tpu.dot_dimension_numbers<[1], [0], [0], [1], [0, 0, 1, 1], [], []>} : vector<64x32xf32>, vector<32x32xf32>, vector<64x32xf32> -> vector<64x32xf32>
    %4 = vector.extract_strided_slice %3 {offsets = [0, 0], sizes = [16, 32], strides = [1, 1]} : vector<64x32xf32> to vector<16x32xf32>
    %c0_4 = arith.constant 0 : index
    %c0_5 = arith.constant 0 : index
    %c0_6 = arith.constant 0 : index
    %5 = vector.load %arg5[%c0_4, %c0_5, %c0_6] : memref<4x32x128xf32, #tpu.memory_space<vmem>>, vector<1x32x128xf32>
    %6 = vector.shape_cast %5 : vector<1x32x128xf32> to vector<32x128xf32>
    %cst_7 = arith.constant dense<0.000000e+00> : vector<16x128xf32>
    %7 = tpu.matmul %4, %6, %cst_7 {dimension_numbers = #tpu.dot_dimension_numbers<[1], [0], [0], [1], [0, 0, 1, 1], [], []>} : vector<16x32xf32>, vector<32x128xf32>, vector<16x128xf32> -> vector<16x128xf32>
    %8 = vector.extract_strided_slice %3 {offsets = [16, 0], sizes = [16, 32], strides = [1, 1]} : vector<64x32xf32> to vector<16x32xf32>
    %c1 = arith.constant 1 : index
    %c0_8 = arith.constant 0 : index
    %c0_9 = arith.constant 0 : index
    %9 = vector.load %arg5[%c1, %c0_8, %c0_9] : memref<4x32x128xf32, #tpu.memory_space<vmem>>, vector<1x32x128xf32>
    %10 = vector.shape_cast %9 : vector<1x32x128xf32> to vector<32x128xf32>
    %cst_10 = arith.constant dense<0.000000e+00> : vector<16x128xf32>
    %11 = tpu.matmul %8, %10, %cst_10 {dimension_numbers = #tpu.dot_dimension_numbers<[1], [0], [0], [1], [0, 0, 1, 1], [], []>} : vector<16x32xf32>, vector<32x128xf32>, vector<16x128xf32> -> vector<16x128xf32>
    %12 = arith.addf %7, %11 : vector<16x128xf32>
    %13 = vector.extract_strided_slice %3 {offsets = [32, 0], sizes = [16, 32], strides = [1, 1]} : vector<64x32xf32> to vector<16x32xf32>
    %c2 = arith.constant 2 : index
    %c0_11 = arith.constant 0 : index
    %c0_12 = arith.constant 0 : index
    %14 = vector.load %arg5[%c2, %c0_11, %c0_12] : memref<4x32x128xf32, #tpu.memory_space<vmem>>, vector<1x32x128xf32>
    %15 = vector.shape_cast %14 : vector<1x32x128xf32> to vector<32x128xf32>
    %cst_13 = arith.constant dense<0.000000e+00> : vector<16x128xf32>
    %16 = tpu.matmul %13, %15, %cst_13 {dimension_numbers = #tpu.dot_dimension_numbers<[1], [0], [0], [1], [0, 0, 1, 1], [], []>} : vector<16x32xf32>, vector<32x128xf32>, vector<16x128xf32> -> vector<16x128xf32>
    %17 = arith.addf %12, %16 : vector<16x128xf32>
    %18 = vector.extract_strided_slice %3 {offsets = [48, 0], sizes = [16, 32], strides = [1, 1]} : vector<64x32xf32> to vector<16x32xf32>
    %c3 = arith.constant 3 : index
    %c0_14 = arith.constant 0 : index
    %c0_15 = arith.constant 0 : index
    %19 = vector.load %arg5[%c3, %c0_14, %c0_15] : memref<4x32x128xf32, #tpu.memory_space<vmem>>, vector<1x32x128xf32>
    %20 = vector.shape_cast %19 : vector<1x32x128xf32> to vector<32x128xf32>
    %cst_16 = arith.constant dense<0.000000e+00> : vector<16x128xf32>
    %21 = tpu.matmul %18, %20, %cst_16 {dimension_numbers = #tpu.dot_dimension_numbers<[1], [0], [0], [1], [0, 0, 1, 1], [], []>} : vector<16x32xf32>, vector<32x128xf32>, vector<16x128xf32> -> vector<16x128xf32>
    %22 = arith.addf %17, %21 : vector<16x128xf32>
    %c0_17 = arith.constant 0 : index
    %c0_18 = arith.constant 0 : index
    %23 = vector.load %arg4[%c0_17, %c0_18] : memref<16x1xf32, #tpu.memory_space<vmem>>, vector<16x1xf32>
    %24 = vector.broadcast %23 : vector<16x1xf32> to vector<16x128xf32>
    %25 = arith.addf %22, %24 : vector<16x128xf32>
    %c0_19 = arith.constant 0 : index
    %c0_20 = arith.constant 0 : index
    %26 = vector.load %arg6[%c0_19, %c0_20] : memref<9x128xf32, #tpu.memory_space<vmem>>, vector<9x128xf32>
    %c0_21 = arith.constant 0 : index
    %c0_22 = arith.constant 0 : index
    %27 = vector.load %arg7[%c0_21, %c0_22] : memref<2x128xf32, #tpu.memory_space<vmem>>, vector<2x128xf32>
    %c0_23 = arith.constant 0 : index
    %c0_24 = arith.constant 0 : index
    %c0_25 = arith.constant 0 : index
    %28 = vector.load %arg2[%c0_23, %c0_24, %c0_25] : memref<1x16x128xf32, #tpu.memory_space<vmem>>, vector<1x16x128xf32>
    %29 = vector.shape_cast %28 : vector<1x16x128xf32> to vector<16x128xf32>
    %30 = tpu.concatenate %25, %29 in 0 : vector<16x128xf32>, vector<16x128xf32> -> vector<32x128xf32>
    %c0_26 = arith.constant 0 : index
    %c0_27 = arith.constant 0 : index
    %31 = vector.load %arg8[%c0_26, %c0_27] : memref<16x288xf32, #tpu.memory_space<vmem>>, vector<16x288xf32>
    %c9_i32 = arith.constant 9 : i32
    %32 = tpu.dynamic_rotate %30 by %c9_i32 dim 1 : vector<32x128xf32>, i32 -> vector<32x128xf32>
    %33 = vector.extract_strided_slice %26 {offsets = [0, 0], sizes = [1, 128], strides = [1, 1]} : vector<9x128xf32> to vector<1x128xf32>
    %34 = vector.broadcast %33 : vector<1x128xf32> to vector<32x128xf32>
    %35 = arith.mulf %32, %34 : vector<32x128xf32>
    %c8_i32 = arith.constant 8 : i32
    %36 = tpu.dynamic_rotate %30 by %c8_i32 dim 1 : vector<32x128xf32>, i32 -> vector<32x128xf32>
    %37 = vector.extract_strided_slice %26 {offsets = [1, 0], sizes = [1, 128], strides = [1, 1]} : vector<9x128xf32> to vector<1x128xf32>
    %38 = vector.broadcast %37 : vector<1x128xf32> to vector<32x128xf32>
    %39 = arith.mulf %36, %38 : vector<32x128xf32>
    %c7_i32 = arith.constant 7 : i32
    %40 = tpu.dynamic_rotate %30 by %c7_i32 dim 1 : vector<32x128xf32>, i32 -> vector<32x128xf32>
    %41 = vector.extract_strided_slice %26 {offsets = [2, 0], sizes = [1, 128], strides = [1, 1]} : vector<9x128xf32> to vector<1x128xf32>
    %42 = vector.broadcast %41 : vector<1x128xf32> to vector<32x128xf32>
    %43 = arith.mulf %40, %42 : vector<32x128xf32>
    %c1_i32 = arith.constant 1 : i32
    %44 = tpu.dynamic_rotate %30 by %c1_i32 dim 1 : vector<32x128xf32>, i32 -> vector<32x128xf32>
    %45 = vector.extract_strided_slice %26 {offsets = [3, 0], sizes = [1, 128], strides = [1, 1]} : vector<9x128xf32> to vector<1x128xf32>
    %46 = vector.broadcast %45 : vector<1x128xf32> to vector<32x128xf32>
    %47 = arith.mulf %44, %46 : vector<32x128xf32>
    %c127_i32 = arith.constant 127 : i32
    %48 = tpu.dynamic_rotate %30 by %c127_i32 dim 1 : vector<32x128xf32>, i32 -> vector<32x128xf32>
    %49 = vector.extract_strided_slice %26 {offsets = [5, 0], sizes = [1, 128], strides = [1, 1]} : vector<9x128xf32> to vector<1x128xf32>
    %50 = vector.broadcast %49 : vector<1x128xf32> to vector<32x128xf32>
    %51 = arith.mulf %48, %50 : vector<32x128xf32>
    %c121_i32 = arith.constant 121 : i32
    %52 = tpu.dynamic_rotate %30 by %c121_i32 dim 1 : vector<32x128xf32>, i32 -> vector<32x128xf32>
    %53 = vector.extract_strided_slice %26 {offsets = [6, 0], sizes = [1, 128], strides = [1, 1]} : vector<9x128xf32> to vector<1x128xf32>
    %54 = vector.broadcast %53 : vector<1x128xf32> to vector<32x128xf32>
    %55 = arith.mulf %52, %54 : vector<32x128xf32>
    %c120_i32 = arith.constant 120 : i32
    %56 = tpu.dynamic_rotate %30 by %c120_i32 dim 1 : vector<32x128xf32>, i32 -> vector<32x128xf32>
    %57 = vector.extract_strided_slice %26 {offsets = [7, 0], sizes = [1, 128], strides = [1, 1]} : vector<9x128xf32> to vector<1x128xf32>
    %58 = vector.broadcast %57 : vector<1x128xf32> to vector<32x128xf32>
    %59 = arith.mulf %56, %58 : vector<32x128xf32>
    %c119_i32 = arith.constant 119 : i32
    %60 = tpu.dynamic_rotate %30 by %c119_i32 dim 1 : vector<32x128xf32>, i32 -> vector<32x128xf32>
    %61 = vector.extract_strided_slice %26 {offsets = [8, 0], sizes = [1, 128], strides = [1, 1]} : vector<9x128xf32> to vector<1x128xf32>
    %62 = vector.broadcast %61 : vector<1x128xf32> to vector<32x128xf32>
    %63 = arith.mulf %60, %62 : vector<32x128xf32>
    %64 = tpu.concatenate %35, %39, %43, %47, %30, %51, %55, %59, %63 in 0 : vector<32x128xf32>, vector<32x128xf32>, vector<32x128xf32>, vector<32x128xf32>, vector<32x128xf32>, vector<32x128xf32>, vector<32x128xf32>, vector<32x128xf32>, vector<32x128xf32> -> vector<288x128xf32>
    %cst_28 = arith.constant dense<0.000000e+00> : vector<16x128xf32>
    %65 = tpu.matmul %31, %64, %cst_28 {dimension_numbers = #tpu.dot_dimension_numbers<[1], [0], [0], [1], [0, 0, 1, 1], [], []>} : vector<16x288xf32>, vector<288x128xf32>, vector<16x128xf32> -> vector<16x128xf32>
    %c0_29 = arith.constant 0 : index
    %c0_30 = arith.constant 0 : index
    %66 = vector.load %arg9[%c0_29, %c0_30] : memref<16x1xf32, #tpu.memory_space<vmem>>, vector<16x1xf32>
    %67 = vector.broadcast %66 : vector<16x1xf32> to vector<16x128xf32>
    %68 = arith.addf %65, %67 : vector<16x128xf32>
    %c0_31 = arith.constant 0 : index
    %c0_32 = arith.constant 0 : index
    %69 = vector.load %arg10[%c0_31, %c0_32] : memref<16x1xf32, #tpu.memory_space<vmem>>, vector<16x1xf32>
    %c0_33 = arith.constant 0 : index
    %c0_34 = arith.constant 0 : index
    %70 = vector.load %arg11[%c0_33, %c0_34] : memref<16x1xf32, #tpu.memory_space<vmem>>, vector<16x1xf32>
    %cst_35 = arith.constant 0.000000e+00 : f32
    %71 = vector.broadcast %cst_35 : f32 to vector<16x128xf32>
    %72 = vector.extract_strided_slice %27 {offsets = [0, 0], sizes = [1, 128], strides = [1, 1]} : vector<2x128xf32> to vector<1x128xf32>
    %73 = vector.broadcast %72 : vector<1x128xf32> to vector<16x128xf32>
    %74 = arith.mulf %68, %73 : vector<16x128xf32>
    %cst_36 = arith.constant dense<0.000000e+00> : vector<16xf32>
    %75 = vector.multi_reduction <add>, %74, %cst_36 [1] : vector<16x128xf32> to vector<16xf32>
    %76 = vector.shape_cast %75 : vector<16xf32> to vector<16x1xf32>
    %cst_37 = arith.constant 1.562500e-02 : f32
    %77 = vector.broadcast %cst_37 : f32 to vector<16x1xf32>
    %78 = arith.mulf %76, %77 : vector<16x1xf32>
    %79 = vector.broadcast %78 : vector<16x1xf32> to vector<16x128xf32>
    %80 = vector.broadcast %72 : vector<1x128xf32> to vector<16x128xf32>
    %81 = arith.mulf %79, %80 : vector<16x128xf32>
    %82 = arith.addf %71, %81 : vector<16x128xf32>
    %83 = vector.extract_strided_slice %27 {offsets = [1, 0], sizes = [1, 128], strides = [1, 1]} : vector<2x128xf32> to vector<1x128xf32>
    %84 = vector.broadcast %83 : vector<1x128xf32> to vector<16x128xf32>
    %85 = arith.mulf %68, %84 : vector<16x128xf32>
    %cst_38 = arith.constant dense<0.000000e+00> : vector<16xf32>
    %86 = vector.multi_reduction <add>, %85, %cst_38 [1] : vector<16x128xf32> to vector<16xf32>
    %87 = vector.shape_cast %86 : vector<16xf32> to vector<16x1xf32>
    %cst_39 = arith.constant 1.562500e-02 : f32
    %88 = vector.broadcast %cst_39 : f32 to vector<16x1xf32>
    %89 = arith.mulf %87, %88 : vector<16x1xf32>
    %90 = vector.broadcast %89 : vector<16x1xf32> to vector<16x128xf32>
    %91 = vector.broadcast %83 : vector<1x128xf32> to vector<16x128xf32>
    %92 = arith.mulf %90, %91 : vector<16x128xf32>
    %93 = arith.addf %82, %92 : vector<16x128xf32>
    %94 = arith.subf %68, %93 : vector<16x128xf32>
    %95 = arith.mulf %94, %94 : vector<16x128xf32>
    %cst_40 = arith.constant 0.000000e+00 : f32
    %96 = vector.broadcast %cst_40 : f32 to vector<16x128xf32>
    %97 = vector.extract_strided_slice %27 {offsets = [0, 0], sizes = [1, 128], strides = [1, 1]} : vector<2x128xf32> to vector<1x128xf32>
    %98 = vector.broadcast %97 : vector<1x128xf32> to vector<16x128xf32>
    %99 = arith.mulf %95, %98 : vector<16x128xf32>
    %cst_41 = arith.constant dense<0.000000e+00> : vector<16xf32>
    %100 = vector.multi_reduction <add>, %99, %cst_41 [1] : vector<16x128xf32> to vector<16xf32>
    %101 = vector.shape_cast %100 : vector<16xf32> to vector<16x1xf32>
    %cst_42 = arith.constant 1.562500e-02 : f32
    %102 = vector.broadcast %cst_42 : f32 to vector<16x1xf32>
    %103 = arith.mulf %101, %102 : vector<16x1xf32>
    %104 = vector.broadcast %103 : vector<16x1xf32> to vector<16x128xf32>
    %105 = vector.broadcast %97 : vector<1x128xf32> to vector<16x128xf32>
    %106 = arith.mulf %104, %105 : vector<16x128xf32>
    %107 = arith.addf %96, %106 : vector<16x128xf32>
    %108 = vector.extract_strided_slice %27 {offsets = [1, 0], sizes = [1, 128], strides = [1, 1]} : vector<2x128xf32> to vector<1x128xf32>
    %109 = vector.broadcast %108 : vector<1x128xf32> to vector<16x128xf32>
    %110 = arith.mulf %95, %109 : vector<16x128xf32>
    %cst_43 = arith.constant dense<0.000000e+00> : vector<16xf32>
    %111 = vector.multi_reduction <add>, %110, %cst_43 [1] : vector<16x128xf32> to vector<16xf32>
    %112 = vector.shape_cast %111 : vector<16xf32> to vector<16x1xf32>
    %cst_44 = arith.constant 1.562500e-02 : f32
    %113 = vector.broadcast %cst_44 : f32 to vector<16x1xf32>
    %114 = arith.mulf %112, %113 : vector<16x1xf32>
    %115 = vector.broadcast %114 : vector<16x1xf32> to vector<16x128xf32>
    %116 = vector.broadcast %108 : vector<1x128xf32> to vector<16x128xf32>
    %117 = arith.mulf %115, %116 : vector<16x128xf32>
    %118 = arith.addf %107, %117 : vector<16x128xf32>
    %cst_45 = arith.constant 9.99999974E-6 : f32
    %119 = vector.broadcast %cst_45 : f32 to vector<16x128xf32>
    %120 = arith.addf %118, %119 : vector<16x128xf32>
    %121 = math.rsqrt %120 : vector<16x128xf32>
    %122 = arith.mulf %94, %121 : vector<16x128xf32>
    %123 = vector.broadcast %69 : vector<16x1xf32> to vector<16x128xf32>
    %124 = arith.mulf %122, %123 : vector<16x128xf32>
    %125 = vector.broadcast %70 : vector<16x1xf32> to vector<16x128xf32>
    %126 = arith.addf %124, %125 : vector<16x128xf32>
    %cst_46 = arith.constant 0.000000e+00 : f32
    %127 = vector.broadcast %cst_46 : f32 to vector<16x128xf32>
    %128 = arith.cmpf ogt, %126, %127 : vector<16x128xf32>
    %cst_47 = arith.constant 0.00999999977 : f32
    %129 = vector.broadcast %cst_47 : f32 to vector<16x128xf32>
    %130 = arith.mulf %129, %126 : vector<16x128xf32>
    %131 = arith.select %128, %126, %130 : vector<16x128xi1>, vector<16x128xf32>
    %c0_48 = arith.constant 0 : index
    %c0_49 = arith.constant 0 : index
    %132 = vector.load %arg12[%c0_48, %c0_49] : memref<16x144xf32, #tpu.memory_space<vmem>>, vector<16x144xf32>
    %c9_i32_50 = arith.constant 9 : i32
    %133 = tpu.dynamic_rotate %131 by %c9_i32_50 dim 1 : vector<16x128xf32>, i32 -> vector<16x128xf32>
    %134 = vector.extract_strided_slice %26 {offsets = [0, 0], sizes = [1, 128], strides = [1, 1]} : vector<9x128xf32> to vector<1x128xf32>
    %135 = vector.broadcast %134 : vector<1x128xf32> to vector<16x128xf32>
    %136 = arith.mulf %133, %135 : vector<16x128xf32>
    %c8_i32_51 = arith.constant 8 : i32
    %137 = tpu.dynamic_rotate %131 by %c8_i32_51 dim 1 : vector<16x128xf32>, i32 -> vector<16x128xf32>
    %138 = vector.extract_strided_slice %26 {offsets = [1, 0], sizes = [1, 128], strides = [1, 1]} : vector<9x128xf32> to vector<1x128xf32>
    %139 = vector.broadcast %138 : vector<1x128xf32> to vector<16x128xf32>
    %140 = arith.mulf %137, %139 : vector<16x128xf32>
    %c7_i32_52 = arith.constant 7 : i32
    %141 = tpu.dynamic_rotate %131 by %c7_i32_52 dim 1 : vector<16x128xf32>, i32 -> vector<16x128xf32>
    %142 = vector.extract_strided_slice %26 {offsets = [2, 0], sizes = [1, 128], strides = [1, 1]} : vector<9x128xf32> to vector<1x128xf32>
    %143 = vector.broadcast %142 : vector<1x128xf32> to vector<16x128xf32>
    %144 = arith.mulf %141, %143 : vector<16x128xf32>
    %c1_i32_53 = arith.constant 1 : i32
    %145 = tpu.dynamic_rotate %131 by %c1_i32_53 dim 1 : vector<16x128xf32>, i32 -> vector<16x128xf32>
    %146 = vector.extract_strided_slice %26 {offsets = [3, 0], sizes = [1, 128], strides = [1, 1]} : vector<9x128xf32> to vector<1x128xf32>
    %147 = vector.broadcast %146 : vector<1x128xf32> to vector<16x128xf32>
    %148 = arith.mulf %145, %147 : vector<16x128xf32>
    %c127_i32_54 = arith.constant 127 : i32
    %149 = tpu.dynamic_rotate %131 by %c127_i32_54 dim 1 : vector<16x128xf32>, i32 -> vector<16x128xf32>
    %150 = vector.extract_strided_slice %26 {offsets = [5, 0], sizes = [1, 128], strides = [1, 1]} : vector<9x128xf32> to vector<1x128xf32>
    %151 = vector.broadcast %150 : vector<1x128xf32> to vector<16x128xf32>
    %152 = arith.mulf %149, %151 : vector<16x128xf32>
    %c121_i32_55 = arith.constant 121 : i32
    %153 = tpu.dynamic_rotate %131 by %c121_i32_55 dim 1 : vector<16x128xf32>, i32 -> vector<16x128xf32>
    %154 = vector.extract_strided_slice %26 {offsets = [6, 0], sizes = [1, 128], strides = [1, 1]} : vector<9x128xf32> to vector<1x128xf32>
    %155 = vector.broadcast %154 : vector<1x128xf32> to vector<16x128xf32>
    %156 = arith.mulf %153, %155 : vector<16x128xf32>
    %c120_i32_56 = arith.constant 120 : i32
    %157 = tpu.dynamic_rotate %131 by %c120_i32_56 dim 1 : vector<16x128xf32>, i32 -> vector<16x128xf32>
    %158 = vector.extract_strided_slice %26 {offsets = [7, 0], sizes = [1, 128], strides = [1, 1]} : vector<9x128xf32> to vector<1x128xf32>
    %159 = vector.broadcast %158 : vector<1x128xf32> to vector<16x128xf32>
    %160 = arith.mulf %157, %159 : vector<16x128xf32>
    %c119_i32_57 = arith.constant 119 : i32
    %161 = tpu.dynamic_rotate %131 by %c119_i32_57 dim 1 : vector<16x128xf32>, i32 -> vector<16x128xf32>
    %162 = vector.extract_strided_slice %26 {offsets = [8, 0], sizes = [1, 128], strides = [1, 1]} : vector<9x128xf32> to vector<1x128xf32>
    %163 = vector.broadcast %162 : vector<1x128xf32> to vector<16x128xf32>
    %164 = arith.mulf %161, %163 : vector<16x128xf32>
    %165 = tpu.concatenate %136, %140, %144, %148, %131, %152, %156, %160, %164 in 0 : vector<16x128xf32>, vector<16x128xf32>, vector<16x128xf32>, vector<16x128xf32>, vector<16x128xf32>, vector<16x128xf32>, vector<16x128xf32>, vector<16x128xf32>, vector<16x128xf32> -> vector<144x128xf32>
    %cst_58 = arith.constant dense<0.000000e+00> : vector<16x128xf32>
    %166 = tpu.matmul %132, %165, %cst_58 {dimension_numbers = #tpu.dot_dimension_numbers<[1], [0], [0], [1], [0, 0, 1, 1], [], []>} : vector<16x144xf32>, vector<144x128xf32>, vector<16x128xf32> -> vector<16x128xf32>
    %c0_59 = arith.constant 0 : index
    %c0_60 = arith.constant 0 : index
    %167 = vector.load %arg13[%c0_59, %c0_60] : memref<16x1xf32, #tpu.memory_space<vmem>>, vector<16x1xf32>
    %168 = vector.broadcast %167 : vector<16x1xf32> to vector<16x128xf32>
    %169 = arith.addf %166, %168 : vector<16x128xf32>
    %c0_61 = arith.constant 0 : index
    %c0_62 = arith.constant 0 : index
    %170 = vector.load %arg14[%c0_61, %c0_62] : memref<16x1xf32, #tpu.memory_space<vmem>>, vector<16x1xf32>
    %c0_63 = arith.constant 0 : index
    %c0_64 = arith.constant 0 : index
    %171 = vector.load %arg15[%c0_63, %c0_64] : memref<16x1xf32, #tpu.memory_space<vmem>>, vector<16x1xf32>
    %cst_65 = arith.constant 0.000000e+00 : f32
    %172 = vector.broadcast %cst_65 : f32 to vector<16x128xf32>
    %173 = vector.extract_strided_slice %27 {offsets = [0, 0], sizes = [1, 128], strides = [1, 1]} : vector<2x128xf32> to vector<1x128xf32>
    %174 = vector.broadcast %173 : vector<1x128xf32> to vector<16x128xf32>
    %175 = arith.mulf %169, %174 : vector<16x128xf32>
    %cst_66 = arith.constant dense<0.000000e+00> : vector<16xf32>
    %176 = vector.multi_reduction <add>, %175, %cst_66 [1] : vector<16x128xf32> to vector<16xf32>
    %177 = vector.shape_cast %176 : vector<16xf32> to vector<16x1xf32>
    %cst_67 = arith.constant 1.562500e-02 : f32
    %178 = vector.broadcast %cst_67 : f32 to vector<16x1xf32>
    %179 = arith.mulf %177, %178 : vector<16x1xf32>
    %180 = vector.broadcast %179 : vector<16x1xf32> to vector<16x128xf32>
    %181 = vector.broadcast %173 : vector<1x128xf32> to vector<16x128xf32>
    %182 = arith.mulf %180, %181 : vector<16x128xf32>
    %183 = arith.addf %172, %182 : vector<16x128xf32>
    %184 = vector.extract_strided_slice %27 {offsets = [1, 0], sizes = [1, 128], strides = [1, 1]} : vector<2x128xf32> to vector<1x128xf32>
    %185 = vector.broadcast %184 : vector<1x128xf32> to vector<16x128xf32>
    %186 = arith.mulf %169, %185 : vector<16x128xf32>
    %cst_68 = arith.constant dense<0.000000e+00> : vector<16xf32>
    %187 = vector.multi_reduction <add>, %186, %cst_68 [1] : vector<16x128xf32> to vector<16xf32>
    %188 = vector.shape_cast %187 : vector<16xf32> to vector<16x1xf32>
    %cst_69 = arith.constant 1.562500e-02 : f32
    %189 = vector.broadcast %cst_69 : f32 to vector<16x1xf32>
    %190 = arith.mulf %188, %189 : vector<16x1xf32>
    %191 = vector.broadcast %190 : vector<16x1xf32> to vector<16x128xf32>
    %192 = vector.broadcast %184 : vector<1x128xf32> to vector<16x128xf32>
    %193 = arith.mulf %191, %192 : vector<16x128xf32>
    %194 = arith.addf %183, %193 : vector<16x128xf32>
    %195 = arith.subf %169, %194 : vector<16x128xf32>
    %196 = arith.mulf %195, %195 : vector<16x128xf32>
    %cst_70 = arith.constant 0.000000e+00 : f32
    %197 = vector.broadcast %cst_70 : f32 to vector<16x128xf32>
    %198 = vector.extract_strided_slice %27 {offsets = [0, 0], sizes = [1, 128], strides = [1, 1]} : vector<2x128xf32> to vector<1x128xf32>
    %199 = vector.broadcast %198 : vector<1x128xf32> to vector<16x128xf32>
    %200 = arith.mulf %196, %199 : vector<16x128xf32>
    %cst_71 = arith.constant dense<0.000000e+00> : vector<16xf32>
    %201 = vector.multi_reduction <add>, %200, %cst_71 [1] : vector<16x128xf32> to vector<16xf32>
    %202 = vector.shape_cast %201 : vector<16xf32> to vector<16x1xf32>
    %cst_72 = arith.constant 1.562500e-02 : f32
    %203 = vector.broadcast %cst_72 : f32 to vector<16x1xf32>
    %204 = arith.mulf %202, %203 : vector<16x1xf32>
    %205 = vector.broadcast %204 : vector<16x1xf32> to vector<16x128xf32>
    %206 = vector.broadcast %198 : vector<1x128xf32> to vector<16x128xf32>
    %207 = arith.mulf %205, %206 : vector<16x128xf32>
    %208 = arith.addf %197, %207 : vector<16x128xf32>
    %209 = vector.extract_strided_slice %27 {offsets = [1, 0], sizes = [1, 128], strides = [1, 1]} : vector<2x128xf32> to vector<1x128xf32>
    %210 = vector.broadcast %209 : vector<1x128xf32> to vector<16x128xf32>
    %211 = arith.mulf %196, %210 : vector<16x128xf32>
    %cst_73 = arith.constant dense<0.000000e+00> : vector<16xf32>
    %212 = vector.multi_reduction <add>, %211, %cst_73 [1] : vector<16x128xf32> to vector<16xf32>
    %213 = vector.shape_cast %212 : vector<16xf32> to vector<16x1xf32>
    %cst_74 = arith.constant 1.562500e-02 : f32
    %214 = vector.broadcast %cst_74 : f32 to vector<16x1xf32>
    %215 = arith.mulf %213, %214 : vector<16x1xf32>
    %216 = vector.broadcast %215 : vector<16x1xf32> to vector<16x128xf32>
    %217 = vector.broadcast %209 : vector<1x128xf32> to vector<16x128xf32>
    %218 = arith.mulf %216, %217 : vector<16x128xf32>
    %219 = arith.addf %208, %218 : vector<16x128xf32>
    %cst_75 = arith.constant 9.99999974E-6 : f32
    %220 = vector.broadcast %cst_75 : f32 to vector<16x128xf32>
    %221 = arith.addf %219, %220 : vector<16x128xf32>
    %222 = math.rsqrt %221 : vector<16x128xf32>
    %223 = arith.mulf %195, %222 : vector<16x128xf32>
    %224 = vector.broadcast %170 : vector<16x1xf32> to vector<16x128xf32>
    %225 = arith.mulf %223, %224 : vector<16x128xf32>
    %226 = vector.broadcast %171 : vector<16x1xf32> to vector<16x128xf32>
    %227 = arith.addf %225, %226 : vector<16x128xf32>
    %cst_76 = arith.constant 0.000000e+00 : f32
    %228 = vector.broadcast %cst_76 : f32 to vector<16x128xf32>
    %229 = arith.cmpf ogt, %227, %228 : vector<16x128xf32>
    %cst_77 = arith.constant 0.00999999977 : f32
    %230 = vector.broadcast %cst_77 : f32 to vector<16x128xf32>
    %231 = arith.mulf %230, %227 : vector<16x128xf32>
    %232 = arith.select %229, %227, %231 : vector<16x128xi1>, vector<16x128xf32>
    %c0_78 = arith.constant 0 : index
    %c0_79 = arith.constant 0 : index
    %233 = vector.load %arg17[%c0_78, %c0_79] : memref<32x16xf32, #tpu.memory_space<vmem>>, vector<32x16xf32>
    %cst_80 = arith.constant dense<0.000000e+00> : vector<32x128xf32>
    %234 = tpu.matmul %233, %232, %cst_80 {dimension_numbers = #tpu.dot_dimension_numbers<[1], [0], [0], [1], [0, 0, 1, 1], [], []>} : vector<32x16xf32>, vector<16x128xf32>, vector<32x128xf32> -> vector<32x128xf32>
    %235 = vector.extract_strided_slice %234 {offsets = [0, 0], sizes = [8, 128], strides = [1, 1]} : vector<32x128xf32> to vector<8x128xf32>
    %c0_81 = arith.constant 0 : index
    %c0_82 = arith.constant 0 : index
    %c0_83 = arith.constant 0 : index
    %236 = vector.load %arg19[%c0_81, %c0_82, %c0_83] : memref<4x128x512xf32, #tpu.memory_space<vmem>>, vector<1x128x512xf32>
    %237 = vector.shape_cast %236 : vector<1x128x512xf32> to vector<128x512xf32>
    %cst_84 = arith.constant dense<0.000000e+00> : vector<8x512xf32>
    %238 = tpu.matmul %235, %237, %cst_84 {dimension_numbers = #tpu.dot_dimension_numbers<[1], [0], [0], [1], [0, 0, 1, 1], [], []>} : vector<8x128xf32>, vector<128x512xf32>, vector<8x512xf32> -> vector<8x512xf32>
    %239 = vector.extract_strided_slice %234 {offsets = [8, 0], sizes = [8, 128], strides = [1, 1]} : vector<32x128xf32> to vector<8x128xf32>
    %c1_85 = arith.constant 1 : index
    %c0_86 = arith.constant 0 : index
    %c0_87 = arith.constant 0 : index
    %240 = vector.load %arg19[%c1_85, %c0_86, %c0_87] : memref<4x128x512xf32, #tpu.memory_space<vmem>>, vector<1x128x512xf32>
    %241 = vector.shape_cast %240 : vector<1x128x512xf32> to vector<128x512xf32>
    %cst_88 = arith.constant dense<0.000000e+00> : vector<8x512xf32>
    %242 = tpu.matmul %239, %241, %cst_88 {dimension_numbers = #tpu.dot_dimension_numbers<[1], [0], [0], [1], [0, 0, 1, 1], [], []>} : vector<8x128xf32>, vector<128x512xf32>, vector<8x512xf32> -> vector<8x512xf32>
    %243 = arith.addf %238, %242 : vector<8x512xf32>
    %244 = vector.extract_strided_slice %234 {offsets = [16, 0], sizes = [8, 128], strides = [1, 1]} : vector<32x128xf32> to vector<8x128xf32>
    %c2_89 = arith.constant 2 : index
    %c0_90 = arith.constant 0 : index
    %c0_91 = arith.constant 0 : index
    %245 = vector.load %arg19[%c2_89, %c0_90, %c0_91] : memref<4x128x512xf32, #tpu.memory_space<vmem>>, vector<1x128x512xf32>
    %246 = vector.shape_cast %245 : vector<1x128x512xf32> to vector<128x512xf32>
    %cst_92 = arith.constant dense<0.000000e+00> : vector<8x512xf32>
    %247 = tpu.matmul %244, %246, %cst_92 {dimension_numbers = #tpu.dot_dimension_numbers<[1], [0], [0], [1], [0, 0, 1, 1], [], []>} : vector<8x128xf32>, vector<128x512xf32>, vector<8x512xf32> -> vector<8x512xf32>
    %248 = arith.addf %243, %247 : vector<8x512xf32>
    %249 = vector.extract_strided_slice %234 {offsets = [24, 0], sizes = [8, 128], strides = [1, 1]} : vector<32x128xf32> to vector<8x128xf32>
    %c3_93 = arith.constant 3 : index
    %c0_94 = arith.constant 0 : index
    %c0_95 = arith.constant 0 : index
    %250 = vector.load %arg19[%c3_93, %c0_94, %c0_95] : memref<4x128x512xf32, #tpu.memory_space<vmem>>, vector<1x128x512xf32>
    %251 = vector.shape_cast %250 : vector<1x128x512xf32> to vector<128x512xf32>
    %cst_96 = arith.constant dense<0.000000e+00> : vector<8x512xf32>
    %252 = tpu.matmul %249, %251, %cst_96 {dimension_numbers = #tpu.dot_dimension_numbers<[1], [0], [0], [1], [0, 0, 1, 1], [], []>} : vector<8x128xf32>, vector<128x512xf32>, vector<8x512xf32> -> vector<8x512xf32>
    %253 = arith.addf %248, %252 : vector<8x512xf32>
    %c0_97 = arith.constant 0 : index
    %c0_98 = arith.constant 0 : index
    %254 = vector.load %arg18[%c0_97, %c0_98] : memref<8x1xf32, #tpu.memory_space<vmem>>, vector<8x1xf32>
    %255 = vector.broadcast %254 : vector<8x1xf32> to vector<8x512xf32>
    %256 = arith.addf %253, %255 : vector<8x512xf32>
    %c0_99 = arith.constant 0 : index
    %c0_100 = arith.constant 0 : index
    %257 = vector.load %arg20[%c0_99, %c0_100] : memref<9x512xf32, #tpu.memory_space<vmem>>, vector<9x512xf32>
    %c0_101 = arith.constant 0 : index
    %c0_102 = arith.constant 0 : index
    %258 = vector.load %arg21[%c0_101, %c0_102] : memref<2x512xf32, #tpu.memory_space<vmem>>, vector<2x512xf32>
    %c0_103 = arith.constant 0 : index
    %c0_104 = arith.constant 0 : index
    %c0_105 = arith.constant 0 : index
    %259 = vector.load %arg16[%c0_103, %c0_104, %c0_105] : memref<1x8x512xf32, #tpu.memory_space<vmem>>, vector<1x8x512xf32>
    %260 = vector.shape_cast %259 : vector<1x8x512xf32> to vector<8x512xf32>
    %261 = tpu.concatenate %256, %260 in 0 : vector<8x512xf32>, vector<8x512xf32> -> vector<16x512xf32>
    %c0_106 = arith.constant 0 : index
    %c0_107 = arith.constant 0 : index
    %262 = vector.load %arg22[%c0_106, %c0_107] : memref<8x144xf32, #tpu.memory_space<vmem>>, vector<8x144xf32>
    %c17_i32 = arith.constant 17 : i32
    %263 = tpu.dynamic_rotate %261 by %c17_i32 dim 1 : vector<16x512xf32>, i32 -> vector<16x512xf32>
    %264 = vector.extract_strided_slice %257 {offsets = [0, 0], sizes = [1, 512], strides = [1, 1]} : vector<9x512xf32> to vector<1x512xf32>
    %265 = vector.broadcast %264 : vector<1x512xf32> to vector<16x512xf32>
    %266 = arith.mulf %263, %265 : vector<16x512xf32>
    %c16_i32 = arith.constant 16 : i32
    %267 = tpu.dynamic_rotate %261 by %c16_i32 dim 1 : vector<16x512xf32>, i32 -> vector<16x512xf32>
    %268 = vector.extract_strided_slice %257 {offsets = [1, 0], sizes = [1, 512], strides = [1, 1]} : vector<9x512xf32> to vector<1x512xf32>
    %269 = vector.broadcast %268 : vector<1x512xf32> to vector<16x512xf32>
    %270 = arith.mulf %267, %269 : vector<16x512xf32>
    %c15_i32 = arith.constant 15 : i32
    %271 = tpu.dynamic_rotate %261 by %c15_i32 dim 1 : vector<16x512xf32>, i32 -> vector<16x512xf32>
    %272 = vector.extract_strided_slice %257 {offsets = [2, 0], sizes = [1, 512], strides = [1, 1]} : vector<9x512xf32> to vector<1x512xf32>
    %273 = vector.broadcast %272 : vector<1x512xf32> to vector<16x512xf32>
    %274 = arith.mulf %271, %273 : vector<16x512xf32>
    %c1_i32_108 = arith.constant 1 : i32
    %275 = tpu.dynamic_rotate %261 by %c1_i32_108 dim 1 : vector<16x512xf32>, i32 -> vector<16x512xf32>
    %276 = vector.extract_strided_slice %257 {offsets = [3, 0], sizes = [1, 512], strides = [1, 1]} : vector<9x512xf32> to vector<1x512xf32>
    %277 = vector.broadcast %276 : vector<1x512xf32> to vector<16x512xf32>
    %278 = arith.mulf %275, %277 : vector<16x512xf32>
    %c511_i32 = arith.constant 511 : i32
    %279 = tpu.dynamic_rotate %261 by %c511_i32 dim 1 : vector<16x512xf32>, i32 -> vector<16x512xf32>
    %280 = vector.extract_strided_slice %257 {offsets = [5, 0], sizes = [1, 512], strides = [1, 1]} : vector<9x512xf32> to vector<1x512xf32>
    %281 = vector.broadcast %280 : vector<1x512xf32> to vector<16x512xf32>
    %282 = arith.mulf %279, %281 : vector<16x512xf32>
    %c497_i32 = arith.constant 497 : i32
    %283 = tpu.dynamic_rotate %261 by %c497_i32 dim 1 : vector<16x512xf32>, i32 -> vector<16x512xf32>
    %284 = vector.extract_strided_slice %257 {offsets = [6, 0], sizes = [1, 512], strides = [1, 1]} : vector<9x512xf32> to vector<1x512xf32>
    %285 = vector.broadcast %284 : vector<1x512xf32> to vector<16x512xf32>
    %286 = arith.mulf %283, %285 : vector<16x512xf32>
    %c496_i32 = arith.constant 496 : i32
    %287 = tpu.dynamic_rotate %261 by %c496_i32 dim 1 : vector<16x512xf32>, i32 -> vector<16x512xf32>
    %288 = vector.extract_strided_slice %257 {offsets = [7, 0], sizes = [1, 512], strides = [1, 1]} : vector<9x512xf32> to vector<1x512xf32>
    %289 = vector.broadcast %288 : vector<1x512xf32> to vector<16x512xf32>
    %290 = arith.mulf %287, %289 : vector<16x512xf32>
    %c495_i32 = arith.constant 495 : i32
    %291 = tpu.dynamic_rotate %261 by %c495_i32 dim 1 : vector<16x512xf32>, i32 -> vector<16x512xf32>
    %292 = vector.extract_strided_slice %257 {offsets = [8, 0], sizes = [1, 512], strides = [1, 1]} : vector<9x512xf32> to vector<1x512xf32>
    %293 = vector.broadcast %292 : vector<1x512xf32> to vector<16x512xf32>
    %294 = arith.mulf %291, %293 : vector<16x512xf32>
    %295 = tpu.concatenate %266, %270, %274, %278, %261, %282, %286, %290, %294 in 0 : vector<16x512xf32>, vector<16x512xf32>, vector<16x512xf32>, vector<16x512xf32>, vector<16x512xf32>, vector<16x512xf32>, vector<16x512xf32>, vector<16x512xf32>, vector<16x512xf32> -> vector<144x512xf32>
    %cst_109 = arith.constant dense<0.000000e+00> : vector<8x512xf32>
    %296 = tpu.matmul %262, %295, %cst_109 {dimension_numbers = #tpu.dot_dimension_numbers<[1], [0], [0], [1], [0, 0, 1, 1], [], []>} : vector<8x144xf32>, vector<144x512xf32>, vector<8x512xf32> -> vector<8x512xf32>
    %c0_110 = arith.constant 0 : index
    %c0_111 = arith.constant 0 : index
    %297 = vector.load %arg23[%c0_110, %c0_111] : memref<8x1xf32, #tpu.memory_space<vmem>>, vector<8x1xf32>
    %298 = vector.broadcast %297 : vector<8x1xf32> to vector<8x512xf32>
    %299 = arith.addf %296, %298 : vector<8x512xf32>
    %c0_112 = arith.constant 0 : index
    %c0_113 = arith.constant 0 : index
    %300 = vector.load %arg24[%c0_112, %c0_113] : memref<8x1xf32, #tpu.memory_space<vmem>>, vector<8x1xf32>
    %c0_114 = arith.constant 0 : index
    %c0_115 = arith.constant 0 : index
    %301 = vector.load %arg25[%c0_114, %c0_115] : memref<8x1xf32, #tpu.memory_space<vmem>>, vector<8x1xf32>
    %cst_116 = arith.constant 0.000000e+00 : f32
    %302 = vector.broadcast %cst_116 : f32 to vector<8x512xf32>
    %303 = vector.extract_strided_slice %258 {offsets = [0, 0], sizes = [1, 512], strides = [1, 1]} : vector<2x512xf32> to vector<1x512xf32>
    %304 = vector.broadcast %303 : vector<1x512xf32> to vector<8x512xf32>
    %305 = arith.mulf %299, %304 : vector<8x512xf32>
    %cst_117 = arith.constant dense<0.000000e+00> : vector<8xf32>
    %306 = vector.multi_reduction <add>, %305, %cst_117 [1] : vector<8x512xf32> to vector<8xf32>
    %307 = vector.shape_cast %306 : vector<8xf32> to vector<8x1xf32>
    %cst_118 = arith.constant 3.906250e-03 : f32
    %308 = vector.broadcast %cst_118 : f32 to vector<8x1xf32>
    %309 = arith.mulf %307, %308 : vector<8x1xf32>
    %310 = vector.broadcast %309 : vector<8x1xf32> to vector<8x512xf32>
    %311 = vector.broadcast %303 : vector<1x512xf32> to vector<8x512xf32>
    %312 = arith.mulf %310, %311 : vector<8x512xf32>
    %313 = arith.addf %302, %312 : vector<8x512xf32>
    %314 = vector.extract_strided_slice %258 {offsets = [1, 0], sizes = [1, 512], strides = [1, 1]} : vector<2x512xf32> to vector<1x512xf32>
    %315 = vector.broadcast %314 : vector<1x512xf32> to vector<8x512xf32>
    %316 = arith.mulf %299, %315 : vector<8x512xf32>
    %cst_119 = arith.constant dense<0.000000e+00> : vector<8xf32>
    %317 = vector.multi_reduction <add>, %316, %cst_119 [1] : vector<8x512xf32> to vector<8xf32>
    %318 = vector.shape_cast %317 : vector<8xf32> to vector<8x1xf32>
    %cst_120 = arith.constant 3.906250e-03 : f32
    %319 = vector.broadcast %cst_120 : f32 to vector<8x1xf32>
    %320 = arith.mulf %318, %319 : vector<8x1xf32>
    %321 = vector.broadcast %320 : vector<8x1xf32> to vector<8x512xf32>
    %322 = vector.broadcast %314 : vector<1x512xf32> to vector<8x512xf32>
    %323 = arith.mulf %321, %322 : vector<8x512xf32>
    %324 = arith.addf %313, %323 : vector<8x512xf32>
    %325 = arith.subf %299, %324 : vector<8x512xf32>
    %326 = arith.mulf %325, %325 : vector<8x512xf32>
    %cst_121 = arith.constant 0.000000e+00 : f32
    %327 = vector.broadcast %cst_121 : f32 to vector<8x512xf32>
    %328 = vector.extract_strided_slice %258 {offsets = [0, 0], sizes = [1, 512], strides = [1, 1]} : vector<2x512xf32> to vector<1x512xf32>
    %329 = vector.broadcast %328 : vector<1x512xf32> to vector<8x512xf32>
    %330 = arith.mulf %326, %329 : vector<8x512xf32>
    %cst_122 = arith.constant dense<0.000000e+00> : vector<8xf32>
    %331 = vector.multi_reduction <add>, %330, %cst_122 [1] : vector<8x512xf32> to vector<8xf32>
    %332 = vector.shape_cast %331 : vector<8xf32> to vector<8x1xf32>
    %cst_123 = arith.constant 3.906250e-03 : f32
    %333 = vector.broadcast %cst_123 : f32 to vector<8x1xf32>
    %334 = arith.mulf %332, %333 : vector<8x1xf32>
    %335 = vector.broadcast %334 : vector<8x1xf32> to vector<8x512xf32>
    %336 = vector.broadcast %328 : vector<1x512xf32> to vector<8x512xf32>
    %337 = arith.mulf %335, %336 : vector<8x512xf32>
    %338 = arith.addf %327, %337 : vector<8x512xf32>
    %339 = vector.extract_strided_slice %258 {offsets = [1, 0], sizes = [1, 512], strides = [1, 1]} : vector<2x512xf32> to vector<1x512xf32>
    %340 = vector.broadcast %339 : vector<1x512xf32> to vector<8x512xf32>
    %341 = arith.mulf %326, %340 : vector<8x512xf32>
    %cst_124 = arith.constant dense<0.000000e+00> : vector<8xf32>
    %342 = vector.multi_reduction <add>, %341, %cst_124 [1] : vector<8x512xf32> to vector<8xf32>
    %343 = vector.shape_cast %342 : vector<8xf32> to vector<8x1xf32>
    %cst_125 = arith.constant 3.906250e-03 : f32
    %344 = vector.broadcast %cst_125 : f32 to vector<8x1xf32>
    %345 = arith.mulf %343, %344 : vector<8x1xf32>
    %346 = vector.broadcast %345 : vector<8x1xf32> to vector<8x512xf32>
    %347 = vector.broadcast %339 : vector<1x512xf32> to vector<8x512xf32>
    %348 = arith.mulf %346, %347 : vector<8x512xf32>
    %349 = arith.addf %338, %348 : vector<8x512xf32>
    %cst_126 = arith.constant 9.99999974E-6 : f32
    %350 = vector.broadcast %cst_126 : f32 to vector<8x512xf32>
    %351 = arith.addf %349, %350 : vector<8x512xf32>
    %352 = math.rsqrt %351 : vector<8x512xf32>
    %353 = arith.mulf %325, %352 : vector<8x512xf32>
    %354 = vector.broadcast %300 : vector<8x1xf32> to vector<8x512xf32>
    %355 = arith.mulf %353, %354 : vector<8x512xf32>
    %356 = vector.broadcast %301 : vector<8x1xf32> to vector<8x512xf32>
    %357 = arith.addf %355, %356 : vector<8x512xf32>
    %cst_127 = arith.constant 0.000000e+00 : f32
    %358 = vector.broadcast %cst_127 : f32 to vector<8x512xf32>
    %359 = arith.cmpf ogt, %357, %358 : vector<8x512xf32>
    %cst_128 = arith.constant 0.00999999977 : f32
    %360 = vector.broadcast %cst_128 : f32 to vector<8x512xf32>
    %361 = arith.mulf %360, %357 : vector<8x512xf32>
    %362 = arith.select %359, %357, %361 : vector<8x512xi1>, vector<8x512xf32>
    %c0_129 = arith.constant 0 : index
    %c0_130 = arith.constant 0 : index
    %363 = vector.load %arg26[%c0_129, %c0_130] : memref<8x72xf32, #tpu.memory_space<vmem>>, vector<8x72xf32>
    %c17_i32_131 = arith.constant 17 : i32
    %364 = tpu.dynamic_rotate %362 by %c17_i32_131 dim 1 : vector<8x512xf32>, i32 -> vector<8x512xf32>
    %365 = vector.extract_strided_slice %257 {offsets = [0, 0], sizes = [1, 512], strides = [1, 1]} : vector<9x512xf32> to vector<1x512xf32>
    %366 = vector.broadcast %365 : vector<1x512xf32> to vector<8x512xf32>
    %367 = arith.mulf %364, %366 : vector<8x512xf32>
    %c16_i32_132 = arith.constant 16 : i32
    %368 = tpu.dynamic_rotate %362 by %c16_i32_132 dim 1 : vector<8x512xf32>, i32 -> vector<8x512xf32>
    %369 = vector.extract_strided_slice %257 {offsets = [1, 0], sizes = [1, 512], strides = [1, 1]} : vector<9x512xf32> to vector<1x512xf32>
    %370 = vector.broadcast %369 : vector<1x512xf32> to vector<8x512xf32>
    %371 = arith.mulf %368, %370 : vector<8x512xf32>
    %c15_i32_133 = arith.constant 15 : i32
    %372 = tpu.dynamic_rotate %362 by %c15_i32_133 dim 1 : vector<8x512xf32>, i32 -> vector<8x512xf32>
    %373 = vector.extract_strided_slice %257 {offsets = [2, 0], sizes = [1, 512], strides = [1, 1]} : vector<9x512xf32> to vector<1x512xf32>
    %374 = vector.broadcast %373 : vector<1x512xf32> to vector<8x512xf32>
    %375 = arith.mulf %372, %374 : vector<8x512xf32>
    %c1_i32_134 = arith.constant 1 : i32
    %376 = tpu.dynamic_rotate %362 by %c1_i32_134 dim 1 : vector<8x512xf32>, i32 -> vector<8x512xf32>
    %377 = vector.extract_strided_slice %257 {offsets = [3, 0], sizes = [1, 512], strides = [1, 1]} : vector<9x512xf32> to vector<1x512xf32>
    %378 = vector.broadcast %377 : vector<1x512xf32> to vector<8x512xf32>
    %379 = arith.mulf %376, %378 : vector<8x512xf32>
    %c511_i32_135 = arith.constant 511 : i32
    %380 = tpu.dynamic_rotate %362 by %c511_i32_135 dim 1 : vector<8x512xf32>, i32 -> vector<8x512xf32>
    %381 = vector.extract_strided_slice %257 {offsets = [5, 0], sizes = [1, 512], strides = [1, 1]} : vector<9x512xf32> to vector<1x512xf32>
    %382 = vector.broadcast %381 : vector<1x512xf32> to vector<8x512xf32>
    %383 = arith.mulf %380, %382 : vector<8x512xf32>
    %c497_i32_136 = arith.constant 497 : i32
    %384 = tpu.dynamic_rotate %362 by %c497_i32_136 dim 1 : vector<8x512xf32>, i32 -> vector<8x512xf32>
    %385 = vector.extract_strided_slice %257 {offsets = [6, 0], sizes = [1, 512], strides = [1, 1]} : vector<9x512xf32> to vector<1x512xf32>
    %386 = vector.broadcast %385 : vector<1x512xf32> to vector<8x512xf32>
    %387 = arith.mulf %384, %386 : vector<8x512xf32>
    %c496_i32_137 = arith.constant 496 : i32
    %388 = tpu.dynamic_rotate %362 by %c496_i32_137 dim 1 : vector<8x512xf32>, i32 -> vector<8x512xf32>
    %389 = vector.extract_strided_slice %257 {offsets = [7, 0], sizes = [1, 512], strides = [1, 1]} : vector<9x512xf32> to vector<1x512xf32>
    %390 = vector.broadcast %389 : vector<1x512xf32> to vector<8x512xf32>
    %391 = arith.mulf %388, %390 : vector<8x512xf32>
    %c495_i32_138 = arith.constant 495 : i32
    %392 = tpu.dynamic_rotate %362 by %c495_i32_138 dim 1 : vector<8x512xf32>, i32 -> vector<8x512xf32>
    %393 = vector.extract_strided_slice %257 {offsets = [8, 0], sizes = [1, 512], strides = [1, 1]} : vector<9x512xf32> to vector<1x512xf32>
    %394 = vector.broadcast %393 : vector<1x512xf32> to vector<8x512xf32>
    %395 = arith.mulf %392, %394 : vector<8x512xf32>
    %396 = tpu.concatenate %367, %371, %375, %379, %362, %383, %387, %391, %395 in 0 : vector<8x512xf32>, vector<8x512xf32>, vector<8x512xf32>, vector<8x512xf32>, vector<8x512xf32>, vector<8x512xf32>, vector<8x512xf32>, vector<8x512xf32>, vector<8x512xf32> -> vector<72x512xf32>
    %cst_139 = arith.constant dense<0.000000e+00> : vector<8x512xf32>
    %397 = tpu.matmul %363, %396, %cst_139 {dimension_numbers = #tpu.dot_dimension_numbers<[1], [0], [0], [1], [0, 0, 1, 1], [], []>} : vector<8x72xf32>, vector<72x512xf32>, vector<8x512xf32> -> vector<8x512xf32>
    %c0_140 = arith.constant 0 : index
    %c0_141 = arith.constant 0 : index
    %398 = vector.load %arg27[%c0_140, %c0_141] : memref<8x1xf32, #tpu.memory_space<vmem>>, vector<8x1xf32>
    %399 = vector.broadcast %398 : vector<8x1xf32> to vector<8x512xf32>
    %400 = arith.addf %397, %399 : vector<8x512xf32>
    %c0_142 = arith.constant 0 : index
    %c0_143 = arith.constant 0 : index
    %401 = vector.load %arg28[%c0_142, %c0_143] : memref<8x1xf32, #tpu.memory_space<vmem>>, vector<8x1xf32>
    %c0_144 = arith.constant 0 : index
    %c0_145 = arith.constant 0 : index
    %402 = vector.load %arg29[%c0_144, %c0_145] : memref<8x1xf32, #tpu.memory_space<vmem>>, vector<8x1xf32>
    %cst_146 = arith.constant 0.000000e+00 : f32
    %403 = vector.broadcast %cst_146 : f32 to vector<8x512xf32>
    %404 = vector.extract_strided_slice %258 {offsets = [0, 0], sizes = [1, 512], strides = [1, 1]} : vector<2x512xf32> to vector<1x512xf32>
    %405 = vector.broadcast %404 : vector<1x512xf32> to vector<8x512xf32>
    %406 = arith.mulf %400, %405 : vector<8x512xf32>
    %cst_147 = arith.constant dense<0.000000e+00> : vector<8xf32>
    %407 = vector.multi_reduction <add>, %406, %cst_147 [1] : vector<8x512xf32> to vector<8xf32>
    %408 = vector.shape_cast %407 : vector<8xf32> to vector<8x1xf32>
    %cst_148 = arith.constant 3.906250e-03 : f32
    %409 = vector.broadcast %cst_148 : f32 to vector<8x1xf32>
    %410 = arith.mulf %408, %409 : vector<8x1xf32>
    %411 = vector.broadcast %410 : vector<8x1xf32> to vector<8x512xf32>
    %412 = vector.broadcast %404 : vector<1x512xf32> to vector<8x512xf32>
    %413 = arith.mulf %411, %412 : vector<8x512xf32>
    %414 = arith.addf %403, %413 : vector<8x512xf32>
    %415 = vector.extract_strided_slice %258 {offsets = [1, 0], sizes = [1, 512], strides = [1, 1]} : vector<2x512xf32> to vector<1x512xf32>
    %416 = vector.broadcast %415 : vector<1x512xf32> to vector<8x512xf32>
    %417 = arith.mulf %400, %416 : vector<8x512xf32>
    %cst_149 = arith.constant dense<0.000000e+00> : vector<8xf32>
    %418 = vector.multi_reduction <add>, %417, %cst_149 [1] : vector<8x512xf32> to vector<8xf32>
    %419 = vector.shape_cast %418 : vector<8xf32> to vector<8x1xf32>
    %cst_150 = arith.constant 3.906250e-03 : f32
    %420 = vector.broadcast %cst_150 : f32 to vector<8x1xf32>
    %421 = arith.mulf %419, %420 : vector<8x1xf32>
    %422 = vector.broadcast %421 : vector<8x1xf32> to vector<8x512xf32>
    %423 = vector.broadcast %415 : vector<1x512xf32> to vector<8x512xf32>
    %424 = arith.mulf %422, %423 : vector<8x512xf32>
    %425 = arith.addf %414, %424 : vector<8x512xf32>
    %426 = arith.subf %400, %425 : vector<8x512xf32>
    %427 = arith.mulf %426, %426 : vector<8x512xf32>
    %cst_151 = arith.constant 0.000000e+00 : f32
    %428 = vector.broadcast %cst_151 : f32 to vector<8x512xf32>
    %429 = vector.extract_strided_slice %258 {offsets = [0, 0], sizes = [1, 512], strides = [1, 1]} : vector<2x512xf32> to vector<1x512xf32>
    %430 = vector.broadcast %429 : vector<1x512xf32> to vector<8x512xf32>
    %431 = arith.mulf %427, %430 : vector<8x512xf32>
    %cst_152 = arith.constant dense<0.000000e+00> : vector<8xf32>
    %432 = vector.multi_reduction <add>, %431, %cst_152 [1] : vector<8x512xf32> to vector<8xf32>
    %433 = vector.shape_cast %432 : vector<8xf32> to vector<8x1xf32>
    %cst_153 = arith.constant 3.906250e-03 : f32
    %434 = vector.broadcast %cst_153 : f32 to vector<8x1xf32>
    %435 = arith.mulf %433, %434 : vector<8x1xf32>
    %436 = vector.broadcast %435 : vector<8x1xf32> to vector<8x512xf32>
    %437 = vector.broadcast %429 : vector<1x512xf32> to vector<8x512xf32>
    %438 = arith.mulf %436, %437 : vector<8x512xf32>
    %439 = arith.addf %428, %438 : vector<8x512xf32>
    %440 = vector.extract_strided_slice %258 {offsets = [1, 0], sizes = [1, 512], strides = [1, 1]} : vector<2x512xf32> to vector<1x512xf32>
    %441 = vector.broadcast %440 : vector<1x512xf32> to vector<8x512xf32>
    %442 = arith.mulf %427, %441 : vector<8x512xf32>
    %cst_154 = arith.constant dense<0.000000e+00> : vector<8xf32>
    %443 = vector.multi_reduction <add>, %442, %cst_154 [1] : vector<8x512xf32> to vector<8xf32>
    %444 = vector.shape_cast %443 : vector<8xf32> to vector<8x1xf32>
    %cst_155 = arith.constant 3.906250e-03 : f32
    %445 = vector.broadcast %cst_155 : f32 to vector<8x1xf32>
    %446 = arith.mulf %444, %445 : vector<8x1xf32>
    %447 = vector.broadcast %446 : vector<8x1xf32> to vector<8x512xf32>
    %448 = vector.broadcast %440 : vector<1x512xf32> to vector<8x512xf32>
    %449 = arith.mulf %447, %448 : vector<8x512xf32>
    %450 = arith.addf %439, %449 : vector<8x512xf32>
    %cst_156 = arith.constant 9.99999974E-6 : f32
    %451 = vector.broadcast %cst_156 : f32 to vector<8x512xf32>
    %452 = arith.addf %450, %451 : vector<8x512xf32>
    %453 = math.rsqrt %452 : vector<8x512xf32>
    %454 = arith.mulf %426, %453 : vector<8x512xf32>
    %455 = vector.broadcast %401 : vector<8x1xf32> to vector<8x512xf32>
    %456 = arith.mulf %454, %455 : vector<8x512xf32>
    %457 = vector.broadcast %402 : vector<8x1xf32> to vector<8x512xf32>
    %458 = arith.addf %456, %457 : vector<8x512xf32>
    %cst_157 = arith.constant 0.000000e+00 : f32
    %459 = vector.broadcast %cst_157 : f32 to vector<8x512xf32>
    %460 = arith.cmpf ogt, %458, %459 : vector<8x512xf32>
    %cst_158 = arith.constant 0.00999999977 : f32
    %461 = vector.broadcast %cst_158 : f32 to vector<8x512xf32>
    %462 = arith.mulf %461, %458 : vector<8x512xf32>
    %463 = arith.select %460, %458, %462 : vector<8x512xi1>, vector<8x512xf32>
    %c0_159 = arith.constant 0 : index
    %c0_160 = arith.constant 0 : index
    %464 = vector.load %arg30[%c0_159, %c0_160] : memref<4x8xf32, #tpu.memory_space<vmem>>, vector<4x8xf32>
    %cst_161 = arith.constant dense<0.000000e+00> : vector<4x512xf32>
    %465 = tpu.matmul %464, %463, %cst_161 {dimension_numbers = #tpu.dot_dimension_numbers<[1], [0], [0], [1], [0, 0, 1, 1], [], []>} : vector<4x8xf32>, vector<8x512xf32>, vector<4x512xf32> -> vector<4x512xf32>
    %c0_162 = arith.constant 0 : index
    %c0_163 = arith.constant 0 : index
    %466 = vector.load %arg31[%c0_162, %c0_163] : memref<4x1xf32, #tpu.memory_space<vmem>>, vector<4x1xf32>
    %467 = vector.broadcast %466 : vector<4x1xf32> to vector<4x512xf32>
    %468 = arith.addf %465, %467 : vector<4x512xf32>
    %c0_164 = arith.constant 0 : index
    %c0_165 = arith.constant 0 : index
    %c0_166 = arith.constant 0 : index
    %469 = vector.load %arg32[%c0_164, %c0_165, %c0_166] : memref<1x4x512xf32, #tpu.memory_space<vmem>>, vector<1x4x512xf32>
    %470 = vector.shape_cast %469 : vector<1x4x512xf32> to vector<4x512xf32>
    %471 = vector.shape_cast %468 : vector<4x512xf32> to vector<1x4x512xf32>
    tpu.vector_store %arg32[%c0_164, %c0_165, %c0_166], %471 {strides = array<i32>} : memref<1x4x512xf32, #tpu.memory_space<vmem>>, vector<1x4x512xf32>,
    return
  }
  func.func @transform_0(%arg0: i32) -> (i32, i32, i32) {
    %c0_i32 = arith.constant 0 : i32
    %c0_i32_0 = arith.constant 0 : i32
    %c0_i32_1 = arith.constant 0 : i32
    return %arg0, %c0_i32, %c0_i32_0 : i32, i32, i32
  }
  func.func @transform_1(%arg0: i32) -> (i32, i32, i32) {
    %c0_i32 = arith.constant 0 : i32
    %c0_i32_0 = arith.constant 0 : i32
    %c0_i32_1 = arith.constant 0 : i32
    return %arg0, %c0_i32, %c0_i32_0 : i32, i32, i32
  }
  func.func @transform_2(%arg0: i32) -> (i32, i32) {
    %c0_i32 = arith.constant 0 : i32
    %c0_i32_0 = arith.constant 0 : i32
    %c0_i32_1 = arith.constant 0 : i32
    return %c0_i32, %c0_i32_0 : i32, i32
  }
  func.func @transform_3(%arg0: i32) -> (i32, i32) {
    %c0_i32 = arith.constant 0 : i32
    %c0_i32_0 = arith.constant 0 : i32
    %c0_i32_1 = arith.constant 0 : i32
    return %c0_i32, %c0_i32_0 : i32, i32
  }
  func.func @transform_4(%arg0: i32) -> (i32, i32, i32) {
    %c0_i32 = arith.constant 0 : i32
    %c0_i32_0 = arith.constant 0 : i32
    %c0_i32_1 = arith.constant 0 : i32
    %c0_i32_2 = arith.constant 0 : i32
    return %c0_i32, %c0_i32_0, %c0_i32_1 : i32, i32, i32
  }
  func.func @transform_5(%arg0: i32) -> (i32, i32) {
    %c0_i32 = arith.constant 0 : i32
    %c0_i32_0 = arith.constant 0 : i32
    %c0_i32_1 = arith.constant 0 : i32
    return %c0_i32, %c0_i32_0 : i32, i32
  }
  func.func @transform_6(%arg0: i32) -> (i32, i32) {
    %c0_i32 = arith.constant 0 : i32
    %c0_i32_0 = arith.constant 0 : i32
    %c0_i32_1 = arith.constant 0 : i32
    return %c0_i32, %c0_i32_0 : i32, i32
  }
  func.func @transform_7(%arg0: i32) -> (i32, i32) {
    %c0_i32 = arith.constant 0 : i32
    %c0_i32_0 = arith.constant 0 : i32
    %c0_i32_1 = arith.constant 0 : i32
    return %c0_i32, %c0_i32_0 : i32, i32
  }
  func.func @transform_8(%arg0: i32) -> (i32, i32) {
    %c0_i32 = arith.constant 0 : i32
    %c0_i32_0 = arith.constant 0 : i32
    %c0_i32_1 = arith.constant 0 : i32
    return %c0_i32, %c0_i32_0 : i32, i32
  }
  func.func @transform_9(%arg0: i32) -> (i32, i32) {
    %c0_i32 = arith.constant 0 : i32
    %c0_i32_0 = arith.constant 0 : i32
    %c0_i32_1 = arith.constant 0 : i32
    return %c0_i32, %c0_i32_0 : i32, i32
  }
  func.func @transform_10(%arg0: i32) -> (i32, i32) {
    %c0_i32 = arith.constant 0 : i32
    %c0_i32_0 = arith.constant 0 : i32
    %c0_i32_1 = arith.constant 0 : i32
    return %c0_i32, %c0_i32_0 : i32, i32
  }
  func.func @transform_11(%arg0: i32) -> (i32, i32) {
    %c0_i32 = arith.constant 0 : i32
    %c0_i32_0 = arith.constant 0 : i32
    %c0_i32_1 = arith.constant 0 : i32
    return %c0_i32, %c0_i32_0 : i32, i32
  }
  func.func @transform_12(%arg0: i32) -> (i32, i32) {
    %c0_i32 = arith.constant 0 : i32
    %c0_i32_0 = arith.constant 0 : i32
    %c0_i32_1 = arith.constant 0 : i32
    return %c0_i32, %c0_i32_0 : i32, i32
  }
  func.func @transform_13(%arg0: i32) -> (i32, i32) {
    %c0_i32 = arith.constant 0 : i32
    %c0_i32_0 = arith.constant 0 : i32
    %c0_i32_1 = arith.constant 0 : i32
    return %c0_i32, %c0_i32_0 : i32, i32
  }
  func.func @transform_14(%arg0: i32) -> (i32, i32) {
    %c0_i32 = arith.constant 0 : i32
    %c0_i32_0 = arith.constant 0 : i32
    %c0_i32_1 = arith.constant 0 : i32
    return %c0_i32, %c0_i32_0 : i32, i32
  }
  func.func @transform_15(%arg0: i32) -> (i32, i32, i32) {
    %c0_i32 = arith.constant 0 : i32
    %c0_i32_0 = arith.constant 0 : i32
    %c0_i32_1 = arith.constant 0 : i32
    return %arg0, %c0_i32, %c0_i32_0 : i32, i32, i32
  }
  func.func @transform_16(%arg0: i32) -> (i32, i32) {
    %c0_i32 = arith.constant 0 : i32
    %c0_i32_0 = arith.constant 0 : i32
    %c0_i32_1 = arith.constant 0 : i32
    return %c0_i32, %c0_i32_0 : i32, i32
  }
  func.func @transform_17(%arg0: i32) -> (i32, i32) {
    %c0_i32 = arith.constant 0 : i32
    %c0_i32_0 = arith.constant 0 : i32
    %c0_i32_1 = arith.constant 0 : i32
    return %c0_i32, %c0_i32_0 : i32, i32
  }
  func.func @transform_18(%arg0: i32) -> (i32, i32, i32) {
    %c0_i32 = arith.constant 0 : i32
    %c0_i32_0 = arith.constant 0 : i32
    %c0_i32_1 = arith.constant 0 : i32
    %c0_i32_2 = arith.constant 0 : i32
    return %c0_i32, %c0_i32_0, %c0_i32_1 : i32, i32, i32
  }
  func.func @transform_19(%arg0: i32) -> (i32, i32) {
    %c0_i32 = arith.constant 0 : i32
    %c0_i32_0 = arith.constant 0 : i32
    %c0_i32_1 = arith.constant 0 : i32
    return %c0_i32, %c0_i32_0 : i32, i32
  }
  func.func @transform_20(%arg0: i32) -> (i32, i32) {
    %c0_i32 = arith.constant 0 : i32
    %c0_i32_0 = arith.constant 0 : i32
    %c0_i32_1 = arith.constant 0 : i32
    return %c0_i32, %c0_i32_0 : i32, i32
  }
  func.func @transform_21(%arg0: i32) -> (i32, i32) {
    %c0_i32 = arith.constant 0 : i32
    %c0_i32_0 = arith.constant 0 : i32
    %c0_i32_1 = arith.constant 0 : i32
    return %c0_i32, %c0_i32_0 : i32, i32
  }
  func.func @transform_22(%arg0: i32) -> (i32, i32) {
    %c0_i32 = arith.constant 0 : i32
    %c0_i32_0 = arith.constant 0 : i32
    %c0_i32_1 = arith.constant 0 : i32
    return %c0_i32, %c0_i32_0 : i32, i32
  }
  func.func @transform_23(%arg0: i32) -> (i32, i32) {
    %c0_i32 = arith.constant 0 : i32
    %c0_i32_0 = arith.constant 0 : i32
    %c0_i32_1 = arith.constant 0 : i32
    return %c0_i32, %c0_i32_0 : i32, i32
  }
  func.func @transform_24(%arg0: i32) -> (i32, i32) {
    %c0_i32 = arith.constant 0 : i32
    %c0_i32_0 = arith.constant 0 : i32
    %c0_i32_1 = arith.constant 0 : i32
    return %c0_i32, %c0_i32_0 : i32, i32
  }
  func.func @transform_25(%arg0: i32) -> (i32, i32) {
    %c0_i32 = arith.constant 0 : i32
    %c0_i32_0 = arith.constant 0 : i32
    %c0_i32_1 = arith.constant 0 : i32
    return %c0_i32, %c0_i32_0 : i32, i32
  }
  func.func @transform_26(%arg0: i32) -> (i32, i32) {
    %c0_i32 = arith.constant 0 : i32
    %c0_i32_0 = arith.constant 0 : i32
    %c0_i32_1 = arith.constant 0 : i32
    return %c0_i32, %c0_i32_0 : i32, i32
  }
  func.func @transform_27(%arg0: i32) -> (i32, i32) {
    %c0_i32 = arith.constant 0 : i32
    %c0_i32_0 = arith.constant 0 : i32
    %c0_i32_1 = arith.constant 0 : i32
    return %c0_i32, %c0_i32_0 : i32, i32
  }
  func.func @transform_28(%arg0: i32) -> (i32, i32) {
    %c0_i32 = arith.constant 0 : i32
    %c0_i32_0 = arith.constant 0 : i32
    %c0_i32_1 = arith.constant 0 : i32
    return %c0_i32, %c0_i32_0 : i32, i32
  }
  func.func @transform_29(%arg0: i32) -> (i32, i32) {
    %c0_i32 = arith.constant 0 : i32
    %c0_i32_0 = arith.constant 0 : i32
    %c0_i32_1 = arith.constant 0 : i32
    return %c0_i32, %c0_i32_0 : i32, i32
  }
  func.func @transform_30(%arg0: i32) -> (i32, i32) {
    %c0_i32 = arith.constant 0 : i32
    %c0_i32_0 = arith.constant 0 : i32
    %c0_i32_1 = arith.constant 0 : i32
    return %c0_i32, %c0_i32_0 : i32, i32
  }
  func.func @transform_31(%arg0: i32) -> (i32, i32, i32) {
    %c0_i32 = arith.constant 0 : i32
    %c0_i32_0 = arith.constant 0 : i32
    %c0_i32_1 = arith.constant 0 : i32
    return %arg0, %c0_i32, %c0_i32_0 : i32, i32, i32
  }
}

</mosaic_0001>

<bundles_post_ra>
// kernel: tpu_custom_call.1
= control target key start
LH: loop header
LB: loop body
LE: loop exit
PB: predicated region body
PF: predicated region fallthrough
CT: control target
= control target key end

     0   :  { %s3070_s6 = smov 1   ;;  %s3071_s10 = smov 2   ;;  %s4592_s0 = inlined_call_operand.smem [shape: u32[32], index: -1, kind: input, shape index: {}] }
   0x1   :  { %s3133_s5 = sld [smem:[%s4592_s0]]   ;;  %s3072_s14 = smov 3  }
   0x2   :  { %s3138_s9 = sld [smem:[%s4592_s0 + %s3070_s6]]   ;;  %s3073_s18 = smov 4  }
   0x3   :  { %s3143_s13 = sld [smem:[%s4592_s0 + %s3071_s10]]   ;;  %s3074_s22 = smov 5  }
   0x4   :  { %s3148_s17 = sld [smem:[%s4592_s0 + %s3072_s14]]   ;;  %s3075_s26 = smov 6  }
   0x5   :  { %s3153_s21 = sld [smem:[%s4592_s0 + %s3073_s18]]   ;;  %s3076_s30 = smov 7  }
   0x6   :  { %s3158_s25 = sld [smem:[%s4592_s0 + %s3074_s22]]   ;;  %s3077_s4 = smov 8  }
   0x7   :  { %s3163_s29 = sld [smem:[%s4592_s0 + %s3075_s26]]   ;;  %s3078_s10 = smov 9  }
   0x8   :  { %s3168_s3 = sld [smem:[%s4592_s0 + %s3076_s30]]   ;;  %s3079_s15 = smov 10  }
   0x9   :  { %s3173_s8 = sld [smem:[%s4592_s0 + %s3077_s4]]   ;;  %s3080_s20 = smov 11  }
   0xa   :  { %s3178_s14 = sld [smem:[%s4592_s0 + %s3078_s10]]   ;;  %s3081_s26 = smov 12  }
   0xb   :  { %s3183_s19 = sld [smem:[%s4592_s0 + %s3079_s15]]   ;;  %s3082_s1 = smov 13  }
   0xc   :  { %s3188_s24 = sld [smem:[%s4592_s0 + %s3080_s20]]   ;;  %s3083_s7 = smov 14  }
   0xd   :  { %s3193_s30 = sld [smem:[%s4592_s0 + %s3081_s26]]   ;;  %s3084_s15 = smov 15  }
   0xe   :  { %s3198_s6 = sld [smem:[%s4592_s0 + %s3082_s1]]   ;;  %s3085_s22 = smov 16  }
   0xf   :  { %s3203_s12 = sld [smem:[%s4592_s0 + %s3083_s7]]   ;;  %s3086_s28 = smov 17  }
  0x10   :  { %s3208_s20 = sld [smem:[%s4592_s0 + %s3084_s15]]   ;;  %s3087_s7 = smov 18  }
  0x11   :  { %s3213_s27 = sld [smem:[%s4592_s0 + %s3085_s22]]   ;;  %s3088_s15 = smov 19  }
  0x12   :  { %4610 = sst [smem:[#allocation15_spill]] %s3188_s24  ;;  %s3089_s22 = smov 20  }
  0x13   :  { %4611 = sst [smem:[#allocation16_spill]] %s3193_s30 }
  0x14   :  { %4612 = sst [smem:[#allocation17_spill]] %s3198_s6 }
  0x15   :  { %4613 = sst [smem:[#allocation18_spill]] %s3203_s12 }
  0x16   :  { %s3218_s4 = sld [smem:[%s4592_s0 + %s3086_s28]]   ;;  %s3090_s28 = smov 21  }
  0x17   :  { %4614 = sst [smem:[#allocation19_spill]] %s3213_s27 }
  0x18   :  { %s3223_s12 = sld [smem:[%s4592_s0 + %s3087_s7]]   ;;  %s3091_s7 = smov 22  }
  0x19   :  { %s3228_s6 = sld [smem:[%s4592_s0 + %s3088_s15]]   ;;  %s3092_s15 = smov 23  }
  0x1a   :  { %s3233_s27 = sld [smem:[%s4592_s0 + %s3089_s22]]   ;;  %s3093_s22 = smov 24  }
  0x1b   :  { %s3243_s24 = sld [smem:[%s4592_s0 + %s3091_s7]]   ;;  %s3095_s7 = smov 26  }
  0x1c   :  { %4615 = sst [smem:[#allocation20_spill]] %s3218_s4 }
  0x1d   :  { %s3238_s4 = sld [smem:[%s4592_s0 + %s3090_s28]]   ;;  %s3094_s28 = smov 25  }
  0x1e   :  { %s3248_s30 = sld [smem:[%s4592_s0 + %s3092_s15]]   ;;  %s3096_s15 = smov 27  }
  0x20   :  { %4616 = sst [smem:[#allocation21_spill]] %s3233_s27 }
  0x21   :  { %4618 = sst [smem:[#allocation23_spill]] %s3243_s24 }
  0x22   :  { %s3253_s27 = sld [smem:[%s4592_s0 + %s3093_s22]]   ;;  %s3097_s22 = smov 28  }
  0x23   :  { %4617 = sst [smem:[#allocation22_spill]] %s3238_s4 }
  0x24   :  { %4619 = sst [smem:[#allocation24_spill]] %s3248_s30 }
  0x25   :  { %s3258_s4 = sld [smem:[%s4592_s0 + %s3094_s28]]   ;;  %s3098_s28 = smov 29  }
  0x26   :  { %s3263_s24 = sld [smem:[%s4592_s0 + %s3095_s7]]   ;;  %s3099_s7 = smov 30  }
  0x27   :  { %s3268_s30 = sld [smem:[%s4592_s0 + %s3096_s15]]   ;;  %s3100_s15 = smov 31  }
  0x28   :  { %4620 = sst [smem:[#allocation25_spill]] %s3253_s27 }
  0x29   :  { %s3273_s27 = sld [smem:[%s4592_s0 + %s3097_s22]]  }
  0x2b   :  { %4621 = sst [smem:[#allocation26_spill]] %s3258_s4 }
  0x2c   :  { %4622 = sst [smem:[#allocation27_spill]] %s3263_s24 }
  0x2d   :  { %4623 = sst [smem:[#allocation28_spill]] %s3268_s30 }
  0x2e   :  { %s3278_s4 = sld [smem:[%s4592_s0 + %s3098_s28]]  }
  0x2f   :  { %s3283_s24 = sld [smem:[%s4592_s0 + %s3099_s7]]  }
  0x30   :  { %s3288_s30 = sld [smem:[%s4592_s0 + %s3100_s15]]  }
  0x31   :  { %68 = vsyncpa [#allocation3], 0 }
  0x32   :  { %69 = vsyncpa [#allocation6], 0 }
  0x33   :  { %70 = vsyncpa [#allocation9], 0  ;;  %s118_s22 = sshll.u32 %s3208_s20, 4  ;;  %s119_s22 = int_to_ptr.hbm [resolvable:$true] %s118_s22 }
  0x34   :  { %71 = vsyncpa [#allocation4], 0  ;;  %s3101_s23 = smov [#allocation5]   ;;  %s90_s28 = sshll.u32 %s3168_s3, 4  ;;  %s91_s28 = int_to_ptr.hbm [resolvable:$true] %s90_s28 }
  0x35   :  { %s120_s26 = sshll.u32 %s3101_s23, 4  ;;  %s2942_s1 = sshra.s32 %s119_s22, 4  ;;  %s121_s26 = int_to_ptr.vmem [resolvable:$true] %s120_s26  ;;  %s2943_s1 = int_to_ptr.hbm [resolvable:$true] %s2942_s1 }
  0x36   :  { %s2944_s2 = scalar_lea.hbm %s2943_s1, 32  ;;  %s2946_s0 = scalar_lea.hbm %s3208_s20, 32 }
  0x37   :  { %p2945_p0 = scmp.ne.s32.totalorder %s2943_s1, %s2944_s2  ;;  %p2947_p1 = scmp.lt.s32.totalorder %s2943_s1, %s3208_s20 }
  0x38   :  { %p2948_p2 = scmp.lt.s32.totalorder %s2946_s0, %s2944_s2 }
  0x3a   :  { %p2949_p3 = por %p2948_p2, %p2947_p1 }
  0x3c   :  { %p2950_p4 = pnand %p2949_p3, %p2945_p0 }
  0x3e   :  { %2953 = shalt.err (!%p2950_p4)
}
  0x3f   :  { %123 = dma.hbm_to_vmem [thread:$0]  %s119_s22, 512, %s121_s26, [#allocation6]  }
  0x40   :  { %s3102_s7 = smov [#allocation2]   ;;  %s2966_s11 = sshra.s32 %s91_s28, 4  ;;  %s2967_s11 = int_to_ptr.hbm [resolvable:$true] %s2966_s11 }
  0x41   :  { %s92_s10 = sshll.u32 %s3102_s7, 4  ;;  %s2968_s15 = scalar_lea.hbm %s2967_s11, 48  ;;  %s93_s10 = int_to_ptr.vmem [resolvable:$true] %s92_s10 }
  0x42   :  { %p2969_p5 = scmp.ne.s32.totalorder %s2967_s11, %s2968_s15  ;;  %s2970_s16 = scalar_lea.hbm %s3168_s3, 48 }
  0x43   :  { %p2971_p6 = scmp.lt.s32.totalorder %s2967_s11, %s3168_s3  ;;  %p2972_p7 = scmp.lt.s32.totalorder %s2970_s16, %s2968_s15 }
  0x45   :  { %p2973_p8 = por %p2972_p7, %p2971_p6 }
  0x47   :  { %p2974_p9 = pnand %p2973_p8, %p2969_p5 }
  0x49   :  { %2977 = shalt.err (!%p2974_p9)
}
  0x4a   :  { %s3103_s20 = smov 384   ;;  %s3104_s18 = smov 24  }
  0x4b   :  { %98 = dma.hbm_to_vmem [thread:$0]  %s91_s28, 768, %s93_s10, [#allocation3], %s3103_s20, %s3103_s20, %s3104_s18  }
  0x4c   :  { %s132_s22 = sshll.u32 %s3223_s12, 4  ;;  %s3105_s23 = smov [#allocation7]   ;;  %s133_s22 = int_to_ptr.hbm [resolvable:$true] %s132_s22 }
  0x4d   :  { %s134_s26 = sshll.u32 %s3105_s23, 4  ;;  %s145_s1 = sshll.u32 %s3228_s6, 4  ;;  %s135_s26 = int_to_ptr.vmem [resolvable:$true] %s134_s26  ;;  %s146_s1 = int_to_ptr.hbm [resolvable:$true] %s145_s1 }
  0x4e   :  { %s2990_s2 = sshra.s32 %s133_s22, 4  ;;  %s2994_s0 = scalar_lea.hbm %s3223_s12, 2048  ;;  %s2991_s2 = int_to_ptr.hbm [resolvable:$true] %s2990_s2 }
  0x4f   :  { %s2992_s3 = scalar_lea.hbm %s2991_s2, 2048  ;;  %p2995_p11 = scmp.lt.s32.totalorder %s2991_s2, %s3223_s12 }
  0x50   :  { %p2993_p10 = scmp.ne.s32.totalorder %s2991_s2, %s2992_s3  ;;  %p2996_p12 = scmp.lt.s32.totalorder %s2994_s0, %s2992_s3 }
  0x52   :  { %p2997_p13 = por %p2996_p12, %p2995_p11 }
  0x54   :  { %p2998_p0 = pnand %p2997_p13, %p2993_p10 }
  0x56   :  { %3001 = shalt.err (!%p2998_p0)
}
  0x57   :  { %s3106_s7 = smov 512   ;;  %s3107_s28 = smov 32  }
  0x58   :  { %140 = dma.hbm_to_vmem [thread:$0]  %s133_s22, 32768, %s135_s26, [#allocation6], %s3106_s7, %s3106_s7, %s3107_s28  }
  0x59   :  { %s3108_s10 = smov [#allocation8]   ;;  %s3014_s15 = sshra.s32 %s146_s1, 4  ;;  %s3015_s15 = int_to_ptr.hbm [resolvable:$true] %s3014_s15 }
  0x5a   :  { %s147_s11 = sshll.u32 %s3108_s10, 4  ;;  %s3016_s16 = scalar_lea.hbm %s3015_s15, 64  ;;  %s148_s11 = int_to_ptr.vmem [resolvable:$true] %s147_s11 }
  0x5b   :  { %p3017_p1 = scmp.ne.s32.totalorder %s3015_s15, %s3016_s16  ;;  %s3018_s20 = scalar_lea.hbm %s3228_s6, 64 }
  0x5c   :  { %p3019_p2 = scmp.lt.s32.totalorder %s3015_s15, %s3228_s6  ;;  %p3020_p3 = scmp.lt.s32.totalorder %s3018_s20, %s3016_s16 }
  0x5e   :  { %p3021_p4 = por %p3020_p3, %p3019_p2 }
  0x60   :  { %p3022_p5 = pnand %p3021_p4, %p3017_p1 }
  0x62   :  { %3025 = shalt.err (!%p3022_p5)
}
  0x63   :  { %153 = dma.hbm_to_vmem [thread:$0]  %s146_s1, 1024, %s148_s11, [#allocation9], %s3106_s7, %s3106_s7, %s3107_s28  }
  0x64   :  { %3062 = dma.done.wait [#allocation3], 768  }
  0x65   :  { %3063 = vsyncadd [#allocation3], 4294966528 }
  0x66   :  { %3064 = dma.done.wait [#allocation6], 33280  }
  0x67   :  { %3065 = vsyncadd [#allocation6], 4294934016 }
  0x68   :  { %3066 = dma.done.wait [#allocation9], 1024  }
  0x69   :  { %3067 = vsyncadd [#allocation9], 4294966272  ;;  %v195_v0 = vld [vmem:[%s3133_s5 + $0x18] sm:$0xff]  ;;  %v194_v1 = vld [vmem:[%s3133_s5 + $0x10] sm:$0xff]  ;;  %vm204_vm0 = vcmask 261120   ;;  %v3109_v29 = vmov 0  }
  0x6a   :  { %241 = vmatpush.msra.mxu0 %v195_v0  ;;  %v193_v2 = vld [vmem:[%s3133_s5 + $0x8] sm:$0xff]  ;;  %v192_v3 = vld [vmem:[%s3133_s5] sm:$0xff]  ;;  %v198_v6 = vld [vmem:[%s3143_s13 + $0x10] sm:$0xff]  ;;  %2909 = vset.pattern.permute.xlu0 %v3109_v29  ;;  %s3110_s5 = smov 120   ;;  %s3114_s6 = smov 8   ;;  %vm801_vm9 = vcmask 130048  }
  0x6b   :  { %v196_v4 = vld [vmem:[%s3143_s13] sm:$0xff]  ;;  %v197_v5 = vld [vmem:[%s3143_s13 + $0x8] sm:$0xff]  ;;  %v199_v7 = vld [vmem:[%s3143_s13 + $0x18] sm:$0xff]  ;;  %2910 = vset.pattern.permute.xlu1 %v3109_v29  ;;  %2911 = vset.pattern.permute.xlu2 %v3109_v29  ;;  %s3116_s12 = smov 9   ;;  %s3117_s18 = smov 119  }
  0x6c   :  { %242 = vmatpush.msra.mxu0 %v194_v1  ;;  %v273_v8 = vld [vmem:[%s3153_s21 + $0x18] sm:$0xff]  ;;  %v272_v9 = vld [vmem:[%s3153_s21 + $0x10] sm:$0xff]  ;;  %v271_v10 = vld [vmem:[%s3153_s21 + $0x8] sm:$0xff]  ;;  %s4629_s22 = sld [smem:[#allocation19_spill]]  ;;  %s3118_s23 = smov 112  }
  0x6d   :  { %326 = vmatpush.msra.mxu2 %v273_v8  ;;  %v200_v11 = vld [vmem:[%s3143_s13 + $0x20] sm:$0xff]  ;;  %v201_v12 = vld [vmem:[%s3143_s13 + $0x28] sm:$0xff]  ;;  %v202_v13 = vld [vmem:[%s3143_s13 + $0x30] sm:$0xff]  ;;  %s3119_s26 = smov 113   ;;  %s3120_s1 = smov 15  }
  0x6e   :  { %243 = vmatpush.msra.mxu0 %v193_v2  ;;  %v203_v14 = vld [vmem:[%s3143_s13 + $0x38] sm:$0xff]  ;;  %v270_v15 = vld [vmem:[%s3153_s21] sm:$0xff]  ;;  %v2816_v17 = vld [vmem:[%s3153_s21 + $0x30] sm:$0xff]  ;;  %s3111_s13 = smov 1   ;;  %s3121_s2 = smov 111  }
  0x6f   :  { %327 = vmatpush.msra.mxu2 %v272_v9  ;;  %v2817_v16 = vld [vmem:[%s3153_s21 + $0x38] sm:$0xff]  ;;  %v2815_v18 = vld [vmem:[%s3153_s21 + $0x28] sm:$0xff]  ;;  %v2814_v19 = vld [vmem:[%s3153_s21 + $0x20] sm:$0xff]  ;;  %s3122_s3 = smov 16   ;;  %s3123_s0 = smov 17  }
  0x70   :  { %244 = vmatpush.msra.mxu0 %v192_v3  ;;  %297 = vmatpush.msra.mxu1 %v2817_v16  ;;  %v2825_v20 = vld [vmem:[%s3153_s21 + $0x58] sm:$0xff]  ;;  %v2824_v21 = vld [vmem:[%s3153_s21 + $0x50] sm:$0xff]  ;;  %v2823_v22 = vld [vmem:[%s3153_s21 + $0x48] sm:$0xff]  ;;  %s4637_s7 = sld [smem:[#allocation23_spill]] }
  0x71   :  { %2806 = vmatmul.msk.f32.vlgmr.msra.gmra.mxu0 %vm204_vm0, %v196_v4  ;;  %328 = vmatpush.msra.mxu2 %v271_v10  ;;  %v2822_v23 = vld [vmem:[%s3153_s21 + $0x40] sm:$0xff]  ;;  %v2831_v26 = vld [vmem:[%s3153_s21 + $0x78] sm:$0xff]  ;;  %v2830_v27 = vld [vmem:[%s3153_s21 + $0x70] sm:$0xff]  ;;  %s4638_s28 = sld [smem:[#allocation25_spill]] }
  0x72   :  { %298 = vmatpush.msra.mxu1 %v2816_v17  ;;  %360 = vmatpush.msra.mxu3 %v2825_v20  ;;  %v410_v28 = vld [vmem:[%s3148_s17 + $0x8] sm:$0xff]  ;;  %v2828_v31 = vld [vmem:[%s3153_s21 + $0x60] sm:$0xff]  ;;  %s4641_s10 = sld [smem:[#allocation22_spill]] }
  0x73   :  { %329 = vmatpush.msra.mxu2 %v270_v15  ;;  %418 = vperm.xlu0 %2909, %v410_v28   ;;  %v2829_v30 = vld [vmem:[%s3153_s21 + $0x68] sm:$0xff]  ;;  %v409_v33 = vld [vmem:[%s3148_s17] sm:$0xff]  ;;  %s3112_s17 = smov 7   ;;  %s3113_s21 = smov 121  }
  0x74   :  { %299 = vmatpush.msra.mxu1 %v2815_v18  ;;  %361 = vmatpush.msra.mxu3 %v2824_v21  ;;  %v3349_v39 = vld [vmem:[%s3138_s9 + $0x8] sm:$0xff]  ;;  %v3356_v40 = vld [vmem:[%s3138_s9] sm:$0xff]  ;;  %s3115_s9 = smov 127   ;;  %s4652_s11 = sld [smem:[#allocation21_spill]] }
  0x75   :  { %518 = vrot.lane.b32.xlu2 %v3349_v39, %s3110_s5  ;;  %479 = vrot.lane.b32.xlu1 %v3349_v39, %s3111_s13  ;;  %v3399_v59 = vld [vmem:[%s3158_s25] sm:$0xff]  ;;  %s4653_s15 = sld [smem:[#allocation24_spill]] }
  0x76   :  { %300 = vmatpush.msra.mxu1 %v2814_v19  ;;  %362 = vmatpush.msra.mxu3 %v2823_v22  ;;  %v3402_v60 = vperm.slane %v3399_v59, 7  ;;  %v3424_v63 = vperm.slane %v3399_v59, 3  ;;  %v3439_v21 = vperm.slane %v3399_v59, 2  ;;  %s4654_s16 = sld [smem:[#allocation27_spill]] }
  0x77   :  { %s4662_s20 = sld [smem:[#allocation26_spill]] }
  0x78   :  { %363 = vmatpush.msra.mxu3 %v2822_v23  ;;  %396 = vmatpush.msrb.mxu1 %v2831_v26 }
  0x79   :  { %2807 = vmatmul.msk.f32.gmra.mxu0 %vm204_vm0, %v197_v5 }
  0x7a   :  { %397 = vmatpush.msrb.mxu1 %v2830_v27  ;;  %v3445_v27 = vperm.slane %v3399_v59, 6 }
  0x7b   :  { %413 = vperm.xlu0 %2909, %v409_v33  }
  0x7c   :  { %398 = vmatpush.msrb.mxu1 %v2829_v30 }
  0x7d   :  { %464 = vrot.lane.b32.xlu2 %v3356_v40, %s3112_s17  ;;  %477 = vrot.lane.b32.xlu1 %v3356_v40, %s3111_s13 }
  0x7e   :  { %399 = vmatpush.msrb.mxu1 %v2828_v31 }
  0x81   :  { %2808 = vmatmul.msk.f32.gmra.mxu0 %vm204_vm0, %v198_v6 }
  0x83   :  { %516 = vrot.lane.b32.xlu0 %v3356_v40, %s3110_s5 }
  0x85   :  { %503 = vrot.lane.b32.xlu2 %v3356_v40, %s3113_s21  ;;  %451 = vrot.lane.b32.xlu1 %v3356_v40, %s3114_s6 }
  0x89   :  { %2809 = vmatmul.msk.f32.gmra.mxu0 %vm204_vm0, %v199_v7 }
  0x8b   :  { %466 = vrot.lane.b32.xlu0 %v3349_v39, %s3112_s17 }
  0x8d   :  { %453 = vrot.lane.b32.xlu2 %v3349_v39, %s3114_s6  ;;  %490 = vrot.lane.b32.xlu1 %v3356_v40, %s3115_s9 }
  0x91   :  { %2810 = vmatmul.msk.f32.gmra.mxu0 %vm204_vm0, %v200_v11 }
  0x93   :  { %505 = vrot.lane.b32.xlu0 %v3349_v39, %s3113_s21 }
  0x95   :  { %492 = vrot.lane.b32.xlu2 %v3349_v39, %s3115_s9 }
  0x99   :  { %2811 = vmatmul.msk.f32.gmra.mxu0 %vm204_vm0, %v201_v12 }
  0xa1   :  { %2812 = vmatmul.msk.f32.gmra.mxu0 %vm204_vm0, %v202_v13 }
  0xa9   :  { %2813 = vmatmul.msk.f32.gmra.mxu0 %vm204_vm0, %v203_v14 }
  0xcf   :  { %v519_v61 = vpop.permute.xlu2 %518 }
  0xd0   :  { %v524_v62 = vmul.f32 %v3402_v60, %v519_v61 }
  0xd2   :  { %579 = vmatpush.msrb.mxu3 %v524_v62 }
  0xd7   :  { %v465_v6 = vpop.permute.xlu2 %464 }
  0xd8   :  { %v471_v23 = vmul.f32 %v3439_v21, %v465_v6  ;;  %v428_v6 = vld [vmem:[#allocation2] sm:$0xff] }
  0xdf   :  { %v504_v7 = vpop.permute.xlu2 %503 }
  0xe0   :  { %v510_v29 = vmul.f32 %v3445_v27, %v504_v7  ;;  %v429_v7 = vld [vmem:[#allocation2 + $0x8] sm:$0xff] }
  0xe5   :  { %v419_v43 = vpop.permute.xlu0 %418 }
  0xe7   :  { %v480_v0 = vpop.permute.xlu1 %479  ;;  %v454_v8 = vpop.permute.xlu2 %453 }
  0xe8   :  { %v485_v1 = vmul.f32 %v3424_v63, %v480_v0  ;;  %v3475_v0 = vld [vmem:[%s3158_s25 + $0x8] ss:$0 sm:$0xff]  ;;  %s4624_s25 = sld [smem:[#allocation16_spill]] }
  0xea   :  { %556 = vmatpush.msrb.mxu2 %v485_v1 }
  0xed   :  { %v414_v50 = vpop.permute.xlu0 %413 }
  0xee   :  { %v246_v24 = vpop.f32.mrf.mxu0 }
  0xef   :  { %2820 = vmatmul.msk.f32.vlgmr.msra.gmra.mxu2 %vm204_vm0, %v246_v24  ;;  %v478_v2 = vpop.permute.xlu1 %477  ;;  %v493_v9 = vpop.permute.xlu2 %492 }
  0xf0   :  { %v484_v4 = vmul.f32 %v3424_v63, %v478_v2 }
  0xf2   :  { %557 = vmatpush.msrb.mxu2 %v484_v4 }
  0xf5   :  { %v517_v3 = vpop.permute.xlu0 %516 }
  0xf6   :  { %v249_v25 = vpop.f32.mrf.mxu0  ;;  %v523_v5 = vmul.f32 %v3402_v60, %v517_v3 }
  0xf7   :  { %2821 = vmatmul.msk.f32.gmra.mxu2 %vm204_vm0, %v249_v25  ;;  %v452_v10 = vpop.permute.xlu1 %451 }
  0xf8   :  { %580 = vmatpush.msrb.mxu3 %v523_v5 }
  0xfd   :  { %v467_v11 = vpop.permute.xlu0 %466 }
  0xfe   :  { %v252_v32 = vpop.f32.mrf.mxu0  ;;  %v472_v22 = vmul.f32 %v3439_v21, %v467_v11  ;;  %v432_v11 = vld [vmem:[#allocation2 + $0x20] sm:$0xff] }
  0xff   :  { %2818 = vmatmul.msk.f32.vlgmr.msra.gmra.mxu1 %vm204_vm0, %v252_v32  ;;  %v491_v14 = vpop.permute.xlu1 %490 }
 0x105   :  { %v506_v15 = vpop.permute.xlu0 %505 }
 0x106   :  { %v255_v34 = vpop.f32.mrf.mxu0  ;;  %v511_v28 = vmul.f32 %v3445_v27, %v506_v15 }
 0x107   :  { %2819 = vmatmul.msk.f32.gmra.mxu1 %vm204_vm0, %v255_v34 }
 0x10e   :  { %v258_v35 = vpop.f32.mrf.mxu0 }
 0x10f   :  { %2826 = vmatmul.msk.f32.vlgmr.msra.gmra.mxu3 %vm204_vm0, %v258_v35  ;;  %v3452_v35 = vperm.slane %v3399_v59, 1 }
 0x116   :  { %v261_v36 = vpop.f32.mrf.mxu0 }
 0x117   :  { %2827 = vmatmul.msk.f32.gmra.mxu3 %vm204_vm0, %v261_v36  ;;  %v459_v36 = vmul.f32 %v3452_v35, %v454_v8 }
 0x11e   :  { %v264_v37 = vpop.f32.mrf.mxu0 }
 0x11f   :  { %2832 = vmatmul.msk.f32.vlgmr.msrb.gmra.mxu1 %vm204_vm0, %v264_v37  ;;  %v458_v37 = vmul.f32 %v3452_v35, %v452_v10 }
 0x126   :  { %v267_v38 = vpop.f32.mrf.mxu0 }
 0x127   :  { %2833 = vmatmul.msk.f32.gmra.mxu1 %vm204_vm0, %v267_v38 }
 0x172   :  { %v331_v44 = vpop.f32.mrf.mxu2 }
 0x17a   :  { %v334_v52 = vpop.f32.mrf.mxu2 }
 0x17c   :  { %v302_v41 = vpop.f32.mrf.mxu1 }
 0x17d   :  { %v332_v46 = vadd.f32 %v331_v44, %v302_v41 }
 0x184   :  { %v305_v42 = vpop.f32.mrf.mxu1 }
 0x185   :  { %v335_v54 = vadd.f32 %v334_v52, %v305_v42 }
 0x192   :  { %v365_v45 = vpop.f32.mrf.mxu3 }
 0x193   :  { %v371_v47 = vadd.f32 %v365_v45, %v332_v46  ;;  %v3461_v46 = vperm.slane %v3399_v59, 5 }
 0x19a   :  { %v368_v53 = vpop.f32.mrf.mxu3 }
 0x19b   :  { %v372_v55 = vadd.f32 %v368_v53, %v335_v54  ;;  %v539_v54 = vld [vmem:[%s3173_s8 + $0x8] sm:$0xff] }
 0x19c   :  { %v401_v48 = vpop.f32.mrf.mxu1 }
 0x19d   :  { %v407_v49 = vadd.f32 %v401_v48, %v371_v47  ;;  %v498_v48 = vmul.f32 %v3461_v46, %v493_v9 }
 0x19f   :  { %v3378_v51 = vadd.f32 %v414_v50, %v407_v49  ;;  %v497_v49 = vmul.f32 %v3461_v46, %v491_v14  ;;  %v3466_v50 = vperm.slane %v3399_v59, 0 }
 0x1a1   :  { %460 = vrot.lane.b32.xlu0 %v3378_v51, %s3112_s17  ;;  %473 = vrot.lane.b32.xlu1 %v3378_v51, %s3111_s13 }
 0x1a4   :  { %v404_v56 = vpop.f32.mrf.mxu1 }
 0x1a5   :  { %v408_v57 = vadd.f32 %v404_v56, %v372_v55  ;;  %v538_v55 = vld [vmem:[%s3173_s8] sm:$0xff]  ;;  %s4626_s8 = sld [smem:[#allocation17_spill]] }
 0x1a7   :  { %v3384_v58 = vadd.f32 %v419_v43, %v408_v57 }
 0x1a9   :  { %499 = vrot.lane.b32.xlu0 %v3378_v51, %s3113_s21  ;;  %512 = vrot.lane.b32.xlu1 %v3378_v51, %s3110_s5 }
 0x1aa   :  { %475 = vrot.lane.b32.xlu2 %v3384_v58, %s3111_s13 }
 0x1b1   :  { %449 = vrot.lane.b32.xlu0 %v3384_v58, %s3114_s6  ;;  %462 = vrot.lane.b32.xlu1 %v3384_v58, %s3112_s17 }
 0x1b2   :  { %514 = vrot.lane.b32.xlu2 %v3384_v58, %s3110_s5 }
 0x1b9   :  { %488 = vrot.lane.b32.xlu0 %v3384_v58, %s3115_s9  ;;  %501 = vrot.lane.b32.xlu1 %v3384_v58, %s3113_s21 }
 0x1ba   :  { %447 = vrot.lane.b32.xlu2 %v3378_v51, %s3114_s6 }
 0x1c1   :  { %438 = vrot.lane.b32.xlu0 %v3356_v40, %s3116_s12  ;;  %440 = vrot.lane.b32.xlu1 %v3349_v39, %s3116_s12 }
 0x1c2   :  { %486 = vrot.lane.b32.xlu2 %v3378_v51, %s3115_s9 }
 0x1c9   :  { %531 = vrot.lane.b32.xlu0 %v3349_v39, %s3117_s18  ;;  %436 = vrot.lane.b32.xlu1 %v3384_v58, %s3116_s12 }
 0x1ca   :  { %434 = vrot.lane.b32.xlu2 %v3378_v51, %s3116_s12 }
 0x1d1   :  { %525 = vrot.lane.b32.xlu0 %v3378_v51, %s3117_s18  ;;  %529 = vrot.lane.b32.xlu1 %v3356_v40, %s3117_s18 }
 0x1d2   :  { %527 = vrot.lane.b32.xlu2 %v3384_v58, %s3117_s18 }
 0x1d9   :  { %547 = vperm.xlu1 %2910, %v539_v54  }
 0x1da   :  { %542 = vperm.xlu2 %2911, %v538_v55  }
 0x204   :  { %v476_v12 = vpop.permute.xlu2 %475 }
 0x205   :  { %v483_v13 = vmul.f32 %v3424_v63, %v476_v12 }
 0x207   :  { %558 = vmatpush.msrb.mxu2 %v483_v13  ;;  %v430_v13 = vld [vmem:[#allocation2 + $0x10] sm:$0xff] }
 0x20c   :  { %v515_v16 = vpop.permute.xlu2 %514 }
 0x20d   :  { %v522_v17 = vmul.f32 %v3402_v60, %v515_v16 }
 0x20f   :  { %581 = vmatpush.msrb.mxu3 %v522_v17  ;;  %v425_v17 = vld [vmem:[%s3163_s29] sm:$0x3]  ;;  %s4625_s29 = sld [smem:[#allocation15_spill]] }
 0x213   :  { %v461_v18 = vpop.permute.xlu0 %460  ;;  %v474_v19 = vpop.permute.xlu1 %473 }
 0x214   :  { %v482_v20 = vmul.f32 %v3424_v63, %v474_v19  ;;  %v448_v33 = vpop.permute.xlu2 %447  ;;  %v469_v34 = vmul.f32 %v3439_v21, %v461_v18 }
 0x215   :  { %v456_v44 = vmul.f32 %v3452_v35, %v448_v33 }
 0x216   :  { %559 = vmatpush.msrb.mxu2 %v482_v20  ;;  %v3490_v20 = vperm.slane %v425_v17, 0 }
 0x218   :  { %560 = vmatpush.msrb.mxu2 %v472_v22 }
 0x21a   :  { %561 = vmatpush.msrb.mxu2 %v471_v23 }
 0x21b   :  { %v500_v24 = vpop.permute.xlu0 %499  ;;  %v513_v25 = vpop.permute.xlu1 %512 }
 0x21c   :  { %v521_v26 = vmul.f32 %v3402_v60, %v513_v25  ;;  %v508_v45 = vmul.f32 %v3445_v27, %v500_v24  ;;  %v487_v47 = vpop.permute.xlu2 %486 }
 0x21d   :  { %v495_v62 = vmul.f32 %v3461_v46, %v487_v47 }
 0x21e   :  { %582 = vmatpush.msrb.mxu3 %v521_v26 }
 0x220   :  { %583 = vmatpush.msrb.mxu3 %v511_v28 }
 0x222   :  { %584 = vmatpush.msrb.mxu3 %v510_v29 }
 0x223   :  { %v450_v30 = vpop.permute.xlu0 %449  ;;  %v463_v31 = vpop.permute.xlu1 %462 }
 0x224   :  { %v470_v32 = vmul.f32 %v3439_v21, %v463_v31  ;;  %v457_v42 = vmul.f32 %v3452_v35, %v450_v30  ;;  %v435_v59 = vpop.permute.xlu2 %434 }
 0x225   :  { %v443_v5 = vmul.f32 %v3466_v50, %v435_v59 }
 0x226   :  { %562 = vmatpush.msrb.mxu2 %v470_v32  ;;  %v3493_v32 = vperm.slane %v425_v17, 1 }
 0x228   :  { %563 = vmatpush.msrb.mxu2 %v469_v34 }
 0x22a   :  { %564 = vmatpush.msrb.mxu2 %v459_v36 }
 0x22b   :  { %v489_v38 = vpop.permute.xlu0 %488  ;;  %v502_v41 = vpop.permute.xlu1 %501 }
 0x22c   :  { %565 = vmatpush.msrb.mxu2 %v458_v37  ;;  %v509_v43 = vmul.f32 %v3445_v27, %v502_v41  ;;  %v496_v57 = vmul.f32 %v3461_v46, %v489_v38  ;;  %v626_v38 = vld [vmem:[%s3178_s14 + $0x8] sm:$0xff] }
 0x22e   :  { %566 = vmatpush.msrb.mxu2 %v457_v42  ;;  %585 = vmatpush.msrb.mxu3 %v509_v43 }
 0x230   :  { %567 = vmatpush.msrb.mxu2 %v456_v44  ;;  %586 = vmatpush.msrb.mxu3 %v508_v45 }
 0x232   :  { %587 = vmatpush.msrb.mxu3 %v498_v48 }
 0x233   :  { %v439_v52 = vpop.permute.xlu0 %438  ;;  %v441_v53 = vpop.permute.xlu1 %440 }
 0x234   :  { %588 = vmatpush.msrb.mxu3 %v497_v49  ;;  %v446_v56 = vmul.f32 %v3466_v50, %v441_v53  ;;  %v445_v61 = vmul.f32 %v3466_v50, %v439_v52 }
 0x236   :  { %568 = vmatpush.msrb.mxu2 %v446_v56  ;;  %589 = vmatpush.msrb.mxu3 %v496_v57 }
 0x238   :  { %590 = vmatpush.msrb.mxu3 %v495_v62  ;;  %569 = vmatpush.msrb.mxu2 %v445_v61 }
 0x23a   :  { %591 = vmatpush.msrb.mxu3 %v3349_v39  ;;  %v528_v39 = vpop.permute.xlu2 %527 }
 0x23b   :  { %v532_v1 = vpop.permute.xlu0 %531  ;;  %v437_v2 = vpop.permute.xlu1 %436  ;;  %v535_v10 = vmul.f32 %v3475_v0, %v528_v39  ;;  %v628_v39 = vld [vmem:[%s3183_s19 + $0x8] sm:$0xff] }
 0x23c   :  { %v537_v3 = vmul.f32 %v3475_v0, %v532_v1  ;;  %592 = vmatpush.msrb.mxu3 %v3356_v40  ;;  %v444_v4 = vmul.f32 %v3466_v50, %v437_v2 }
 0x23e   :  { %570 = vmatpush.msrb.mxu2 %v444_v4  ;;  %593 = vmatpush.msrb.mxu3 %v3384_v58  ;;  %v431_v58 = vld [vmem:[#allocation2 + $0x18] sm:$0xff] }
 0x23f   :  { %614 = vmatpush.msra.mxu1 %v537_v3 }
 0x240   :  { %571 = vmatpush.msrb.mxu2 %v443_v5  ;;  %594 = vmatpush.msrb.mxu3 %v3378_v51  ;;  %v433_v51 = vld [vmem:[#allocation2 + $0x28] sm:$0xff] }
 0x241   :  { %572 = vmatmul.f32.vlgmr.msrb.gmra.mxu2 %v428_v6  ;;  %595 = vmatmul.f32.vlgmr.msrb.gmra.mxu3 %v429_v7  ;;  %v625_v6 = vld [vmem:[%s3178_s14] sm:$0xff]  ;;  %s4627_s14 = sld [smem:[#allocation20_spill]] }
 0x242   :  { %v543_v14 = vpop.permute.xlu2 %542  ;;  %v627_v7 = vld [vmem:[%s3183_s19] sm:$0xff]  ;;  %s4628_s19 = sld [smem:[#allocation18_spill]] }
 0x243   :  { %v530_v8 = vpop.permute.xlu1 %529  ;;  %v526_v40 = vpop.permute.xlu0 %525 }
 0x244   :  { %v536_v9 = vmul.f32 %v3475_v0, %v530_v8  ;;  %v534_v12 = vmul.f32 %v3475_v0, %v526_v40 }
 0x246   :  { %615 = vmatpush.msra.mxu1 %v536_v9 }
 0x248   :  { %616 = vmatpush.msra.mxu1 %v535_v10 }
 0x249   :  { %575 = vmatmul.f32.gmra.mxu2 %v431_v58  ;;  %598 = vmatmul.f32.gmra.mxu3 %v432_v11 }
 0x24a   :  { %617 = vmatpush.msra.mxu1 %v534_v12 }
 0x24b   :  { %2834 = vmatmul.msk.f32.vlgmr.msra.gmra.mxu1 %vm204_vm0, %v430_v13  ;;  %v548_v24 = vpop.permute.xlu1 %547 }
 0x253   :  { %2835 = vmatmul.msk.f32.gmra.mxu1 %vm204_vm0, %v433_v51 }
 0x2c4   :  { %v573_v15 = vpop.f32.mrf.mxu2  ;;  %v596_v16 = vpop.f32.mrf.mxu3 }
 0x2c5   :  { %v574_v18 = vadd.f32 %v573_v15, %v543_v14 }
 0x2c7   :  { %v597_v19 = vadd.f32 %v596_v16, %v574_v18 }
 0x2c8   :  { %v619_v22 = vpop.f32.mrf.mxu1 }
 0x2c9   :  { %v620_v23 = vadd.f32 %v619_v22, %v597_v19 }
 0x2cb   :  { %v630_v25 = vmul.f32 %v3490_v20, %v620_v23  ;;  %v643_v37 = vmul.f32 %v3493_v32, %v620_v23 }
 0x2cc   :  { %v576_v26 = vpop.f32.mrf.mxu2  ;;  %v599_v28 = vpop.f32.mrf.mxu3 }
 0x2cd   :  { %v577_v29 = vadd.f32 %v576_v26, %v548_v24  ;;  %632 = vadd.xlane.f32.xlu2 %v630_v25 }
 0x2cf   :  { %v600_v30 = vadd.f32 %v599_v28, %v577_v29 }
 0x2d0   :  { %v622_v31 = vpop.f32.mrf.mxu1 }
 0x2d1   :  { %v623_v33 = vadd.f32 %v622_v31, %v600_v30 }
 0x2d3   :  { %v644_v34 = vmul.f32 %v3493_v32, %v623_v33  ;;  %v631_v36 = vmul.f32 %v3490_v20, %v623_v33 }
 0x2d5   :  { %647 = vadd.xlane.f32.xlu1 %v644_v34  ;;  %634 = vadd.xlane.f32.xlu0 %v631_v36 }
 0x2d6   :  { %645 = vadd.xlane.f32.xlu2 %v643_v37 }
 0x2ee   :  { %714 = vperm.xlu1 %2910, %v626_v38  }
 0x340   :  { %v633_v41 = vpop.xlane.xlu2 %632 }
 0x341   :  { %v636_v42 = vmul.f32 0.015625, %v633_v41 }
 0x343   :  { %v638_v54 = vmul.f32 %v636_v42, %v3490_v20 }
 0x348   :  { %v648_v43 = vpop.xlane.xlu1 %647  ;;  %v635_v44 = vpop.xlane.xlu0 %634 }
 0x349   :  { %v650_v45 = vmul.f32 0.015625, %v648_v43  ;;  %v637_v47 = vmul.f32 0.015625, %v635_v44  ;;  %v646_v48 = vpop.xlane.xlu2 %645 }
 0x34a   :  { %v649_v49 = vmul.f32 0.015625, %v646_v48 }
 0x34b   :  { %v652_v52 = vmul.f32 %v650_v45, %v3493_v32  ;;  %v639_v53 = vmul.f32 %v637_v47, %v3490_v20 }
 0x34c   :  { %v651_v55 = vmul.f32 %v649_v49, %v3493_v32 }
 0x34d   :  { %v654_v56 = vadd.f32 %v652_v52, %v639_v53 }
 0x34e   :  { %v653_v57 = vadd.f32 %v651_v55, %v638_v54 }
 0x34f   :  { %v3503_v61 = vsub.f32 %v623_v33, %v654_v56 }
 0x350   :  { %v655_v62 = vsub.f32 %v620_v23, %v653_v57 }
 0x351   :  { %v658_v59 = vmul.f32 %v3503_v61, %v3503_v61 }
 0x352   :  { %v657_v1 = vmul.f32 %v655_v62, %v655_v62 }
 0x353   :  { %v672_v2 = vmul.f32 %v658_v59, %v3493_v32  ;;  %v660_v5 = vmul.f32 %v658_v59, %v3490_v20  ;;  %v789_v59 = vld [vmem:[%s4624_s25] sm:$0xff] }
 0x354   :  { %v671_v3 = vmul.f32 %v657_v1, %v3493_v32  ;;  %v659_v4 = vmul.f32 %v657_v1, %v3490_v20 }
 0x355   :  { %675 = vadd.xlane.f32.xlu1 %v672_v2 }
 0x356   :  { %673 = vadd.xlane.f32.xlu0 %v671_v3  ;;  %661 = vadd.xlane.f32.xlu2 %v659_v4 }
 0x35e   :  { %663 = vadd.xlane.f32.xlu0 %v660_v5 }
 0x360   :  { %v715_v8 = vpop.permute.xlu1 %714 }
 0x36e   :  { %709 = vperm.xlu2 %2911, %v625_v6   ;;  %721 = vperm.xlu1 %2910, %v627_v7  }
 0x372   :  { %726 = vperm.xlu0 %2909, %v628_v39  }
 0x3c8   :  { %v676_v13 = vpop.xlane.xlu1 %675 }
 0x3c9   :  { %v674_v9 = vpop.xlane.xlu0 %673  ;;  %v662_v40 = vpop.xlane.xlu2 %661  ;;  %v678_v14 = vmul.f32 0.015625, %v676_v13 }
 0x3ca   :  { %v677_v10 = vmul.f32 0.015625, %v674_v9  ;;  %v665_v58 = vmul.f32 0.015625, %v662_v40 }
 0x3cb   :  { %v680_v18 = vmul.f32 %v678_v14, %v3493_v32 }
 0x3cc   :  { %v679_v11 = vmul.f32 %v677_v10, %v3493_v32  ;;  %v667_v12 = vmul.f32 %v665_v58, %v3490_v20 }
 0x3ce   :  { %v681_v51 = vadd.f32 %v679_v11, %v667_v12 }
 0x3d0   :  { %v683_v15 = vadd.f32 1e-05, %v681_v51 }
 0x3d1   :  { %v664_v16 = vpop.xlane.xlu0 %663  ;;  %v710_v38 = vpop.permute.xlu2 %709 }
 0x3d2   :  { %2917 = vrsqrt.f32 %v683_v15  ;;  %v666_v17 = vmul.f32 0.015625, %v664_v16  ;;  %vm691_vm2 = vweird.f32 %v683_v15 }
 0x3d4   :  { %v668_v19 = vmul.f32 %v666_v17, %v3490_v20 }
 0x3d6   :  { %v682_v22 = vadd.f32 %v680_v18, %v668_v19 }
 0x3d8   :  { %v2918_v23 = vpop.eup %2917  ;;  %v684_v24 = vadd.f32 1e-05, %v682_v22 }
 0x3d9   :  { %v686_v25 = vmul.f32 %v2918_v23, %v683_v15  ;;  %vm692_vm1 = vweird.f32 %v2918_v23 }
 0x3da   :  { %2919 = vrsqrt.f32 %v684_v24  ;;  %vm693_vm3 = vmor %vm691_vm2, %vm692_vm1  ;;  %vm701_vm5 = vweird.f32 %v684_v24 }
 0x3db   :  { %v687_v26 = vmul.f32 %v2918_v23, %v686_v25 }
 0x3dd   :  { %v688_v28 = vmul.f32 0.5, %v687_v26 }
 0x3df   :  { %v689_v29 = vsub.f32 1.5, %v688_v28  ;;  %v739_v28 = vld [vmem:[%s4625_s29 + $0x10] sm:$0xff] }
 0x3e0   :  { %v2920_v30 = vpop.eup %2919  ;;  %v722_v43 = vpop.permute.xlu1 %721 }
 0x3e1   :  { %v696_v31 = vmul.f32 %v2920_v30, %v684_v24  ;;  %v690_v33 = vmul.f32 %v2918_v23, %v689_v29  ;;  %vm702_vm4 = vweird.f32 %v2920_v30 }
 0x3e2   :  { %vm703_vm7 = vmor %vm701_vm5, %vm702_vm4 }
 0x3e3   :  { %v697_v34 = vmul.f32 %v2920_v30, %v696_v31  ;;  %v694_v36 = vsel %vm693_vm3, %v2918_v23, %v690_v33 }
 0x3e4   :  { %v705_v37 = vmul.f32 %v694_v36, %v655_v62  ;;  %v727_v55 = vpop.permute.xlu0 %726 }
 0x3e5   :  { %v698_v41 = vmul.f32 0.5, %v697_v34 }
 0x3e6   :  { %v717_v42 = vmul.f32 %v710_v38, %v705_v37 }
 0x3e7   :  { %v699_v44 = vsub.f32 1.5, %v698_v41 }
 0x3e8   :  { %v729_v45 = vadd.f32 %v722_v43, %v717_v42 }
 0x3e9   :  { %v700_v47 = vmul.f32 %v2920_v30, %v699_v44 }
 0x3ea   :  { %vm731_vm6 = vcmp.gt.f32.partialorder %v729_v45, 0.0  ;;  %v733_v48 = vmul.f32 0.01, %v729_v45 }
 0x3eb   :  { %v704_v49 = vsel %vm703_vm7, %v2920_v30, %v700_v47 }
 0x3ec   :  { %v735_v52 = vsel %vm731_vm6, %v729_v45, %v733_v48  ;;  %v706_v53 = vmul.f32 %v704_v49, %v3503_v61  ;;  %v790_v61 = vld [vmem:[%s4624_s25 + $0x8] sm:$0xff] }
 0x3ed   :  { %771 = vrot.lane.b32.xlu0 %v735_v52, %s3113_s21  ;;  %777 = vrot.lane.b32.xlu2 %v735_v52, %s3110_s5 }
 0x3ee   :  { %v718_v54 = vmul.f32 %v715_v8, %v706_v53 }
 0x3f0   :  { %v730_v56 = vadd.f32 %v727_v55, %v718_v54 }
 0x3f2   :  { %vm732_vm8 = vcmp.gt.f32.partialorder %v730_v56, 0.0  ;;  %v734_v57 = vmul.f32 0.01, %v730_v56 }
 0x3f4   :  { %v736_v62 = vsel %vm732_vm8, %v730_v56, %v734_v57 }
 0x3f5   :  { %773 = vrot.lane.b32.xlu1 %v736_v62, %s3113_s21  ;;  %779 = vrot.lane.b32.xlu0 %v736_v62, %s3110_s5  ;;  %s4671_s5 = sld [smem:[#allocation28_spill]]  ;;  %s3054_s21 = scalar_lea.hbm %s3288_s30, 16 }
 0x3f6   :  { %767 = vrot.lane.b32.xlu2 %v736_v62, %s3115_s9 }
 0x3fd   :  { %765 = vrot.lane.b32.xlu1 %v735_v52, %s3115_s9  ;;  %753 = vrot.lane.b32.xlu0 %v735_v52, %s3112_s17 }
 0x3fe   :  { %759 = vrot.lane.b32.xlu2 %v735_v52, %s3111_s13 }
 0x405   :  { %755 = vrot.lane.b32.xlu1 %v736_v62, %s3112_s17  ;;  %761 = vrot.lane.b32.xlu0 %v736_v62, %s3111_s13 }
 0x406   :  { %749 = vrot.lane.b32.xlu2 %v736_v62, %s3114_s6 }
 0x40d   :  { %747 = vrot.lane.b32.xlu1 %v735_v52, %s3114_s6  ;;  %743 = vrot.lane.b32.xlu0 %v736_v62, %s3116_s12 }
 0x40e   :  { %741 = vrot.lane.b32.xlu2 %v735_v52, %s3116_s12 }
 0x415   :  { %785 = vrot.lane.b32.xlu1 %v736_v62, %s3117_s18  ;;  %783 = vrot.lane.b32.xlu0 %v735_v52, %s3117_s18 }
 0x416   :  { %798 = vperm.xlu2 %2911, %v790_v61  }
 0x41d   :  { %793 = vperm.xlu1 %2910, %v789_v59  }
 0x447   :  { %v778_v1 = vpop.permute.xlu2 %777 }
 0x448   :  { %v781_v7 = vmul.f32 %v778_v1, %v3402_v60 }
 0x450   :  { %v768_v3 = vpop.permute.xlu2 %767 }
 0x451   :  { %v770_v58 = vmul.f32 %v768_v3, %v3461_v46 }
 0x458   :  { %v760_v8 = vpop.permute.xlu2 %759 }
 0x459   :  { %v763_v14 = vmul.f32 %v760_v8, %v3424_v63 }
 0x45f   :  { %v772_v2 = vpop.permute.xlu0 %771 }
 0x460   :  { %v775_v9 = vmul.f32 %v772_v2, %v3445_v27  ;;  %v750_v51 = vpop.permute.xlu2 %749 }
 0x461   :  { %v752_v17 = vmul.f32 %v750_v51, %v3452_v35 }
 0x467   :  { %v774_v4 = vpop.permute.xlu1 %773  ;;  %v780_v5 = vpop.permute.xlu0 %779 }
 0x468   :  { %v782_v6 = vmul.f32 %v780_v5, %v3402_v60  ;;  %v776_v39 = vmul.f32 %v774_v4, %v3445_v27  ;;  %v742_v19 = vpop.permute.xlu2 %741 }
 0x469   :  { %v745_v22 = vmul.f32 %v742_v19, %v3466_v50 }
 0x46a   :  { %808 = vmatpush.msrb.mxu0 %v782_v6 }
 0x46c   :  { %809 = vmatpush.msrb.mxu0 %v781_v7 }
 0x46e   :  { %810 = vmatpush.msrb.mxu0 %v776_v39 }
 0x46f   :  { %v766_v40 = vpop.permute.xlu1 %765  ;;  %v754_v10 = vpop.permute.xlu0 %753 }
 0x470   :  { %811 = vmatpush.msrb.mxu0 %v775_v9  ;;  %v769_v11 = vmul.f32 %v766_v40, %v3461_v46  ;;  %v757_v15 = vmul.f32 %v754_v10, %v3439_v21  ;;  %v855_v40 = vld [vmem:[%s4626_s8 + $0x8] sm:$0xff]  ;;  %v854_v10 = vld [vmem:[%s4626_s8] sm:$0xff] }
 0x472   :  { %812 = vmatpush.msrb.mxu0 %v770_v58  ;;  %v1596_v58 = vld [vmem:[%s4627_s14] sm:$0xff] }
 0x474   :  { %813 = vmatpush.msrb.mxu0 %v769_v11  ;;  %v856_v11 = vld [vmem:[%s4628_s19] sm:$0xff] }
 0x476   :  { %814 = vmatpush.msrb.mxu0 %v736_v62 }
 0x477   :  { %v756_v12 = vpop.permute.xlu1 %755  ;;  %v762_v60 = vpop.permute.xlu0 %761 }
 0x478   :  { %v764_v13 = vmul.f32 %v762_v60, %v3424_v63  ;;  %815 = vmatpush.msrb.mxu0 %v735_v52  ;;  %v758_v27 = vmul.f32 %v756_v12, %v3439_v21  ;;  %v737_v21 = vld [vmem:[%s4625_s29] sm:$0xff]  ;;  %v857_v12 = vld [vmem:[%s4628_s19 + $0x8] sm:$0xff] }
 0x47a   :  { %816 = vmatpush.msrb.mxu0 %v764_v13 }
 0x47c   :  { %817 = vmatpush.msrb.mxu0 %v763_v14 }
 0x47e   :  { %818 = vmatpush.msrb.mxu0 %v758_v27 }
 0x47f   :  { %v748_v46 = vpop.permute.xlu1 %747  ;;  %v744_v16 = vpop.permute.xlu0 %743 }
 0x480   :  { %819 = vmatpush.msrb.mxu0 %v757_v15  ;;  %v751_v18 = vmul.f32 %v748_v46, %v3452_v35  ;;  %v746_v63 = vmul.f32 %v744_v16, %v3466_v50  ;;  %v738_v35 = vld [vmem:[%s4625_s29 + $0x8] sm:$0xff]  ;;  %v740_v50 = vld [vmem:[%s4625_s29 + $0x18] sm:$0xff] }
 0x482   :  { %820 = vmatpush.msrb.mxu0 %v752_v17 }
 0x484   :  { %821 = vmatpush.msrb.mxu0 %v751_v18 }
 0x486   :  { %822 = vmatpush.msrb.mxu0 %v746_v63 }
 0x487   :  { %v786_v23 = vpop.permute.xlu1 %785  ;;  %v784_v24 = vpop.permute.xlu0 %783 }
 0x488   :  { %v788_v25 = vmul.f32 %v3475_v0, %v786_v23  ;;  %823 = vmatpush.msrb.mxu0 %v745_v22  ;;  %v787_v26 = vmul.f32 %v3475_v0, %v784_v24  ;;  %v799_v0 = vpop.permute.xlu2 %798 }
 0x489   :  { %824 = vmatmul.f32.vlgmr.msrb.gmra.mxu0 %v737_v21 }
 0x48a   :  { %845 = vmatpush.msrb.mxu1 %v788_v25 }
 0x48c   :  { %846 = vmatpush.msrb.mxu1 %v787_v26 }
 0x48d   :  { %2836 = vmatmul.msk.f32.vlgmr.msrb.gmra.mxu1 %vm801_vm9, %v738_v35 }
 0x48f   :  { %v794_v30 = vpop.permute.xlu1 %793 }
 0x491   :  { %827 = vmatmul.f32.gmra.mxu0 %v739_v28 }
 0x495   :  { %2837 = vmatmul.msk.f32.gmra.mxu1 %vm801_vm9, %v740_v50 }
 0x506   :  { %v825_v29 = vpop.f32.mrf.mxu0 }
 0x507   :  { %v826_v31 = vadd.f32 %v825_v29, %v794_v30 }
 0x50a   :  { %v848_v33 = vpop.f32.mrf.mxu1 }
 0x50b   :  { %v849_v34 = vadd.f32 %v848_v33, %v826_v31 }
 0x50d   :  { %v858_v36 = vmul.f32 %v849_v34, %v3490_v20  ;;  %v870_v45 = vmul.f32 %v849_v34, %v3493_v32 }
 0x50e   :  { %v828_v37 = vpop.f32.mrf.mxu0 }
 0x50f   :  { %860 = vadd.xlane.f32.xlu1 %v858_v36  ;;  %v829_v38 = vadd.f32 %v828_v37, %v799_v0 }
 0x512   :  { %v851_v41 = vpop.f32.mrf.mxu1 }
 0x513   :  { %v852_v42 = vadd.f32 %v851_v41, %v829_v38 }
 0x515   :  { %v871_v43 = vmul.f32 %v852_v42, %v3493_v32  ;;  %v859_v44 = vmul.f32 %v852_v42, %v3490_v20 }
 0x517   :  { %874 = vadd.xlane.f32.xlu2 %v871_v43  ;;  %862 = vadd.xlane.f32.xlu0 %v859_v44 }
 0x51f   :  { %872 = vadd.xlane.f32.xlu0 %v870_v45 }
 0x582   :  { %v861_v55 = vpop.xlane.xlu1 %860 }
 0x583   :  { %v864_v57 = vmul.f32 0.015625, %v861_v55  ;;  %v1137_v55 = vld [vmem:[#allocation7 + $0x3f8] sm:$0xff] }
 0x584   :  { %1198 = vmatpush.msra.mxu0 %v1137_v55  ;;  %v1075_v55 = vld [vmem:[#allocation7 + $0x208] sm:$0xff] }
 0x585   :  { %v866_v2 = vmul.f32 %v864_v57, %v3490_v20  ;;  %v1131_v57 = vld [vmem:[#allocation7 + $0x3c8] sm:$0xff] }
 0x58a   :  { %v875_v47 = vpop.xlane.xlu2 %874  ;;  %v863_v48 = vpop.xlane.xlu0 %862 }
 0x58b   :  { %v877_v49 = vmul.f32 0.015625, %v875_v47  ;;  %v865_v52 = vmul.f32 0.015625, %v863_v48 }
 0x58d   :  { %v879_v53 = vmul.f32 %v877_v49, %v3493_v32  ;;  %v867_v54 = vmul.f32 %v865_v52, %v3490_v20  ;;  %v1134_v52 = vld [vmem:[#allocation7 + $0x3e0] sm:$0xff] }
 0x58e   :  { %1138 = vmatpush.msra.mxu3 %v1134_v52  ;;  %v1088_v52 = vld [vmem:[#allocation7 + $0x270] sm:$0xff] }
 0x58f   :  { %v881_v56 = vadd.f32 %v879_v53, %v867_v54  ;;  %v1135_v53 = vld [vmem:[#allocation7 + $0x3e8] sm:$0xff] }
 0x590   :  { %1158 = vmatpush.msra.mxu1 %v1135_v53  ;;  %v1081_v53 = vld [vmem:[#allocation7 + $0x238] sm:$0xff] }
 0x591   :  { %v3565_v62 = vsub.f32 %v852_v42, %v881_v56  ;;  %v1130_v56 = vld [vmem:[#allocation7 + $0x3c0] sm:$0xff] }
 0x592   :  { %v873_v61 = vpop.xlane.xlu0 %872  ;;  %1139 = vmatpush.msra.mxu3 %v1130_v56  ;;  %1159 = vmatpush.msra.mxu1 %v1131_v57  ;;  %v1084_v56 = vld [vmem:[#allocation7 + $0x250] sm:$0xff]  ;;  %v1077_v57 = vld [vmem:[#allocation7 + $0x218] sm:$0xff] }
 0x593   :  { %v876_v59 = vmul.f32 0.015625, %v873_v61  ;;  %v885_v1 = vmul.f32 %v3565_v62, %v3565_v62 }
 0x595   :  { %v878_v3 = vmul.f32 %v876_v59, %v3493_v32  ;;  %v899_v4 = vmul.f32 %v885_v1, %v3493_v32  ;;  %v887_v9 = vmul.f32 %v885_v1, %v3490_v20  ;;  %v1133_v59 = vld [vmem:[#allocation7 + $0x3d8] sm:$0xff]  ;;  %v1127_v1 = vld [vmem:[#allocation7 + $0x3a8] sm:$0xff] }
 0x596   :  { %1199 = vmatpush.msra.mxu0 %v1133_v59  ;;  %1160 = vmatpush.msra.mxu1 %v1127_v1  ;;  %v1070_v59 = vld [vmem:[#allocation7 + $0x1e8] sm:$0xff]  ;;  %v1072_v1 = vld [vmem:[#allocation7 + $0x1f8] sm:$0xff] }
 0x597   :  { %v880_v5 = vadd.f32 %v878_v3, %v866_v2  ;;  %902 = vadd.xlane.f32.xlu1 %v899_v4  ;;  %v1129_v2 = vld [vmem:[#allocation7 + $0x3b8] sm:$0xff]  ;;  %v1122_v4 = vld [vmem:[#allocation7 + $0x380] sm:$0xff] }
 0x598   :  { %1200 = vmatpush.msra.mxu0 %v1129_v2  ;;  %v1065_v2 = vld [vmem:[#allocation7 + $0x1c0] sm:$0xff] }
 0x599   :  { %v882_v6 = vsub.f32 %v849_v34, %v880_v5  ;;  %v964_v5 = vld [vmem:[%s4629_s22] sm:$0xff] }
 0x59b   :  { %v884_v7 = vmul.f32 %v882_v6, %v882_v6 }
 0x59d   :  { %v898_v39 = vmul.f32 %v884_v7, %v3493_v32  ;;  %v886_v8 = vmul.f32 %v884_v7, %v3490_v20 }
 0x59f   :  { %900 = vadd.xlane.f32.xlu2 %v898_v39  ;;  %888 = vadd.xlane.f32.xlu0 %v886_v8  ;;  %v1136_v39 = vld [vmem:[#allocation7 + $0x3f0] sm:$0xff]  ;;  %v1125_v8 = vld [vmem:[#allocation7 + $0x398] sm:$0xff] }
 0x5a0   :  { %1201 = vmatpush.msra.mxu0 %v1125_v8  ;;  %v1064_v8 = vld [vmem:[#allocation7 + $0x1b8] sm:$0xff] }
 0x5a7   :  { %890 = vadd.xlane.f32.xlu2 %v887_v9  ;;  %v1118_v9 = vld [vmem:[#allocation7 + $0x360] sm:$0xff] }
 0x5b0   :  { %941 = vperm.xlu1 %2910, %v855_v40   ;;  %v1119_v40 = vld [vmem:[#allocation7 + $0x368] sm:$0xff] }
 0x5b3   :  { %936 = vperm.xlu0 %2909, %v854_v10   ;;  %v1132_v10 = vld [vmem:[#allocation7 + $0x3d0] sm:$0xff] }
 0x5b8   :  { %1599 = vperm.xlu1 %2910, %v1596_v58   ;;  %v1121_v58 = vld [vmem:[#allocation7 + $0x378] sm:$0xff] }
 0x5b9   :  { %1202 = vmatpush.msra.mxu0 %v1121_v58  ;;  %v1060_v58 = vld [vmem:[#allocation7 + $0x198] sm:$0xff] }
 0x5bb   :  { %948 = vperm.xlu0 %2909, %v856_v11   ;;  %v1114_v11 = vld [vmem:[#allocation7 + $0x340] sm:$0xff] }
 0x5bf   :  { %953 = vperm.xlu2 %2911, %v857_v12   ;;  %v1115_v12 = vld [vmem:[#allocation7 + $0x348] sm:$0xff] }
 0x60a   :  { %v903_v46 = vpop.xlane.xlu1 %902 }
 0x60b   :  { %v905_v17 = vmul.f32 0.015625, %v903_v46  ;;  %v965_v46 = vld [vmem:[%s4629_s22 + $0x8] sm:$0xff] }
 0x60d   :  { %v907_v22 = vmul.f32 %v905_v17, %v3493_v32  ;;  %v1120_v17 = vld [vmem:[#allocation7 + $0x370] sm:$0xff] }
 0x612   :  { %v901_v60 = vpop.xlane.xlu2 %900  ;;  %v889_v13 = vpop.xlane.xlu0 %888 }
 0x613   :  { %v904_v51 = vmul.f32 0.015625, %v901_v60  ;;  %v892_v14 = vmul.f32 0.015625, %v889_v13  ;;  %v1128_v60 = vld [vmem:[#allocation7 + $0x3b0] sm:$0xff]  ;;  %v1117_v13 = vld [vmem:[#allocation7 + $0x358] sm:$0xff] }
 0x614   :  { %1203 = vmatpush.msra.mxu0 %v1117_v13  ;;  %v1056_v13 = vld [vmem:[#allocation7 + $0x178] sm:$0xff] }
 0x615   :  { %v906_v27 = vmul.f32 %v904_v51, %v3493_v32  ;;  %v894_v15 = vmul.f32 %v892_v14, %v3490_v20  ;;  %v1110_v51 = vld [vmem:[#allocation7 + $0x320] sm:$0xff]  ;;  %v1111_v14 = vld [vmem:[#allocation7 + $0x328] sm:$0xff] }
 0x617   :  { %v908_v16 = vadd.f32 %v906_v27, %v894_v15  ;;  %v1124_v27 = vld [vmem:[#allocation7 + $0x390] sm:$0xff]  ;;  %v1113_v15 = vld [vmem:[#allocation7 + $0x338] sm:$0xff] }
 0x618   :  { %1204 = vmatpush.msra.mxu0 %v1113_v15  ;;  %v1052_v15 = vld [vmem:[#allocation7 + $0x158] sm:$0xff] }
 0x619   :  { %v910_v18 = vadd.f32 1e-05, %v908_v16  ;;  %v1106_v16 = vld [vmem:[#allocation7 + $0x300] sm:$0xff] }
 0x61a   :  { %v891_v19 = vpop.xlane.xlu2 %890 }
 0x61b   :  { %2921 = vrsqrt.f32 %v910_v18  ;;  %v893_v63 = vmul.f32 0.015625, %v891_v19  ;;  %vm918_vm11 = vweird.f32 %v910_v18  ;;  %v1109_v19 = vld [vmem:[#allocation7 + $0x318] sm:$0xff] }
 0x61c   :  { %1205 = vmatpush.msra.mxu0 %v1109_v19  ;;  %v1051_v19 = vld [vmem:[#allocation7 + $0x150] sm:$0xff] }
 0x61d   :  { %v895_v21 = vmul.f32 %v893_v63, %v3490_v20  ;;  %v1102_v63 = vld [vmem:[#allocation7 + $0x2e0] sm:$0xff] }
 0x61f   :  { %v909_v23 = vadd.f32 %v907_v22, %v895_v21  ;;  %v1116_v22 = vld [vmem:[#allocation7 + $0x350] sm:$0xff]  ;;  %v1103_v21 = vld [vmem:[#allocation7 + $0x2e8] sm:$0xff] }
 0x621   :  { %v2922_v24 = vpop.eup %2921  ;;  %v911_v25 = vadd.f32 1e-05, %v909_v23  ;;  %v1105_v23 = vld [vmem:[#allocation7 + $0x2f8] sm:$0xff] }
 0x622   :  { %v913_v26 = vmul.f32 %v2922_v24, %v910_v18  ;;  %vm919_vm10 = vweird.f32 %v2922_v24  ;;  %v942_v44 = vpop.permute.xlu1 %941  ;;  %v954_v48 = vpop.permute.xlu2 %953  ;;  %v1107_v18 = vld [vmem:[#allocation7 + $0x308] sm:$0xff]  ;;  %1206 = vmatpush.msra.mxu0 %v1105_v23  ;;  %v1047_v23 = vld [vmem:[#allocation7 + $0x130] sm:$0xff] }
 0x623   :  { %2923 = vrsqrt.f32 %v911_v25  ;;  %vm920_vm12 = vmor %vm918_vm11, %vm919_vm10  ;;  %vm928_vm14 = vweird.f32 %v911_v25 }
 0x624   :  { %v914_v35 = vmul.f32 %v2922_v24, %v913_v26  ;;  %v1099_v26 = vld [vmem:[#allocation7 + $0x2c8] sm:$0xff] }
 0x625   :  { %v937_v33 = vpop.permute.xlu0 %936 }
 0x626   :  { %v915_v28 = vmul.f32 0.5, %v914_v35  ;;  %v1101_v35 = vld [vmem:[#allocation7 + $0x2d8] sm:$0xff] }
 0x627   :  { %1207 = vmatpush.msra.mxu0 %v1101_v35  ;;  %v1043_v35 = vld [vmem:[#allocation7 + $0x110] sm:$0xff] }
 0x628   :  { %v916_v50 = vsub.f32 1.5, %v915_v28  ;;  %v1094_v28 = vld [vmem:[#allocation7 + $0x2a0] sm:$0xff] }
 0x629   :  { %v2924_v29 = vpop.eup %2923 }
 0x62a   :  { %v923_v30 = vmul.f32 %v2924_v29, %v911_v25  ;;  %v917_v31 = vmul.f32 %v2922_v24, %v916_v50  ;;  %vm929_vm13 = vweird.f32 %v2924_v29  ;;  %v1112_v25 = vld [vmem:[#allocation7 + $0x330] sm:$0xff] }
 0x62b   :  { %vm930_vm15 = vmor %vm928_vm14, %vm929_vm13  ;;  %v1108_v50 = vld [vmem:[#allocation7 + $0x310] sm:$0xff] }
 0x62c   :  { %v924_v34 = vmul.f32 %v2924_v29, %v923_v30  ;;  %v921_v36 = vsel %vm920_vm12, %v2922_v24, %v917_v31  ;;  %v1098_v24 = vld [vmem:[#allocation7 + $0x2c0] sm:$0xff]  ;;  %v1097_v31 = vld [vmem:[#allocation7 + $0x2b8] sm:$0xff] }
 0x62d   :  { %v932_v37 = vmul.f32 %v921_v36, %v882_v6  ;;  %v949_v43 = vpop.permute.xlu0 %948  ;;  %v1123_v6 = vld [vmem:[#allocation7 + $0x388] sm:$0xff]  ;;  %v966_v30 = vld [vmem:[%s4629_s22 + $0x10] sm:$0xff]  ;;  %1208 = vmatpush.msra.mxu0 %v1097_v31 }
 0x62e   :  { %v925_v32 = vmul.f32 0.5, %v924_v34  ;;  %1161 = vmatpush.msra.mxu1 %v1123_v6  ;;  %v1090_v34 = vld [vmem:[#allocation7 + $0x280] sm:$0xff]  ;;  %v1091_v36 = vld [vmem:[#allocation7 + $0x288] sm:$0xff]  ;;  %v1071_v6 = vld [vmem:[#allocation7 + $0x1f0] sm:$0xff] }
 0x62f   :  { %v944_v38 = vmul.f32 %v937_v33, %v932_v37  ;;  %v1104_v33 = vld [vmem:[#allocation7 + $0x2f0] sm:$0xff]  ;;  %v1029_v31 = vld [vmem:[#allocation7 + $0xa0] sm:$0xff] }
 0x630   :  { %v926_v20 = vsub.f32 1.5, %v925_v32  ;;  %1162 = vmatpush.msra.mxu1 %v1119_v40  ;;  %v1093_v32 = vld [vmem:[#allocation7 + $0x298] sm:$0xff]  ;;  %v1100_v37 = vld [vmem:[#allocation7 + $0x2d0] sm:$0xff]  ;;  %v1057_v40 = vld [vmem:[#allocation7 + $0x180] sm:$0xff] }
 0x631   :  { %v956_v45 = vadd.f32 %v949_v43, %v944_v38  ;;  %v1089_v38 = vld [vmem:[#allocation7 + $0x278] sm:$0xff]  ;;  %1209 = vmatpush.msra.mxu0 %v1093_v32  ;;  %v1083_v43 = vld [vmem:[#allocation7 + $0x248] sm:$0xff]  ;;  %v1031_v32 = vld [vmem:[#allocation7 + $0xb0] sm:$0xff] }
 0x632   :  { %v927_v0 = vmul.f32 %v2924_v29, %v926_v20  ;;  %1163 = vmatpush.msra.mxu1 %v1115_v12  ;;  %v1086_v20 = vld [vmem:[#allocation7 + $0x260] sm:$0xff] }
 0x633   :  { %v960_v54 = vmul.f32 0.01, %v956_v45  ;;  %vm958_vm1 = vcmp.gt.f32.partialorder %v956_v45, 0.0  ;;  %1210 = vmatpush.msra.mxu0 %v1089_v38  ;;  %v1053_v12 = vld [vmem:[#allocation7 + $0x160] sm:$0xff]  ;;  %v1028_v38 = vld [vmem:[#allocation7 + $0x98] sm:$0xff] }
 0x634   :  { %v931_v41 = vsel %vm930_vm15, %v2924_v29, %v927_v0  ;;  %1164 = vmatpush.msra.mxu1 %v1111_v14  ;;  %v1095_v29 = vld [vmem:[#allocation7 + $0x2a8] sm:$0xff]  ;;  %v1049_v14 = vld [vmem:[#allocation7 + $0x140] sm:$0xff] }
 0x635   :  { %v933_v42 = vmul.f32 %v931_v41, %v3565_v62  ;;  %v1126_v62 = vld [vmem:[#allocation7 + $0x3a0] sm:$0xff]  ;;  %v962_v7 = vsel %vm958_vm1, %v956_v45, %v960_v54  ;;  %v1087_v0 = vld [vmem:[#allocation7 + $0x268] sm:$0xff]  ;;  %v1096_v41 = vld [vmem:[#allocation7 + $0x2b0] sm:$0xff] }
 0x636   :  { %1140 = vmatpush.msra.mxu3 %v1126_v62  ;;  %1165 = vmatpush.msra.mxu1 %v1107_v18  ;;  %v1092_v45 = vld [vmem:[#allocation7 + $0x290] sm:$0xff]  ;;  %v1074_v54 = vld [vmem:[#allocation7 + $0x200] sm:$0xff]  ;;  %v1048_v18 = vld [vmem:[#allocation7 + $0x138] sm:$0xff] }
 0x637   :  { %v945_v47 = vmul.f32 %v942_v44, %v933_v42  ;;  %v1082_v42 = vld [vmem:[#allocation7 + $0x240] sm:$0xff]  ;;  %v1085_v44 = vld [vmem:[#allocation7 + $0x258] sm:$0xff]  ;;  %v1080_v62 = vld [vmem:[#allocation7 + $0x230] sm:$0xff] }
 0x638   :  { %1141 = vmatpush.msra.mxu3 %v1122_v4  ;;  %1166 = vmatpush.msra.mxu1 %v1103_v21  ;;  %v1076_v4 = vld [vmem:[#allocation7 + $0x210] sm:$0xff]  ;;  %v1044_v21 = vld [vmem:[#allocation7 + $0x118] sm:$0xff] }
 0x639   :  { %v957_v49 = vadd.f32 %v954_v48, %v945_v47  ;;  %v1078_v47 = vld [vmem:[#allocation7 + $0x220] sm:$0xff]  ;;  %v967_v48 = vld [vmem:[%s4629_s22 + $0x18] sm:$0xff]  ;;  %1211 = vmatpush.msra.mxu0 %v1085_v44  ;;  %v1024_v44 = vld [vmem:[#allocation7 + $0x78] sm:$0xff] }
 0x63a   :  { %1142 = vmatpush.msra.mxu3 %v1118_v9  ;;  %1167 = vmatpush.msra.mxu1 %v1099_v26  ;;  %v1067_v9 = vld [vmem:[#allocation7 + $0x1d0] sm:$0xff]  ;;  %v1040_v26 = vld [vmem:[#allocation7 + $0xf8] sm:$0xff] }
 0x63b   :  { %vm959_vm0 = vcmp.gt.f32.partialorder %v957_v49, 0.0  ;;  %v961_v61 = vmul.f32 0.01, %v957_v49  ;;  %1212 = vmatpush.msra.mxu0 %v1081_v53  ;;  %v1014_v53 = vld [vmem:[#allocation7 + $0x28] sm:$0xff] }
 0x63c   :  { %1143 = vmatpush.msra.mxu3 %v1114_v11  ;;  %1168 = vmatpush.msra.mxu1 %v1095_v29  ;;  %v1063_v11 = vld [vmem:[#allocation7 + $0x1b0] sm:$0xff]  ;;  %v1036_v29 = vld [vmem:[#allocation7 + $0xd8] sm:$0xff] }
 0x63d   :  { %v963_v3 = vsel %vm959_vm0, %v957_v49, %v961_v61  ;;  %v1079_v49 = vld [vmem:[#allocation7 + $0x228] sm:$0xff]  ;;  %v1069_v61 = vld [vmem:[#allocation7 + $0x1e0] sm:$0xff]  ;;  %1213 = vmatpush.msra.mxu0 %v1077_v57 }
 0x63e   :  { %994 = vmatpush.msra.mxu2 %v963_v3  ;;  %1144 = vmatpush.msra.mxu3 %v1110_v51  ;;  %v1066_v3 = vld [vmem:[#allocation7 + $0x1c8] sm:$0xff]  ;;  %v1059_v51 = vld [vmem:[#allocation7 + $0x190] sm:$0xff] }
 0x63f   :  { %1169 = vmatpush.msra.mxu1 %v1091_v36  ;;  %1278 = vmatpush.msrb.mxu0 %v1072_v1  ;;  %v1035_v36 = vld [vmem:[#allocation7 + $0xd0] sm:$0xff]  ;;  %v1010_v57 = vld [vmem:[#allocation7 + $0x8] sm:$0xff] }
 0x640   :  { %995 = vmatpush.msra.mxu2 %v962_v7  ;;  %1145 = vmatpush.msra.mxu3 %v1106_v16  ;;  %v1061_v7 = vld [vmem:[#allocation7 + $0x1a0] sm:$0xff] }
 0x641   :  { %2838 = vmatmul.msk.f32.vlgmr.msra.gmra.mxu2 %vm801_vm9, %v964_v5  ;;  %1170 = vmatpush.msra.mxu1 %v1087_v0  ;;  %v1068_v5 = vld [vmem:[#allocation7 + $0x1d8] sm:$0xff]  ;;  %v1045_v16 = vld [vmem:[#allocation7 + $0x120] sm:$0xff]  ;;  %v1027_v0 = vld [vmem:[#allocation7 + $0x90] sm:$0xff] }
 0x642   :  { %1178 = vmatpush.msrb.mxu2 %v1136_v39  ;;  %1146 = vmatpush.msra.mxu3 %v1102_v63  ;;  %v1062_v39 = vld [vmem:[#allocation7 + $0x1a8] sm:$0xff]  ;;  %v1041_v63 = vld [vmem:[#allocation7 + $0x100] sm:$0xff] }
 0x643   :  { %1171 = vmatpush.msra.mxu1 %v1083_v43  ;;  %1279 = vmatpush.msrb.mxu0 %v1068_v5  ;;  %v1023_v43 = vld [vmem:[#allocation7 + $0x70] sm:$0xff]  ;;  %v1362_v5 = vld [vmem:[#allocation7 + $0x5f8] sm:$0xff] }
 0x644   :  { %1179 = vmatpush.msrb.mxu2 %v1132_v10  ;;  %1147 = vmatpush.msra.mxu3 %v1098_v24  ;;  %v1058_v10 = vld [vmem:[#allocation7 + $0x188] sm:$0xff]  ;;  %v1037_v24 = vld [vmem:[#allocation7 + $0xe0] sm:$0xff] }
 0x645   :  { %1172 = vmatpush.msra.mxu1 %v1079_v49  ;;  %1280 = vmatpush.msrb.mxu0 %v1064_v8  ;;  %v1020_v49 = vld [vmem:[#allocation7 + $0x58] sm:$0xff] }
 0x646   :  { %1180 = vmatpush.msrb.mxu2 %v1128_v60  ;;  %1148 = vmatpush.msra.mxu3 %v1094_v28  ;;  %v1054_v60 = vld [vmem:[#allocation7 + $0x168] sm:$0xff]  ;;  %v1033_v28 = vld [vmem:[#allocation7 + $0xc0] sm:$0xff]  ;;  %v1358_v8 = vld [vmem:[#allocation7 + $0x5d8] sm:$0xff] }
 0x647   :  { %1173 = vmatpush.msra.mxu1 %v1075_v55  ;;  %1281 = vmatpush.msrb.mxu0 %v1060_v58  ;;  %v1016_v55 = vld [vmem:[#allocation7 + $0x38] sm:$0xff] }
 0x648   :  { %1181 = vmatpush.msrb.mxu2 %v1124_v27  ;;  %1149 = vmatpush.msra.mxu3 %v1090_v34  ;;  %v1050_v27 = vld [vmem:[#allocation7 + $0x148] sm:$0xff]  ;;  %v1032_v34 = vld [vmem:[#allocation7 + $0xb8] sm:$0xff] }
 0x649   :  { %2839 = vmatmul.msk.f32.gmra.mxu2 %vm801_vm9, %v965_v46  ;;  %1238 = vmatpush.msrb.mxu1 %v1070_v59  ;;  %v1055_v46 = vld [vmem:[#allocation7 + $0x170] sm:$0xff]  ;;  %v1012_v59 = vld [vmem:[#allocation7 + $0x18] sm:$0xff] }
 0x64a   :  { %1182 = vmatpush.msrb.mxu2 %v1120_v17  ;;  %1150 = vmatpush.msra.mxu3 %v1086_v20  ;;  %v1046_v17 = vld [vmem:[#allocation7 + $0x128] sm:$0xff]  ;;  %v1354_v58 = vld [vmem:[#allocation7 + $0x5b8] sm:$0xff] }
 0x64b   :  { %1239 = vmatpush.msrb.mxu1 %v1066_v3  ;;  %1282 = vmatpush.msrb.mxu0 %v1056_v13  ;;  %v1026_v20 = vld [vmem:[#allocation7 + $0x88] sm:$0xff]  ;;  %v1350_v13 = vld [vmem:[#allocation7 + $0x598] sm:$0xff] }
 0x64c   :  { %1183 = vmatpush.msrb.mxu2 %v1116_v22  ;;  %1151 = vmatpush.msra.mxu3 %v1082_v42  ;;  %v1042_v22 = vld [vmem:[#allocation7 + $0x108] sm:$0xff] }
 0x64d   :  { %1240 = vmatpush.msrb.mxu1 %v1062_v39  ;;  %1283 = vmatpush.msrb.mxu0 %v1052_v15  ;;  %v1022_v42 = vld [vmem:[#allocation7 + $0x68] sm:$0xff]  ;;  %v1357_v39 = vld [vmem:[#allocation7 + $0x5d0] sm:$0xff]  ;;  %v1346_v15 = vld [vmem:[#allocation7 + $0x578] sm:$0xff] }
 0x64e   :  { %1184 = vmatpush.msrb.mxu2 %v1112_v25  ;;  %1152 = vmatpush.msra.mxu3 %v1078_v47  ;;  %v1038_v25 = vld [vmem:[#allocation7 + $0xe8] sm:$0xff] }
 0x64f   :  { %1241 = vmatpush.msrb.mxu1 %v1058_v10  ;;  %1284 = vmatpush.msrb.mxu0 %v1048_v18  ;;  %v1018_v47 = vld [vmem:[#allocation7 + $0x48] sm:$0xff]  ;;  %v1353_v10 = vld [vmem:[#allocation7 + $0x5b0] sm:$0xff]  ;;  %v1342_v18 = vld [vmem:[#allocation7 + $0x558] sm:$0xff] }
 0x650   :  { %1185 = vmatpush.msrb.mxu2 %v1108_v50  ;;  %1153 = vmatpush.msra.mxu3 %v1074_v54  ;;  %v1034_v50 = vld [vmem:[#allocation7 + $0xc8] sm:$0xff]  ;;  %v1015_v54 = vld [vmem:[#allocation7 + $0x30] sm:$0xff] }
 0x651   :  { %2840 = vmatmul.msk.f32.gmra.mxu2 %vm801_vm9, %v966_v30  ;;  %1242 = vmatpush.msrb.mxu1 %v1054_v60  ;;  %v1039_v30 = vld [vmem:[#allocation7 + $0xf0] sm:$0xff]  ;;  %v1360_v3 = vld [vmem:[#allocation7 + $0x5e8] sm:$0xff] }
 0x652   :  { %1186 = vmatpush.msrb.mxu2 %v1104_v33  ;;  %1218 = vmatpush.msrb.mxu3 %v1069_v61  ;;  %v1030_v33 = vld [vmem:[#allocation7 + $0xa8] sm:$0xff]  ;;  %v1011_v61 = vld [vmem:[#allocation7 + $0x10] sm:$0xff] }
 0x653   :  { %1243 = vmatpush.msrb.mxu1 %v1050_v27  ;;  %1285 = vmatpush.msrb.mxu0 %v1044_v21  ;;  %v1349_v60 = vld [vmem:[#allocation7 + $0x590] sm:$0xff]  ;;  %v1338_v21 = vld [vmem:[#allocation7 + $0x538] sm:$0xff] }
 0x654   :  { %1187 = vmatpush.msrb.mxu2 %v1100_v37  ;;  %1219 = vmatpush.msrb.mxu3 %v1065_v2  ;;  %v1025_v37 = vld [vmem:[#allocation7 + $0x80] sm:$0xff]  ;;  %v1345_v27 = vld [vmem:[#allocation7 + $0x570] sm:$0xff] }
 0x655   :  { %1244 = vmatpush.msrb.mxu1 %v1046_v17  ;;  %1286 = vmatpush.msrb.mxu0 %v1040_v26  ;;  %v1359_v2 = vld [vmem:[#allocation7 + $0x5e0] sm:$0xff]  ;;  %v1341_v17 = vld [vmem:[#allocation7 + $0x550] sm:$0xff]  ;;  %v1334_v26 = vld [vmem:[#allocation7 + $0x518] sm:$0xff] }
 0x656   :  { %1188 = vmatpush.msrb.mxu2 %v1096_v41  ;;  %1220 = vmatpush.msrb.mxu3 %v1061_v7  ;;  %v1021_v41 = vld [vmem:[#allocation7 + $0x60] sm:$0xff]  ;;  %v1356_v7 = vld [vmem:[#allocation7 + $0x5c8] sm:$0xff] }
 0x657   :  { %1245 = vmatpush.msrb.mxu1 %v1042_v22  ;;  %1287 = vmatpush.msrb.mxu0 %v1036_v29  ;;  %v1337_v22 = vld [vmem:[#allocation7 + $0x530] sm:$0xff]  ;;  %v1330_v29 = vld [vmem:[#allocation7 + $0x4f8] sm:$0xff] }
 0x658   :  { %1189 = vmatpush.msrb.mxu2 %v1092_v45  ;;  %1221 = vmatpush.msrb.mxu3 %v1057_v40  ;;  %v1017_v45 = vld [vmem:[#allocation7 + $0x40] sm:$0xff]  ;;  %v1352_v40 = vld [vmem:[#allocation7 + $0x5a8] sm:$0xff] }
 0x659   :  { %2841 = vmatmul.msk.f32.gmra.mxu2 %vm801_vm9, %v967_v48  ;;  %1246 = vmatpush.msrb.mxu1 %v1038_v25  ;;  %v1019_v48 = vld [vmem:[#allocation7 + $0x50] sm:$0xff] }
 0x65a   :  { %1190 = vmatpush.msrb.mxu2 %v1088_v52  ;;  %1222 = vmatpush.msrb.mxu3 %v1053_v12  ;;  %v1013_v52 = vld [vmem:[#allocation7 + $0x20] sm:$0xff]  ;;  %v1348_v12 = vld [vmem:[#allocation7 + $0x588] sm:$0xff]  ;;  %v1333_v25 = vld [vmem:[#allocation7 + $0x510] sm:$0xff] }
 0x65b   :  { %1247 = vmatpush.msrb.mxu1 %v1034_v50  ;;  %1288 = vmatpush.msrb.mxu0 %v1032_v34  ;;  %v1329_v50 = vld [vmem:[#allocation7 + $0x4f0] sm:$0xff]  ;;  %v1326_v34 = vld [vmem:[#allocation7 + $0x4d8] sm:$0xff] }
 0x65c   :  { %1191 = vmatpush.msrb.mxu2 %v1084_v56  ;;  %1223 = vmatpush.msrb.mxu3 %v1049_v14  ;;  %v1009_v56 = vld [vmem:[#allocation7] sm:$0xff]  ;;  %v1344_v14 = vld [vmem:[#allocation7 + $0x568] sm:$0xff] }
 0x65d   :  { %1248 = vmatpush.msrb.mxu1 %v1030_v33  ;;  %1289 = vmatpush.msrb.mxu0 %v1028_v38  ;;  %v1325_v33 = vld [vmem:[#allocation7 + $0x4d0] sm:$0xff]  ;;  %v1316_v38 = vld [vmem:[#allocation7 + $0x488] sm:$0xff] }
 0x65e   :  { %1192 = vmatpush.msrb.mxu2 %v1080_v62  ;;  %1224 = vmatpush.msrb.mxu3 %v1045_v16  ;;  %v1340_v16 = vld [vmem:[#allocation7 + $0x548] sm:$0xff] }
 0x65f   :  { %1249 = vmatpush.msrb.mxu1 %v1026_v20  ;;  %1290 = vmatpush.msrb.mxu0 %v1024_v44  ;;  %v1322_v20 = vld [vmem:[#allocation7 + $0x4b8] sm:$0xff]  ;;  %v1312_v44 = vld [vmem:[#allocation7 + $0x468] sm:$0xff] }
 0x660   :  { %1193 = vmatpush.msrb.mxu2 %v1076_v4  ;;  %1225 = vmatpush.msrb.mxu3 %v1041_v63  ;;  %v1361_v4 = vld [vmem:[#allocation7 + $0x5f0] sm:$0xff]  ;;  %v1336_v63 = vld [vmem:[#allocation7 + $0x528] sm:$0xff] }
 0x661   :  { %1250 = vmatpush.msrb.mxu1 %v1022_v42  ;;  %1291 = vmatpush.msrb.mxu0 %v1020_v49  ;;  %v1318_v42 = vld [vmem:[#allocation7 + $0x498] sm:$0xff]  ;;  %v1308_v49 = vld [vmem:[#allocation7 + $0x448] sm:$0xff] }
 0x662   :  { %1258 = vmatpush.msra.mxu2 %v1071_v6  ;;  %1226 = vmatpush.msrb.mxu3 %v1037_v24  ;;  %v1355_v6 = vld [vmem:[#allocation7 + $0x5c0] sm:$0xff]  ;;  %v1332_v24 = vld [vmem:[#allocation7 + $0x508] sm:$0xff] }
 0x663   :  { %1251 = vmatpush.msrb.mxu1 %v1018_v47  ;;  %1292 = vmatpush.msrb.mxu0 %v1016_v55  ;;  %v1314_v47 = vld [vmem:[#allocation7 + $0x478] sm:$0xff]  ;;  %v1304_v55 = vld [vmem:[#allocation7 + $0x428] sm:$0xff] }
 0x664   :  { %1259 = vmatpush.msra.mxu2 %v1067_v9  ;;  %1227 = vmatpush.msrb.mxu3 %v1033_v28  ;;  %v1351_v9 = vld [vmem:[#allocation7 + $0x5a0] sm:$0xff]  ;;  %v1328_v28 = vld [vmem:[#allocation7 + $0x4e8] sm:$0xff] }
 0x665   :  { %1252 = vmatpush.msrb.mxu1 %v1014_v53  ;;  %1293 = vmatpush.msrb.mxu0 %v1012_v59  ;;  %v1310_v53 = vld [vmem:[#allocation7 + $0x458] sm:$0xff]  ;;  %v1300_v59 = vld [vmem:[#allocation7 + $0x408] sm:$0xff] }
 0x666   :  { %1260 = vmatpush.msra.mxu2 %v1063_v11  ;;  %1228 = vmatpush.msrb.mxu3 %v1029_v31  ;;  %v1347_v11 = vld [vmem:[#allocation7 + $0x580] sm:$0xff]  ;;  %v1324_v31 = vld [vmem:[#allocation7 + $0x4c8] sm:$0xff] }
 0x667   :  { %1253 = vmatpush.msrb.mxu1 %v1010_v57  ;;  %v1306_v57 = vld [vmem:[#allocation7 + $0x438] sm:$0xff] }
 0x668   :  { %1261 = vmatpush.msra.mxu2 %v1059_v51  ;;  %1229 = vmatpush.msrb.mxu3 %v1025_v37  ;;  %v1343_v51 = vld [vmem:[#allocation7 + $0x560] sm:$0xff]  ;;  %v1321_v37 = vld [vmem:[#allocation7 + $0x4b0] sm:$0xff] }
 0x66a   :  { %1262 = vmatpush.msra.mxu2 %v1055_v46  ;;  %1230 = vmatpush.msrb.mxu3 %v1021_v41  ;;  %v1339_v46 = vld [vmem:[#allocation7 + $0x540] sm:$0xff]  ;;  %v1317_v41 = vld [vmem:[#allocation7 + $0x490] sm:$0xff] }
 0x66c   :  { %1263 = vmatpush.msra.mxu2 %v1051_v19  ;;  %1231 = vmatpush.msrb.mxu3 %v1017_v45  ;;  %v1335_v19 = vld [vmem:[#allocation7 + $0x520] sm:$0xff]  ;;  %v1313_v45 = vld [vmem:[#allocation7 + $0x470] sm:$0xff] }
 0x66e   :  { %1264 = vmatpush.msra.mxu2 %v1047_v23  ;;  %1232 = vmatpush.msrb.mxu3 %v1013_v52  ;;  %v1331_v23 = vld [vmem:[#allocation7 + $0x500] sm:$0xff]  ;;  %v1309_v52 = vld [vmem:[#allocation7 + $0x450] sm:$0xff] }
 0x670   :  { %1265 = vmatpush.msra.mxu2 %v1043_v35  ;;  %1233 = vmatpush.msrb.mxu3 %v1009_v56  ;;  %v1327_v35 = vld [vmem:[#allocation7 + $0x4e0] sm:$0xff]  ;;  %v1305_v56 = vld [vmem:[#allocation7 + $0x430] sm:$0xff] }
 0x672   :  { %1266 = vmatpush.msra.mxu2 %v1039_v30  ;;  %v1323_v30 = vld [vmem:[#allocation7 + $0x4c0] sm:$0xff] }
 0x674   :  { %1267 = vmatpush.msra.mxu2 %v1035_v36  ;;  %v1319_v36 = vld [vmem:[#allocation7 + $0x4a0] sm:$0xff] }
 0x676   :  { %1268 = vmatpush.msra.mxu2 %v1031_v32  ;;  %v1320_v32 = vld [vmem:[#allocation7 + $0x4a8] sm:$0xff] }
 0x678   :  { %1269 = vmatpush.msra.mxu2 %v1027_v0  ;;  %v1315_v0 = vld [vmem:[#allocation7 + $0x480] sm:$0xff] }
 0x67a   :  { %1270 = vmatpush.msra.mxu2 %v1023_v43  ;;  %v1311_v43 = vld [vmem:[#allocation7 + $0x460] sm:$0xff] }
 0x67c   :  { %1271 = vmatpush.msra.mxu2 %v1019_v48  ;;  %v1307_v48 = vld [vmem:[#allocation7 + $0x440] sm:$0xff] }
 0x67e   :  { %1272 = vmatpush.msra.mxu2 %v1015_v54  ;;  %v1303_v54 = vld [vmem:[#allocation7 + $0x420] sm:$0xff] }
 0x680   :  { %1273 = vmatpush.msra.mxu2 %v1011_v61  ;;  %v1299_v61 = vld [vmem:[#allocation7 + $0x400] sm:$0xff] }
 0x6c4   :  { %v997_v62 = vpop.f32.mrf.mxu2 }
 0x6cc   :  { %v1000_v1 = vpop.f32.mrf.mxu2 }
 0x6cd   :  { %1154 = vmatmul.f32.vlgmr.msra.gmra.mxu3 %v1000_v1  ;;  %1174 = vmatmul.f32.vlgmr.msra.gmra.mxu1 %v1000_v1 }
 0x6ce   :  { %1194 = vmatmul.f32.vlgmr.msrb.gmra.mxu2 %v1000_v1  ;;  %1214 = vmatmul.f32.vlgmr.msra.gmra.mxu0 %v1000_v1  ;;  %v1302_v1 = vld [vmem:[#allocation7 + $0x418] sm:$0xff] }
 0x6cf   :  { %1363 = vmatpush.msra.mxu3 %v1359_v2  ;;  %1383 = vmatpush.msra.mxu1 %v1360_v3  ;;  %v1508_v3 = vld [vmem:[#allocation7 + $0x7e0] sm:$0xff] }
 0x6d0   :  { %1403 = vmatpush.msrb.mxu2 %v1361_v4  ;;  %1423 = vmatpush.msra.mxu0 %v1362_v5  ;;  %v1509_v4 = vld [vmem:[#allocation7 + $0x7e8] sm:$0xff]  ;;  %v1510_v5 = vld [vmem:[#allocation7 + $0x7f0] sm:$0xff] }
 0x6d1   :  { %1364 = vmatpush.msra.mxu3 %v1355_v6  ;;  %1384 = vmatpush.msra.mxu1 %v1356_v7  ;;  %v1511_v6 = vld [vmem:[#allocation7 + $0x7f8] sm:$0xff]  ;;  %v1504_v7 = vld [vmem:[#allocation7 + $0x7c0] sm:$0xff] }
 0x6d2   :  { %1404 = vmatpush.msrb.mxu2 %v1357_v39  ;;  %1424 = vmatpush.msra.mxu0 %v1358_v8  ;;  %v1505_v39 = vld [vmem:[#allocation7 + $0x7c8] sm:$0xff]  ;;  %v1506_v8 = vld [vmem:[#allocation7 + $0x7d0] sm:$0xff] }
 0x6d3   :  { %1365 = vmatpush.msra.mxu3 %v1351_v9  ;;  %1385 = vmatpush.msra.mxu1 %v1352_v40  ;;  %v1507_v9 = vld [vmem:[#allocation7 + $0x7d8] sm:$0xff]  ;;  %v1500_v40 = vld [vmem:[#allocation7 + $0x7a0] sm:$0xff] }
 0x6d4   :  { %1405 = vmatpush.msrb.mxu2 %v1353_v10  ;;  %1425 = vmatpush.msra.mxu0 %v1354_v58  ;;  %v1003_v2 = vpop.f32.mrf.mxu2  ;;  %v1501_v10 = vld [vmem:[#allocation7 + $0x7a8] sm:$0xff]  ;;  %v1502_v58 = vld [vmem:[#allocation7 + $0x7b0] sm:$0xff] }
 0x6d5   :  { %1366 = vmatpush.msra.mxu3 %v1347_v11  ;;  %1386 = vmatpush.msra.mxu1 %v1348_v12  ;;  %v1503_v11 = vld [vmem:[#allocation7 + $0x7b8] sm:$0xff]  ;;  %v1496_v12 = vld [vmem:[#allocation7 + $0x780] sm:$0xff] }
 0x6d6   :  { %1406 = vmatpush.msrb.mxu2 %v1349_v60  ;;  %1426 = vmatpush.msra.mxu0 %v1350_v13  ;;  %v1497_v60 = vld [vmem:[#allocation7 + $0x788] sm:$0xff]  ;;  %v1498_v13 = vld [vmem:[#allocation7 + $0x790] sm:$0xff] }
 0x6d7   :  { %1234 = vmatmul.f32.vlgmr.msrb.gmra.mxu3 %v997_v62  ;;  %1254 = vmatmul.f32.vlgmr.msrb.gmra.mxu1 %v997_v62 }
 0x6d8   :  { %1274 = vmatmul.f32.vlgmr.msra.gmra.mxu2 %v997_v62  ;;  %1294 = vmatmul.f32.vlgmr.msrb.gmra.mxu0 %v997_v62  ;;  %v1301_v62 = vld [vmem:[#allocation7 + $0x410] sm:$0xff] }
 0x6d9   :  { %1367 = vmatpush.msra.mxu3 %v1343_v51  ;;  %1387 = vmatpush.msra.mxu1 %v1344_v14  ;;  %v1499_v51 = vld [vmem:[#allocation7 + $0x798] sm:$0xff]  ;;  %v1492_v14 = vld [vmem:[#allocation7 + $0x760] sm:$0xff] }
 0x6da   :  { %1407 = vmatpush.msrb.mxu2 %v1345_v27  ;;  %1427 = vmatpush.msra.mxu0 %v1346_v15  ;;  %v1493_v27 = vld [vmem:[#allocation7 + $0x768] sm:$0xff]  ;;  %v1494_v15 = vld [vmem:[#allocation7 + $0x770] sm:$0xff] }
 0x6db   :  { %1368 = vmatpush.msra.mxu3 %v1339_v46  ;;  %1388 = vmatpush.msra.mxu1 %v1340_v16  ;;  %v1495_v46 = vld [vmem:[#allocation7 + $0x778] sm:$0xff]  ;;  %v1488_v16 = vld [vmem:[#allocation7 + $0x740] sm:$0xff] }
 0x6dc   :  { %1408 = vmatpush.msrb.mxu2 %v1341_v17  ;;  %1428 = vmatpush.msra.mxu0 %v1342_v18  ;;  %v1489_v17 = vld [vmem:[#allocation7 + $0x748] sm:$0xff]  ;;  %v1490_v18 = vld [vmem:[#allocation7 + $0x750] sm:$0xff] }
 0x6dd   :  { %1369 = vmatpush.msra.mxu3 %v1335_v19  ;;  %1389 = vmatpush.msra.mxu1 %v1336_v63  ;;  %v1491_v19 = vld [vmem:[#allocation7 + $0x758] sm:$0xff]  ;;  %v1484_v63 = vld [vmem:[#allocation7 + $0x720] sm:$0xff] }
 0x6de   :  { %1409 = vmatpush.msrb.mxu2 %v1337_v22  ;;  %1429 = vmatpush.msra.mxu0 %v1338_v21  ;;  %v1485_v22 = vld [vmem:[#allocation7 + $0x728] sm:$0xff]  ;;  %v1486_v21 = vld [vmem:[#allocation7 + $0x730] sm:$0xff] }
 0x6df   :  { %1370 = vmatpush.msra.mxu3 %v1331_v23  ;;  %1390 = vmatpush.msra.mxu1 %v1332_v24  ;;  %v1487_v23 = vld [vmem:[#allocation7 + $0x738] sm:$0xff]  ;;  %v1480_v24 = vld [vmem:[#allocation7 + $0x700] sm:$0xff] }
 0x6e0   :  { %1410 = vmatpush.msrb.mxu2 %v1333_v25  ;;  %1430 = vmatpush.msra.mxu0 %v1334_v26  ;;  %v1481_v25 = vld [vmem:[#allocation7 + $0x708] sm:$0xff]  ;;  %v1482_v26 = vld [vmem:[#allocation7 + $0x710] sm:$0xff] }
 0x6e1   :  { %1371 = vmatpush.msra.mxu3 %v1327_v35  ;;  %1391 = vmatpush.msra.mxu1 %v1328_v28  ;;  %v1483_v35 = vld [vmem:[#allocation7 + $0x718] sm:$0xff]  ;;  %v1476_v28 = vld [vmem:[#allocation7 + $0x6e0] sm:$0xff] }
 0x6e2   :  { %1411 = vmatpush.msrb.mxu2 %v1329_v50  ;;  %1431 = vmatpush.msra.mxu0 %v1330_v29  ;;  %v1477_v50 = vld [vmem:[#allocation7 + $0x6e8] sm:$0xff]  ;;  %v1478_v29 = vld [vmem:[#allocation7 + $0x6f0] sm:$0xff] }
 0x6e3   :  { %1372 = vmatpush.msra.mxu3 %v1323_v30  ;;  %1392 = vmatpush.msra.mxu1 %v1324_v31  ;;  %v1479_v30 = vld [vmem:[#allocation7 + $0x6f8] sm:$0xff]  ;;  %v1472_v31 = vld [vmem:[#allocation7 + $0x6c0] sm:$0xff] }
 0x6e4   :  { %1412 = vmatpush.msrb.mxu2 %v1325_v33  ;;  %1432 = vmatpush.msra.mxu0 %v1326_v34  ;;  %v1473_v33 = vld [vmem:[#allocation7 + $0x6c8] sm:$0xff]  ;;  %v1474_v34 = vld [vmem:[#allocation7 + $0x6d0] sm:$0xff] }
 0x6e5   :  { %1373 = vmatpush.msra.mxu3 %v1319_v36  ;;  %1393 = vmatpush.msra.mxu1 %v1320_v32  ;;  %v1475_v36 = vld [vmem:[#allocation7 + $0x6d8] sm:$0xff]  ;;  %v1468_v32 = vld [vmem:[#allocation7 + $0x6a0] sm:$0xff] }
 0x6e6   :  { %1413 = vmatpush.msrb.mxu2 %v1321_v37  ;;  %1433 = vmatpush.msra.mxu0 %v1322_v20  ;;  %v1469_v37 = vld [vmem:[#allocation7 + $0x6a8] sm:$0xff]  ;;  %v1470_v20 = vld [vmem:[#allocation7 + $0x6b0] sm:$0xff] }
 0x6e7   :  { %1374 = vmatpush.msra.mxu3 %v1315_v0  ;;  %1394 = vmatpush.msra.mxu1 %v1316_v38  ;;  %v1471_v0 = vld [vmem:[#allocation7 + $0x6b8] sm:$0xff]  ;;  %v1464_v38 = vld [vmem:[#allocation7 + $0x680] sm:$0xff] }
 0x6e8   :  { %1414 = vmatpush.msrb.mxu2 %v1317_v41  ;;  %1434 = vmatpush.msra.mxu0 %v1318_v42  ;;  %v1465_v41 = vld [vmem:[#allocation7 + $0x688] sm:$0xff]  ;;  %v1466_v42 = vld [vmem:[#allocation7 + $0x690] sm:$0xff] }
 0x6e9   :  { %1375 = vmatpush.msra.mxu3 %v1311_v43  ;;  %1395 = vmatpush.msra.mxu1 %v1312_v44  ;;  %v1467_v43 = vld [vmem:[#allocation7 + $0x698] sm:$0xff]  ;;  %v1460_v44 = vld [vmem:[#allocation7 + $0x660] sm:$0xff] }
 0x6ea   :  { %1415 = vmatpush.msrb.mxu2 %v1313_v45  ;;  %1435 = vmatpush.msra.mxu0 %v1314_v47  ;;  %v1461_v45 = vld [vmem:[#allocation7 + $0x668] sm:$0xff]  ;;  %v1462_v47 = vld [vmem:[#allocation7 + $0x670] sm:$0xff] }
 0x6eb   :  { %1376 = vmatpush.msra.mxu3 %v1307_v48  ;;  %1396 = vmatpush.msra.mxu1 %v1308_v49  ;;  %v1463_v48 = vld [vmem:[#allocation7 + $0x678] sm:$0xff]  ;;  %v1456_v49 = vld [vmem:[#allocation7 + $0x640] sm:$0xff] }
 0x6ec   :  { %1416 = vmatpush.msrb.mxu2 %v1309_v52  ;;  %1436 = vmatpush.msra.mxu0 %v1310_v53  ;;  %v1457_v52 = vld [vmem:[#allocation7 + $0x648] sm:$0xff]  ;;  %v1458_v53 = vld [vmem:[#allocation7 + $0x650] sm:$0xff] }
 0x6ed   :  { %1377 = vmatpush.msra.mxu3 %v1303_v54  ;;  %1397 = vmatpush.msra.mxu1 %v1304_v55  ;;  %v1459_v54 = vld [vmem:[#allocation7 + $0x658] sm:$0xff]  ;;  %v1452_v55 = vld [vmem:[#allocation7 + $0x620] sm:$0xff] }
 0x6ee   :  { %1417 = vmatpush.msrb.mxu2 %v1305_v56  ;;  %1437 = vmatpush.msra.mxu0 %v1306_v57  ;;  %v1453_v56 = vld [vmem:[#allocation7 + $0x628] sm:$0xff]  ;;  %v1454_v57 = vld [vmem:[#allocation7 + $0x630] sm:$0xff] }
 0x6ef   :  { %1378 = vmatpush.msra.mxu3 %v1299_v61  ;;  %1398 = vmatpush.msra.mxu1 %v1300_v59  ;;  %v1455_v61 = vld [vmem:[#allocation7 + $0x638] sm:$0xff]  ;;  %v1448_v59 = vld [vmem:[#allocation7 + $0x600] sm:$0xff] }
 0x6f0   :  { %1418 = vmatpush.msrb.mxu2 %v1301_v62  ;;  %1438 = vmatpush.msra.mxu0 %v1302_v1  ;;  %v1449_v62 = vld [vmem:[#allocation7 + $0x608] sm:$0xff]  ;;  %v1450_v1 = vld [vmem:[#allocation7 + $0x610] sm:$0xff] }
 0x6f1   :  { %1379 = vmatmul.f32.vlgmr.msra.gmra.mxu3 %v1003_v2  ;;  %1399 = vmatmul.f32.vlgmr.msra.gmra.mxu1 %v1003_v2 }
 0x6f2   :  { %1419 = vmatmul.f32.vlgmr.msrb.gmra.mxu2 %v1003_v2  ;;  %1439 = vmatmul.f32.vlgmr.msra.gmra.mxu0 %v1003_v2  ;;  %v1451_v2 = vld [vmem:[#allocation7 + $0x618] sm:$0xff] }
 0x6f3   :  { %1512 = vmatpush.msrb.mxu3 %v1508_v3  ;;  %1532 = vmatpush.msrb.mxu1 %v1509_v4  ;;  %v1006_v3 = vpop.f32.mrf.mxu2  ;;  %v3593_v4 = vld [vmem:[#allocation5 + $0x8] sm:$0xff] }
 0x6f4   :  { %1552 = vmatpush.msra.mxu2 %v1510_v5  ;;  %1572 = vmatpush.msrb.mxu0 %v1511_v6  ;;  %v3597_v5 = vld [vmem:[#allocation5] sm:$0xff]  ;;  %v3607_v6 = vld [vmem:[#allocation5 + $0x18] sm:$0xff] }
 0x6f5   :  { %1513 = vmatpush.msrb.mxu3 %v1504_v7  ;;  %1533 = vmatpush.msrb.mxu1 %v1505_v39  ;;  %4630 = vst [vmem:[#allocation29_spill] sm:$0xff] %v3607_v6  ;;  %v3621_v7 = vld [vmem:[#allocation5 + $0x10] sm:$0xff] }
 0x6f6   :  { %1553 = vmatpush.msra.mxu2 %v1506_v8  ;;  %1573 = vmatpush.msrb.mxu0 %v1507_v9  ;;  %v3657_v9 = vpop.permute.xlu1 %1599 }
 0x6f7   :  { %1514 = vmatpush.msrb.mxu3 %v1500_v40  ;;  %1534 = vmatpush.msrb.mxu1 %v1501_v10 }
 0x6f8   :  { %1554 = vmatpush.msra.mxu2 %v1502_v58  ;;  %1574 = vmatpush.msrb.mxu0 %v1503_v11  ;;  %v1637_v58 = vlaneseq }
 0x6f9   :  { %1515 = vmatpush.msrb.mxu3 %v1496_v12  ;;  %1535 = vmatpush.msrb.mxu1 %v1497_v60 }
 0x6fa   :  { %1555 = vmatpush.msra.mxu2 %v1498_v13  ;;  %1575 = vmatpush.msrb.mxu0 %v1499_v51  ;;  %v3659_v51 = vand.u32 127, %v1637_v58 }
 0x6fb   :  { %1516 = vmatpush.msrb.mxu3 %v1492_v14  ;;  %1536 = vmatpush.msrb.mxu1 %v1493_v27  ;;  %v3661_v14 = vld [vmem:[#allocation8] sm:$0xff] }
 0x6fc   :  { %1556 = vmatpush.msra.mxu2 %v1494_v15  ;;  %1576 = vmatpush.msrb.mxu0 %v1495_v46  ;;  %vm1824_vm2 = vcmp.lt.s32.totalorder %v3659_v51, 113  ;;  %vm1861_vm3 = vcmp.lt.s32.totalorder %v3659_v51, 112  ;;  %v3666_v46 = vperm.slane %v3661_v14, 7  ;;  %vm1787_vm4 = vcmp.lt.s32.totalorder %v3659_v51, 127 }
 0x6fd   :  { %1517 = vmatpush.msrb.mxu3 %v1488_v16  ;;  %1537 = vmatpush.msrb.mxu1 %v1489_v17  ;;  %vm1750_vm5 = vcmp.lt.s32.totalorder %v3659_v51, 1  ;;  %vm1713_vm6 = vcmp.lt.s32.totalorder %v3659_v51, 15  ;;  %vm1898_vm7 = vcmp.lt.s32.totalorder %v3659_v51, 111  ;;  %vm4609_vm8 = vcmp.lt.s32.totalorder %v3659_v51, 16 }
 0x6fe   :  { %1557 = vmatpush.msra.mxu2 %v1490_v18  ;;  %1577 = vmatpush.msrb.mxu0 %v1491_v19  ;;  %vm4608_vm10 = vcmp.lt.s32.totalorder %v3659_v51, 17 }
 0x6ff   :  { %1518 = vmatpush.msrb.mxu3 %v1484_v63  ;;  %1538 = vmatpush.msrb.mxu1 %v1485_v22 }
 0x700   :  { %1558 = vmatpush.msra.mxu2 %v1486_v21  ;;  %1578 = vmatpush.msrb.mxu0 %v1487_v23 }
 0x701   :  { %1519 = vmatpush.msrb.mxu3 %v1480_v24  ;;  %1539 = vmatpush.msrb.mxu1 %v1481_v25 }
 0x702   :  { %1559 = vmatpush.msra.mxu2 %v1482_v26  ;;  %1579 = vmatpush.msrb.mxu0 %v1483_v35 }
 0x703   :  { %1520 = vmatpush.msrb.mxu3 %v1476_v28  ;;  %1540 = vmatpush.msrb.mxu1 %v1477_v50 }
 0x704   :  { %1560 = vmatpush.msra.mxu2 %v1478_v29  ;;  %1580 = vmatpush.msrb.mxu0 %v1479_v30 }
 0x705   :  { %1521 = vmatpush.msrb.mxu3 %v1472_v31  ;;  %1541 = vmatpush.msrb.mxu1 %v1473_v33  ;;  %v3688_v31 = vld [vmem:[#allocation8 + $0x8] sm:$0xff] }
 0x706   :  { %1561 = vmatpush.msra.mxu2 %v1474_v34  ;;  %1581 = vmatpush.msrb.mxu0 %v1475_v36  ;;  %v3691_v36 = vperm.slane %v3688_v31, 7 }
 0x707   :  { %1522 = vmatpush.msrb.mxu3 %v1468_v32  ;;  %1542 = vmatpush.msrb.mxu1 %v1469_v37 }
 0x708   :  { %1562 = vmatpush.msra.mxu2 %v1470_v20  ;;  %1582 = vmatpush.msrb.mxu0 %v1471_v0  ;;  %4632 = vst [vmem:[#allocation31_spill] sm:$0xff] %v3691_v36 }
 0x709   :  { %1523 = vmatpush.msrb.mxu3 %v1464_v38  ;;  %1543 = vmatpush.msrb.mxu1 %v1465_v41  ;;  %v3700_v38 = vld [vmem:[#allocation8 + $0x10] sm:$0xff] }
 0x70a   :  { %1563 = vmatpush.msra.mxu2 %v1466_v42  ;;  %1583 = vmatpush.msrb.mxu0 %v1467_v43  ;;  %v3707_v43 = vperm.slane %v3700_v38, 7 }
 0x70b   :  { %1524 = vmatpush.msrb.mxu3 %v1460_v44  ;;  %1544 = vmatpush.msrb.mxu1 %v1461_v45 }
 0x70c   :  { %1564 = vmatpush.msra.mxu2 %v1462_v47  ;;  %1584 = vmatpush.msrb.mxu0 %v1463_v48  ;;  %4633 = vst [vmem:[#allocation32_spill] sm:$0xff] %v3707_v43 }
 0x70d   :  { %1525 = vmatpush.msrb.mxu3 %v1456_v49  ;;  %1545 = vmatpush.msrb.mxu1 %v1457_v52 }
 0x70e   :  { %1565 = vmatpush.msra.mxu2 %v1458_v53  ;;  %1585 = vmatpush.msrb.mxu0 %v1459_v54 }
 0x70f   :  { %1526 = vmatpush.msrb.mxu3 %v1452_v55  ;;  %1546 = vmatpush.msrb.mxu1 %v1453_v56 }
 0x710   :  { %1566 = vmatpush.msra.mxu2 %v1454_v57  ;;  %1586 = vmatpush.msrb.mxu0 %v1455_v61 }
 0x711   :  { %1527 = vmatpush.msrb.mxu3 %v1448_v59  ;;  %1547 = vmatpush.msrb.mxu1 %v1449_v62 }
 0x712   :  { %1567 = vmatpush.msra.mxu2 %v1450_v1  ;;  %1587 = vmatpush.msrb.mxu0 %v1451_v2 }
 0x713   :  { %1528 = vmatmul.f32.vlgmr.msrb.gmra.mxu3 %v1006_v3  ;;  %1548 = vmatmul.f32.vlgmr.msrb.gmra.mxu1 %v1006_v3 }
 0x714   :  { %1568 = vmatmul.f32.vlgmr.msra.gmra.mxu2 %v1006_v3  ;;  %1588 = vmatmul.f32.vlgmr.msrb.gmra.mxu0 %v1006_v3 }
 0x715   :  { %1851 = vrot.lane.b32.xlu0 %v3593_v4, %s3118_s23  ;;  %1814 = vrot.lane.b32.xlu1 %v3593_v4, %s3119_s26 }
 0x716   :  { %1847 = vrot.lane.b32.xlu2 %v3597_v5, %s3118_s23 }
 0x71d   :  { %1810 = vrot.lane.b32.xlu0 %v3597_v5, %s3119_s26  ;;  %1777 = vrot.lane.b32.xlu1 %v3593_v4, %s3115_s9 }
 0x71e   :  { %1855 = vrot.lane.b32.xlu2 %v3621_v7, %s3118_s23 }
 0x725   :  { %1773 = vrot.lane.b32.xlu0 %v3597_v5, %s3115_s9  ;;  %1748 = vrot.lane.b32.xlu1 %v3607_v6, %s3111_s13 }
 0x726   :  { %1818 = vrot.lane.b32.xlu2 %v3621_v7, %s3119_s26 }
 0x72d   :  { %1859 = vrot.lane.b32.xlu0 %v3607_v6, %s3118_s23  ;;  %1711 = vrot.lane.b32.xlu1 %v3607_v6, %s3120_s1 }
 0x72e   :  { %1781 = vrot.lane.b32.xlu2 %v3621_v7, %s3115_s9 }
 0x735   :  { %1822 = vrot.lane.b32.xlu0 %v3607_v6, %s3119_s26  ;;  %1888 = vrot.lane.b32.xlu1 %v3593_v4, %s3121_s2 }
 0x736   :  { %1785 = vrot.lane.b32.xlu2 %v3607_v6, %s3115_s9 }
 0x73d   :  { %1736 = vrot.lane.b32.xlu0 %v3597_v5, %s3111_s13  ;;  %1662 = vrot.lane.b32.xlu1 %v3597_v5, %s3122_s3 }
 0x73e   :  { %1740 = vrot.lane.b32.xlu2 %v3593_v4, %s3111_s13 }
 0x745   :  { %1699 = vrot.lane.b32.xlu0 %v3597_v5, %s3120_s1  ;;  %1744 = vrot.lane.b32.xlu1 %v3621_v7, %s3111_s13 }
 0x746   :  { %1674 = vrot.lane.b32.xlu2 %v3607_v6, %s3122_s3 }
 0x74a   :  { %v1175_v39 = vpop.f32.mrf.mxu1 }
 0x74b   :  { %v1215_v8 = vpop.f32.mrf.mxu0 }
 0x74d   :  { %1884 = vrot.lane.b32.xlu0 %v3597_v5, %s3121_s2  ;;  %1635 = vrot.lane.b32.xlu1 %v3607_v6, %s3123_s0 }
 0x74e   :  { %1666 = vrot.lane.b32.xlu2 %v3593_v4, %s3122_s3 }
 0x750   :  { %v1155_v50 = vpop.f32.mrf.mxu3 }
 0x751   :  { %v1195_v35 = vpop.f32.mrf.mxu2 }
 0x754   :  { %v1255_v40 = vpop.f32.mrf.mxu1 }
 0x755   :  { %1703 = vrot.lane.b32.xlu0 %v3593_v4, %s3120_s1  ;;  %1892 = vrot.lane.b32.xlu1 %v3621_v7, %s3121_s2  ;;  %v1295_v10 = vpop.f32.mrf.mxu0  ;;  %v1256_v27 = vadd.f32 %v1255_v40, %v1175_v39 }
 0x756   :  { %v1296_v15 = vadd.f32 %v1295_v10, %v1215_v8 }
 0x75a   :  { %v1235_v42 = vpop.f32.mrf.mxu3 }
 0x75b   :  { %v1275_v41 = vpop.f32.mrf.mxu2  ;;  %v1236_v3 = vadd.f32 %v1235_v42, %v1155_v50 }
 0x75c   :  { %v1276_v2 = vadd.f32 %v1275_v41, %v1195_v35 }
 0x75d   :  { %1623 = vrot.lane.b32.xlu0 %v3597_v5, %s3123_s0 }
 0x765   :  { %1707 = vrot.lane.b32.xlu0 %v3621_v7, %s3120_s1 }
 0x76e   :  { %v1400_v60 = vpop.f32.mrf.mxu1 }
 0x76f   :  { %v1440_v13 = vpop.f32.mrf.mxu0  ;;  %v1444_v17 = vadd.f32 %v1400_v60, %v1256_v27 }
 0x770   :  { %v1848_v16 = vpop.permute.xlu2 %1847  ;;  %v1446_v22 = vadd.f32 %v1440_v13, %v1296_v15 }
 0x774   :  { %v1380_v55 = vpop.f32.mrf.mxu3 }
 0x775   :  { %v1420_v54 = vpop.f32.mrf.mxu2  ;;  %v1443_v10 = vadd.f32 %v1380_v55, %v1236_v3 }
 0x776   :  { %v1445_v8 = vadd.f32 %v1420_v54, %v1276_v2 }
 0x778   :  { %v1856_v33 = vpop.permute.xlu2 %1855 }
 0x780   :  { %v1819_v44 = vpop.permute.xlu2 %1818 }
 0x787   :  { %v1852_v11 = vpop.permute.xlu0 %1851  ;;  %v1815_v12 = vpop.permute.xlu1 %1814 }
 0x788   :  { %v1867_v63 = vsel %vm1861_vm3, %v1848_v16, %v1852_v11  ;;  %v1865_v32 = vsel %vm1861_vm3, %v1852_v11, %v1856_v33  ;;  %v3713_v47 = vsel %vm1824_vm2, %v1815_v12, %v1819_v44  ;;  %v1782_v56 = vpop.permute.xlu2 %1781 }
 0x789   :  { %v1878_v24 = vmul.f32 %v3666_v46, %v1867_v63  ;;  %v1879_v0 = vmul.f32 %v3691_v36, %v1865_v32 }
 0x78b   :  { %1928 = vmatpush.msra.mxu3 %v1878_v24  ;;  %1968 = vmatpush.msrb.mxu2 %v1879_v0 }
 0x78f   :  { %v1811_v18 = vpop.permute.xlu0 %1810  ;;  %v1778_v19 = vpop.permute.xlu1 %1777 }
 0x790   :  { %v1549_v21 = vpop.f32.mrf.mxu1  ;;  %v3672_v23 = vsel %vm1824_vm2, %v1811_v18, %v1815_v12  ;;  %v3732_v61 = vsel %vm1787_vm4, %v1778_v19, %v1782_v56  ;;  %v1786_v58 = vpop.permute.xlu2 %1785 }
 0x791   :  { %v1593_v25 = vadd.f32 %v1549_v21, %v1444_v17  ;;  %v1589_v26 = vpop.f32.mrf.mxu0  ;;  %v3753_v60 = vsel %vm1787_vm4, %v1782_v56, %v1786_v58 }
 0x792   :  { %v1595_v28 = vadd.f32 %v1589_v26, %v1446_v22  ;;  %v3800_v26 = vld [vmem:[#allocation8 + $0x20] ss:$0 sm:$0xff] }
 0x793   :  { %v3676_v29 = vadd.f32 %v3657_v9, %v1593_v25 }
 0x794   :  { %v3679_v30 = vadd.f32 %v3657_v9, %v1595_v28 }
 0x795   :  { %1812 = vrot.lane.b32.xlu1 %v3676_v29, %s3119_s26  ;;  %1849 = vrot.lane.b32.xlu2 %v3676_v29, %s3118_s23 }
 0x796   :  { %4631 = vst [vmem:[#allocation30_spill] sm:$0xff] %v3679_v30  ;;  %1709 = vrot.lane.b32.xlu0 %v3679_v30, %s3120_s1  ;;  %v1529_v40 = vpop.f32.mrf.mxu3 }
 0x797   :  { %v1774_v34 = vpop.permute.xlu0 %1773  ;;  %v1749_v20 = vpop.permute.xlu1 %1748  ;;  %v1592_v27 = vadd.f32 %v1529_v40, %v1443_v10 }
 0x798   :  { %v3697_v37 = vsel %vm1787_vm4, %v1774_v34, %v1778_v19  ;;  %v1569_v39 = vpop.f32.mrf.mxu2  ;;  %v3757_v13 = vsel %vm1787_vm4, %v1786_v58, %v1774_v34  ;;  %v1741_v19 = vpop.permute.xlu2 %1740 }
 0x799   :  { %v1594_v11 = vadd.f32 %v1569_v39, %v1445_v8  ;;  %4635 = vst [vmem:[#allocation34_spill] sm:$0xff] %v3757_v13  ;;  %v3881_v39 = vperm.slane %v3688_v31, 6  ;;  %v3884_v8 = vperm.slane %v3700_v38, 6 }
 0x79b   :  { %v3766_v17 = vadd.f32 %v3657_v9, %v1594_v11  ;;  %4640 = vst [vmem:[#allocation37_spill] sm:$0xff] %v3884_v8 }
 0x79d   :  { %1857 = vrot.lane.b32.xlu1 %v3679_v30, %s3118_s23  ;;  %1775 = vrot.lane.b32.xlu2 %v3676_v29, %s3115_s9 }
 0x79e   :  { %1886 = vrot.lane.b32.xlu0 %v3676_v29, %s3121_s2 }
 0x79f   :  { %v1860_v45 = vpop.permute.xlu0 %1859  ;;  %v3719_v49 = vpop.permute.xlu1 %1711 }
 0x7a0   :  { %v3717_v48 = vsel %vm1861_vm3, %v1860_v45, %v1848_v16  ;;  %v1863_v52 = vsel %vm1861_vm3, %v1856_v33, %v1860_v45  ;;  %v3844_v42 = vpop.permute.xlu2 %1674 }
 0x7a1   :  { %v1880_v53 = vmul.f32 %v3707_v43, %v1863_v52 }
 0x7a3   :  { %2008 = vmatpush.msra.mxu0 %v1880_v53 }
 0x7a5   :  { %1746 = vrot.lane.b32.xlu1 %v3679_v30, %s3111_s13  ;;  %1820 = vrot.lane.b32.xlu2 %v3679_v30, %s3119_s26 }
 0x7a6   :  { %1672 = vrot.lane.b32.xlu0 %v3679_v30, %s3122_s3 }
 0x7a7   :  { %v1823_v57 = vpop.permute.xlu0 %1822  ;;  %v3738_v62 = vpop.permute.xlu1 %1888 }
 0x7a8   :  { %v3736_v59 = vsel %vm1824_vm2, %v1823_v57, %v1811_v18  ;;  %v3742_v1 = vsel %vm1824_vm2, %v1819_v44, %v1823_v57  ;;  %v3769_v18 = vadd.f32 %v3657_v9, %v1592_v27  ;;  %v1919_v44 = vld [vmem:[%s4637_s7] sm:$0xff]  ;;  %v3857_v45 = vpop.permute.xlu2 %1666 }
 0x7a9   :  { %4634 = vst [vmem:[#allocation33_spill] sm:$0xff] %v3736_v59 }
 0x7ad   :  { %1738 = vrot.lane.b32.xlu1 %v3676_v29, %s3111_s13  ;;  %1783 = vrot.lane.b32.xlu2 %v3679_v30, %s3115_s9 }
 0x7ae   :  { %1633 = vrot.lane.b32.xlu0 %v3679_v30, %s3123_s0 }
 0x7af   :  { %v1737_v12 = vpop.permute.xlu0 %1736  ;;  %v3763_v16 = vpop.permute.xlu1 %1662 }
 0x7b0   :  { %v3761_v15 = vsel %vm1750_vm5, %v1749_v20, %v1737_v12  ;;  %v3780_v22 = vsel %vm1750_vm5, %v1737_v12, %v1741_v19 }
 0x7b5   :  { %1701 = vrot.lane.b32.xlu1 %v3676_v29, %s3120_s1  ;;  %1853 = vrot.lane.b32.xlu2 %v3766_v17, %s3118_s23 }
 0x7b6   :  { %1808 = vrot.lane.b32.xlu0 %v3769_v18, %s3119_s26 }
 0x7b7   :  { %v1700_v63 = vpop.permute.xlu0 %1699  ;;  %v1745_v21 = vpop.permute.xlu1 %1744 }
 0x7b8   :  { %v3785_v9 = vsel %vm1713_vm6, %v3719_v49, %v1700_v63  ;;  %v3789_v24 = vsel %vm1750_vm5, %v1745_v21, %v1749_v20  ;;  %v3793_v25 = vsel %vm1750_vm5, %v1741_v19, %v1745_v21  ;;  %v1843_v21 = vmul.f32 %v3884_v8, %v3742_v1 }
 0x7b9   :  { %4636 = vst [vmem:[#allocation35_spill] sm:$0xff] %v3789_v24 }
 0x7bd   :  { %1664 = vrot.lane.b32.xlu1 %v3676_v29, %s3122_s3  ;;  %1670 = vrot.lane.b32.xlu2 %v3621_v7, %s3122_s3 }
 0x7be   :  { %1816 = vrot.lane.b32.xlu0 %v3766_v17, %s3119_s26 }
 0x7bf   :  { %v3804_v35 = vpop.permute.xlu0 %1884  ;;  %v3864_v53 = vpop.permute.xlu1 %1635 }
 0x7c0   :  { %v1904_v28 = vsel %vm1898_vm7, %v3804_v35, %v3738_v62 }
 0x7c1   :  { %v1915_v50 = vmul.f32 %v3800_v26, %v1904_v28 }
 0x7c3   :  { %1962 = vmatpush.msra.mxu1 %v1915_v50 }
 0x7c5   :  { %1845 = vrot.lane.b32.xlu1 %v3769_v18, %s3118_s23  ;;  %1631 = vrot.lane.b32.xlu2 %v3621_v7, %s3123_s0 }
 0x7c6   :  { %1734 = vrot.lane.b32.xlu0 %v3769_v18, %s3111_s13 }
 0x7c7   :  { %v1704_v33 = vpop.permute.xlu0 %1703  ;;  %v3872_v55 = vpop.permute.xlu1 %1892 }
 0x7c8   :  { %v3819_v34 = vsel %vm1713_vm6, %v1700_v63, %v1704_v33  ;;  %v1842_v63 = vmul.f32 %v3881_v39, %v3713_v47 }
 0x7cd   :  { %1771 = vrot.lane.b32.xlu1 %v3769_v18, %s3115_s9  ;;  %1697 = vrot.lane.b32.xlu2 %v3769_v18, %s3120_s1 }
 0x7ce   :  { %1625 = vrot.lane.b32.xlu0 %v3676_v29, %s3123_s0 }
 0x7cf   :  { %v3827_v32 = vpop.permute.xlu0 %1623 }
 0x7d5   :  { %1779 = vrot.lane.b32.xlu1 %v3766_v17, %s3115_s9  ;;  %1882 = vrot.lane.b32.xlu2 %v3769_v18, %s3121_s2 }
 0x7d6   :  { %1890 = vrot.lane.b32.xlu0 %v3766_v17, %s3121_s2 }
 0x7d7   :  { %v1708_v20 = vpop.permute.xlu0 %1707 }
 0x7d8   :  { %v3838_v0 = vsel %vm1713_vm6, %v1708_v20, %v3719_v49  ;;  %v3842_v41 = vsel %vm1713_vm6, %v1704_v33, %v1708_v20  ;;  %v2089_v49 = vld [vmem:[%s4638_s28] sm:$0xff] }
 0x7d9   :  { %4639 = vst [vmem:[#allocation36_spill] sm:$0xff] %v3838_v0 }
 0x7dd   :  { %1627 = vrot.lane.b32.xlu1 %v3593_v4, %s3123_s0  ;;  %1660 = vrot.lane.b32.xlu2 %v3769_v18, %s3122_s3 }
 0x7de   :  { %1896 = vrot.lane.b32.xlu0 %v3607_v6, %s3121_s2 }
 0x7e5   :  { %1668 = vrot.lane.b32.xlu1 %v3766_v17, %s3122_s3  ;;  %1742 = vrot.lane.b32.xlu2 %v3766_v17, %s3111_s13 }
 0x7e6   :  { %1922 = vperm.xlu0 %2909, %v1919_v44  }
 0x7ed   :  { %1629 = vrot.lane.b32.xlu1 %v3766_v17, %s3123_s0  ;;  %1621 = vrot.lane.b32.xlu2 %v3769_v18, %s3123_s0 }
 0x7ee   :  { %2254 = vperm.xlu0 %2909, %v2089_v49  }
 0x7ef   :  { %v1850_v52 = vpop.permute.xlu2 %1849 }
 0x7f5   :  { %1705 = vrot.lane.b32.xlu2 %v3766_v17, %s3120_s1 }
 0x7f7   :  { %v3868_v54 = vpop.permute.xlu2 %1775 }
 0x7fd   :  { %1894 = vrot.lane.b32.xlu2 %v3679_v30, %s3121_s2 }
 0x7ff   :  { %v3874_v56 = vpop.permute.xlu2 %1820 }
 0x807   :  { %v1813_v57 = vpop.permute.xlu1 %1812  ;;  %v3876_v2 = vpop.permute.xlu2 %1783 }
 0x808   :  { %v3878_v3 = vpop.permute.xlu0 %1709 }
 0x80f   :  { %v3886_v40 = vpop.permute.xlu1 %1857  ;;  %v1854_v10 = vpop.permute.xlu2 %1853 }
 0x810   :  { %v1862_v58 = vsel %vm1861_vm3, %v1854_v10, %v3886_v40  ;;  %v1864_v11 = vsel %vm1861_vm3, %v1850_v52, %v1854_v10  ;;  %v3893_v12 = vpop.permute.xlu0 %1886 }
 0x811   :  { %v1875_v27 = vmul.f32 %v3691_v36, %v1864_v11  ;;  %v1876_v19 = vmul.f32 %v3707_v43, %v1862_v58  ;;  %v3919_v58 = vld [vmem:[#allocation8 + $0x28] ss:$0 sm:$0xff] }
 0x813   :  { %1969 = vmatpush.msrb.mxu2 %v1875_v27  ;;  %2009 = vmatpush.msra.mxu0 %v1876_v19  ;;  %v3926_v19 = vperm.slane %v3688_v31, 5 }
 0x815   :  { %1970 = vmatpush.msrb.mxu2 %v1842_v63  ;;  %2010 = vmatpush.msra.mxu0 %v1843_v21  ;;  %v3929_v63 = vperm.slane %v3700_v38, 5  ;;  %v1902_v21 = vsel %vm1898_vm7, %v3738_v62, %v3872_v55  ;;  %v1805_v59 = vmul.f32 %v3926_v19, %v3732_v61 }
 0x816   :  { %v1916_v62 = vmul.f32 %v3919_v58, %v1902_v21 }
 0x817   :  { %v3901_v28 = vpop.permute.xlu1 %1746  ;;  %v3903_v50 = vpop.permute.xlu2 %1670  ;;  %4642 = vst [vmem:[#allocation38_spill] sm:$0xff] %v3929_v63 }
 0x818   :  { %v3905_v33 = vpop.permute.xlu0 %1672 }
 0x81f   :  { %v3907_v20 = vpop.permute.xlu1 %1738  ;;  %v3909_v44 = vpop.permute.xlu2 %1631 }
 0x820   :  { %v3911_v49 = vpop.permute.xlu0 %1633 }
 0x827   :  { %v3913_v47 = vpop.permute.xlu1 %1701  ;;  %v3915_v10 = vpop.permute.xlu2 %1697 }
 0x828   :  { %v3917_v1 = vpop.permute.xlu0 %1808 }
 0x82f   :  { %v3921_v11 = vpop.permute.xlu1 %1664  ;;  %v3923_v27 = vpop.permute.xlu2 %1882 }
 0x830   :  { %v1903_v43 = vsel %vm1898_vm7, %v3923_v27, %v3893_v12  ;;  %v1817_v36 = vpop.permute.xlu0 %1816 }
 0x831   :  { %v1911_v0 = vmul.f32 %v3800_v26, %v1903_v43  ;;  %v1825_v30 = vsel %vm1824_vm2, %v1817_v36, %v3874_v56  ;;  %v1827_v24 = vsel %vm1824_vm2, %v1813_v57, %v1817_v36  ;;  %v1806_v43 = vmul.f32 %v3929_v63, %v3753_v60  ;;  %v3953_v26 = vld [vmem:[%s4641_s10 + $0x8] sm:$0xff] }
 0x832   :  { %v1838_v6 = vmul.f32 %v3881_v39, %v1827_v24  ;;  %v1839_v13 = vmul.f32 %v3884_v8, %v1825_v30  ;;  %v3956_v36 = vperm.slane %v3661_v14, 6 }
 0x833   :  { %1963 = vmatpush.msra.mxu1 %v1911_v0  ;;  %v3974_v0 = vperm.slane %v3661_v14, 5 }
 0x834   :  { %1971 = vmatpush.msrb.mxu2 %v1838_v6  ;;  %2011 = vmatpush.msra.mxu0 %v1839_v13  ;;  %v1841_v13 = vmul.f32 %v3956_v36, %v3672_v23 }
 0x835   :  { %2002 = vmatpush.msrb.mxu1 %v1916_v62  ;;  %4643 = vst [vmem:[#allocation39_spill] sm:$0xff] %v3974_v0 }
 0x836   :  { %1972 = vmatpush.msrb.mxu2 %v1805_v59  ;;  %2012 = vmatpush.msra.mxu0 %v1806_v43  ;;  %v1829_v59 = vsel %vm1824_vm2, %v3917_v1, %v1813_v57 }
 0x837   :  { %v3958_v30 = vpop.permute.xlu1 %1845  ;;  %v3960_v24 = vpop.permute.xlu2 %1660  ;;  %2842 = vmatmul.msk.f32.vlgmr.msra.gmra.mxu1 %vm801_vm9, %v3953_v26  ;;  %v1837_v21 = vmul.f32 %v3956_v36, %v1829_v59 }
 0x838   :  { %v1866_v6 = vsel %vm1861_vm3, %v3958_v30, %v1850_v52  ;;  %v1735_v61 = vpop.permute.xlu0 %1734  ;;  %v1804_v52 = vmul.f32 %v3974_v0, %v3697_v37 }
 0x839   :  { %v1874_v60 = vmul.f32 %v3666_v46, %v1866_v6  ;;  %v1757_v37 = vsel %vm1750_vm5, %v3901_v28, %v1735_v61 }
 0x83b   :  { %1929 = vmatpush.msra.mxu3 %v1874_v60  ;;  %v3991_v60 = vperm.slane %v3661_v14, 3 }
 0x83d   :  { %1930 = vmatpush.msra.mxu3 %v1841_v13  ;;  %4644 = vst [vmem:[#allocation40_spill] sm:$0xff] %v3991_v60  ;;  %v1767_v59 = vmul.f32 %v3991_v60, %v3761_v15  ;;  %v4000_v13 = vperm.slane %v3661_v14, 2  ;;  %v1763_v15 = vmul.f32 %v3991_v60, %v1757_v37  ;;  %v1647_v60 = vsel %vm4608_vm10, %v3864_v53, %v3827_v32 }
 0x83f   :  { %v3979_v62 = vpop.permute.xlu1 %1771  ;;  %v3981_v43 = vpop.permute.xlu2 %1742  ;;  %1931 = vmatpush.msra.mxu3 %v1837_v21  ;;  %4645 = vst [vmem:[#allocation41_spill] sm:$0xff] %v4000_v13  ;;  %v1730_v37 = vmul.f32 %v4000_v13, %v3785_v9 }
 0x840   :  { %v1792_v23 = vsel %vm1787_vm4, %v3979_v62, %v3868_v54  ;;  %v3987_v57 = vpop.permute.xlu0 %1625 }
 0x841   :  { %v1800_v6 = vmul.f32 %v3974_v0, %v1792_v23  ;;  %1932 = vmatpush.msra.mxu3 %v1804_v52 }
 0x843   :  { %1933 = vmatpush.msra.mxu3 %v1800_v6 }
 0x845   :  { %1934 = vmatpush.msra.mxu3 %v3597_v5 }
 0x847   :  { %v1780_v21 = vpop.permute.xlu1 %1779  ;;  %v4002_v8 = vpop.permute.xlu2 %1621  ;;  %1935 = vmatpush.msra.mxu3 %v3769_v18  ;;  %v1720_v18 = vsel %vm1713_vm6, %v3878_v3, %v3915_v10 }
 0x848   :  { %v1788_v52 = vsel %vm1787_vm4, %v1780_v21, %v3876_v2  ;;  %v1790_v5 = vsel %vm1787_vm4, %v3868_v54, %v1780_v21  ;;  %v4011_v23 = vpop.permute.xlu0 %1890  ;;  %v1726_v9 = vmul.f32 %v4000_v13, %v1720_v18 }
 0x849   :  { %v1801_v6 = vmul.f32 %v3926_v19, %v1790_v5  ;;  %v1802_v0 = vmul.f32 %v3929_v63, %v1788_v52  ;;  %1936 = vmatpush.msra.mxu3 %v1767_v59  ;;  %v1901_v54 = vsel %vm1898_vm7, %v3893_v12, %v4011_v23  ;;  %v4029_v59 = vperm.slane %v3688_v31, 3 }
 0x84a   :  { %v1912_v21 = vmul.f32 %v3919_v58, %v1901_v54  ;;  %v4032_v52 = vperm.slane %v3661_v14, 1  ;;  %v4035_v5 = vperm.slane %v3700_v38, 3  ;;  %v1684_v12 = vsel %vm4609_vm8, %v3844_v42, %v3763_v16 }
 0x84b   :  { %1937 = vmatpush.msra.mxu3 %v1763_v15  ;;  %1973 = vmatpush.msrb.mxu2 %v1801_v6  ;;  %v1683_v15 = vsel %vm4609_vm8, %v3905_v33, %v3960_v24  ;;  %v1755_v6 = vsel %vm1750_vm5, %v1735_v61, %v3907_v20 }
 0x84c   :  { %2013 = vmatpush.msra.mxu0 %v1802_v0  ;;  %2003 = vmatpush.msrb.mxu1 %v1912_v21  ;;  %v4046_v0 = vperm.slane %v3688_v31, 2  ;;  %v1768_v21 = vmul.f32 %v4029_v59, %v3780_v22  ;;  %v1693_v61 = vmul.f32 %v4032_v52, %v1684_v12  ;;  %v4083_v22 = vperm.slane %v3700_v38, 2 }
 0x84d   :  { %1938 = vmatpush.msra.mxu3 %v1730_v37  ;;  %1974 = vmatpush.msrb.mxu2 %v3593_v4  ;;  %v4059_v4 = vld [vmem:[#allocation8 + $0x30] ss:$0 sm:$0xff]  ;;  %v4066_v37 = vperm.slane %v3661_v14, 0  ;;  %v1769_v14 = vmul.f32 %v4035_v5, %v3793_v25  ;;  %v1689_v12 = vmul.f32 %v4032_v52, %v1683_v15 }
 0x84e   :  { %2014 = vmatpush.msra.mxu0 %v3621_v7  ;;  %2843 = vmatmul.msk.f32.vlgmr.msrb.gmra.mxu1 %vm801_vm9, %v3953_v26  ;;  %v4063_v7 = vld [vmem:[#allocation8 + $0x18] sm:$0xff] }
 0x84f   :  { %v4055_v18 = vpop.permute.xlu1 %1627  ;;  %v4057_v54 = vpop.permute.xlu2 %1705  ;;  %1939 = vmatpush.msra.mxu3 %v1726_v9  ;;  %v1753_v9 = vsel %vm1750_vm5, %v3907_v20, %v3981_v43  ;;  %1975 = vmatpush.msrb.mxu2 %v3676_v29  ;;  %v1764_v20 = vmul.f32 %v4029_v59, %v1755_v6  ;;  %v4092_v63 = vperm.slane %v4063_v7, 7  ;;  %v1731_v6 = vmul.f32 %v4046_v0, %v3819_v34 }
 0x850   :  { %v1897_v13 = vpop.permute.xlu0 %1896  ;;  %2015 = vmatpush.msra.mxu0 %v3766_v17  ;;  %v1765_v25 = vmul.f32 %v4035_v5, %v1753_v9  ;;  %v1646_v17 = vsel %vm4608_vm10, %v3911_v49, %v4002_v8  ;;  %v4110_v9 = vperm.slane %v3688_v31, 1  ;;  %v1716_v34 = vsel %vm1713_vm6, %v3913_v47, %v4057_v54 }
 0x851   :  { %v1900_v29 = vsel %vm1898_vm7, %v3872_v55, %v1897_v13  ;;  %1940 = vmatpush.msra.mxu3 %v1693_v61  ;;  %1976 = vmatpush.msrb.mxu2 %v1768_v21  ;;  %v1656_v55 = vmul.f32 %v4066_v37, %v1647_v60  ;;  %v1718_v21 = vsel %vm1713_vm6, %v3915_v10, %v3913_v47 }
 0x852   :  { %v1917_v15 = vmul.f32 %v4059_v4, %v1900_v29  ;;  %2016 = vmatpush.msra.mxu0 %v1769_v14  ;;  %v1732_v61 = vmul.f32 %v4083_v22, %v3842_v41  ;;  %v4113_v14 = vperm.slane %v3700_v38, 1  ;;  %v1682_v10 = vsel %vm4609_vm8, %v3763_v16, %v3857_v45 }
 0x853   :  { %1941 = vmatpush.msra.mxu3 %v1689_v12  ;;  %1977 = vmatpush.msrb.mxu2 %v1764_v20  ;;  %v1680_v41 = vsel %vm4609_vm8, %v3857_v45, %v3903_v50  ;;  %v1652_v60 = vmul.f32 %v4066_v37, %v1646_v17  ;;  %v4129_v12 = vperm.slane %v4063_v7, 6  ;;  %v1881_v47 = vmul.f32 %v4092_v63, %v3717_v48 }
 0x854   :  { %2017 = vmatpush.msra.mxu0 %v1765_v25  ;;  %2042 = vmatpush.msra.mxu1 %v1917_v15  ;;  %v1727_v20 = vmul.f32 %v4046_v0, %v1718_v21  ;;  %v1868_v16 = vsel %vm1861_vm3, %v3886_v40, %v3958_v30  ;;  %v4141_v25 = vld [vmem:[%s4641_s10] sm:$0xff]  ;;  %v1681_v17 = vsel %vm4609_vm8, %v3960_v24, %v3921_v11  ;;  %v4148_v15 = vld [vmem:[#allocation8 + $0x38] ss:$0 sm:$0xff] }
 0x855   :  { %1942 = vmatpush.msra.mxu3 %v1656_v55  ;;  %1978 = vmatpush.msrb.mxu2 %v1731_v6  ;;  %v1728_v48 = vmul.f32 %v4083_v22, %v1716_v34  ;;  %v1694_v6 = vmul.f32 %v4110_v9, %v1682_v10  ;;  %v1695_v55 = vmul.f32 %v4113_v14, %v1680_v41 }
 0x856   :  { %2018 = vmatpush.msra.mxu0 %v1732_v61  ;;  %v1906_v24 = vsel %vm1898_vm7, %v1897_v13, %v3804_v35  ;;  %v1877_v61 = vmul.f32 %v4092_v63, %v1868_v16  ;;  %v1690_v35 = vmul.f32 %v4110_v9, %v1681_v17  ;;  %v4175_v13 = vperm.slane %v3688_v31, 0 }
 0x857   :  { %v4138_v29 = vpop.permute.xlu1 %1668  ;;  %v1895_v45 = vpop.permute.xlu2 %1894  ;;  %1943 = vmatpush.msra.mxu3 %v1652_v60  ;;  %1979 = vmatpush.msrb.mxu2 %v1727_v20  ;;  %v1644_v31 = vsel %vm4608_vm10, %v4002_v8, %v3987_v57  ;;  %v1918_v41 = vmul.f32 %v4148_v15, %v1906_v24 }
 0x858   :  { %v1679_v40 = vsel %vm4609_vm8, %v3921_v11, %v4138_v29  ;;  %v1899_v30 = vsel %vm1898_vm7, %v4011_v23, %v1895_v45  ;;  %v4165_v11 = vperm.slane %v3700_v38, 0  ;;  %v1645_v23 = vsel %vm4608_vm10, %v3827_v32, %v4055_v18  ;;  %2019 = vmatpush.msra.mxu0 %v1728_v48  ;;  %1944 = vmatmul.f32.vlgmr.msra.gmra.mxu3 %v4141_v25  ;;  %v4647_v48 = vld [vmem:[#allocation34_spill] sm:$0xff] }
 0x859   :  { %v1913_v21 = vmul.f32 %v4059_v4, %v1899_v30  ;;  %v1691_v34 = vmul.f32 %v4113_v14, %v1679_v40  ;;  %v1643_v38 = vsel %vm4608_vm10, %v4055_v18, %v3909_v44  ;;  %v1905_v10 = vsel %vm1898_vm7, %v1895_v45, %v3923_v27  ;;  %2048 = vmatpush.msrb.mxu3 %v1881_v47  ;;  %v4646_v18 = vld [vmem:[#allocation33_spill] sm:$0xff] }
 0x85a   :  { %1980 = vmatpush.msrb.mxu2 %v1694_v6  ;;  %v1831_v32 = vsel %vm1824_vm2, %v3874_v56, %v3917_v1  ;;  %2020 = vmatpush.msra.mxu0 %v1695_v55  ;;  %v1844_v60 = vmul.f32 %v4129_v12, %v4646_v18  ;;  %v4196_v27 = vperm.slane %v4063_v7, 5  ;;  %v1657_v47 = vmul.f32 %v4175_v13, %v1645_v23  ;;  %v4649_v55 = vld [vmem:[#allocation35_spill] sm:$0xff] }
 0x85b   :  { %2043 = vmatpush.msra.mxu1 %v1913_v21  ;;  %2049 = vmatpush.msrb.mxu3 %v1877_v61  ;;  %v1658_v56 = vmul.f32 %v4165_v11, %v1643_v38  ;;  %v1914_v1 = vmul.f32 %v4148_v15, %v1905_v10  ;;  %v1840_v8 = vmul.f32 %v4129_v12, %v1831_v32  ;;  %v4229_v21 = vperm.slane %v4063_v7, 2  ;;  %v4650_v61 = vld [vmem:[#allocation30_spill] sm:$0xff] }
 0x85c   :  { %1981 = vmatpush.msrb.mxu2 %v1690_v35  ;;  %2021 = vmatpush.msra.mxu0 %v1691_v34  ;;  %v1653_v20 = vmul.f32 %v4175_v13, %v1644_v31  ;;  %v1794_v45 = vsel %vm1787_vm4, %v3876_v2, %v3979_v62  ;;  %v1807_v40 = vmul.f32 %v4196_v27, %v4647_v48  ;;  %v4219_v62 = vperm.slane %v4063_v7, 3 }
 0x85d   :  { %2082 = vmatpush.msrb.mxu1 %v1918_v41  ;;  %2050 = vmatpush.msrb.mxu3 %v1844_v60  ;;  %v1803_v2 = vmul.f32 %v4196_v27, %v1794_v45  ;;  %v1751_v6 = vsel %vm1750_vm5, %v3981_v43, %v3901_v28  ;;  %v1714_v34 = vsel %vm1713_vm6, %v4057_v54, %v3878_v3  ;;  %v4651_v28 = vld [vmem:[#allocation36_spill] sm:$0xff]  ;;  %v4242_v35 = vperm.slane %v4063_v7, 1 }
 0x85e   :  { %1982 = vmatpush.msrb.mxu2 %v1657_v47  ;;  %2022 = vmatpush.msra.mxu0 %v1658_v56  ;;  %v1770_v24 = vmul.f32 %v4219_v62, %v4649_v55  ;;  %v1766_v23 = vmul.f32 %v4219_v62, %v1751_v6  ;;  %v1733_v43 = vmul.f32 %v4229_v21, %v4651_v28  ;;  %v4255_v10 = vperm.slane %v4063_v7, 0 }
 0x85f   :  { %v1630_v16 = vpop.permute.xlu1 %1629  ;;  %2083 = vmatpush.msrb.mxu1 %v1914_v1  ;;  %2051 = vmatpush.msrb.mxu3 %v1840_v8  ;;  %v1729_v38 = vmul.f32 %v4229_v21, %v1714_v34  ;;  %v1677_v3 = vsel %vm4609_vm8, %v4138_v29, %v3905_v33 }
 0x860   :  { %v1642_v17 = vsel %vm4608_vm10, %v3987_v57, %v1630_v16  ;;  %1983 = vmatpush.msrb.mxu2 %v1653_v20  ;;  %2844 = vmatmul.msk.f32.vlgmr.msra.gmra.mxu1 %vm801_vm9, %v3953_v26  ;;  %v4648_v57 = vld [vmem:[#allocation29_spill] sm:$0xff]  ;;  %v1640_v32 = vsel %vm4608_vm10, %v1630_v16, %v3911_v49 }
 0x861   :  { %v1654_v30 = vmul.f32 %v4165_v11, %v1642_v17  ;;  %1984 = vmatmul.f32.vlgmr.msrb.gmra.mxu2 %v4141_v25  ;;  %2052 = vmatpush.msrb.mxu3 %v1807_v40  ;;  %v1655_v29 = vmul.f32 %v4255_v10, %v1640_v32 }
 0x863   :  { %2023 = vmatpush.msra.mxu0 %v1654_v30  ;;  %2053 = vmatpush.msrb.mxu3 %v1803_v2 }
 0x864   :  { %2024 = vmatmul.f32.vlgmr.msra.gmra.mxu0 %v4141_v25 }
 0x865   :  { %2054 = vmatpush.msrb.mxu3 %v4648_v57 }
 0x867   :  { %2055 = vmatpush.msrb.mxu3 %v4650_v61 }
 0x868   :  { %2845 = vmatmul.msk.f32.vlgmr.msrb.gmra.mxu1 %vm801_vm9, %v3953_v26  ;;  %v1678_v26 = vsel %vm4609_vm8, %v3903_v50, %v3844_v42  ;;  %v1641_v42 = vsel %vm4608_vm10, %v3909_v44, %v3864_v53  ;;  %v1692_v50 = vmul.f32 %v4242_v35, %v1677_v3  ;;  %v1614_v53 = vld [vmem:[%s4652_s11] sm:$0xff]  ;;  %v1923_v44 = vpop.permute.xlu0 %1922 }
 0x869   :  { %2056 = vmatpush.msrb.mxu3 %v1770_v24  ;;  %v1696_v54 = vmul.f32 %v4242_v35, %v1678_v26  ;;  %v1659_v33 = vmul.f32 %v4255_v10, %v1641_v42  ;;  %v2092_v47 = vperm.slane %v1614_v53, 2  ;;  %v2122_v56 = vperm.slane %v1614_v53, 3 }
 0x86a   :  { %v2091_v1 = vperm.slane %v1614_v53, 0  ;;  %v2121_v8 = vperm.slane %v1614_v53, 1  ;;  %v2093_v40 = vperm.slane %v1614_v53, 4  ;;  %v2123_v6 = vperm.slane %v1614_v53, 5 }
 0x86b   :  { %2057 = vmatpush.msrb.mxu3 %v1766_v23  ;;  %v4269_v17 = vperm.slane %v2092_v47, 0  ;;  %v4271_v48 = vperm.slane %v2122_v56, 1  ;;  %v2124_v55 = vperm.slane %v1614_v53, 7  ;;  %v2094_v23 = vperm.slane %v1614_v53, 6 }
 0x86c   :  { %v4275_v2 = vperm.slane %v2121_v8, 1  ;;  %v4279_v34 = vperm.slane %v2093_v40, 0 }
 0x86d   :  { %2058 = vmatpush.msrb.mxu3 %v1733_v43  ;;  %v4285_v42 = vperm.slane %v2124_v55, 1 }
 0x86f   :  { %2059 = vmatpush.msrb.mxu3 %v1729_v38  ;;  %v4283_v38 = vperm.slane %v2123_v6, 1 }
 0x871   :  { %2060 = vmatpush.msrb.mxu3 %v1696_v54 }
 0x873   :  { %2061 = vmatpush.msrb.mxu3 %v1692_v50 }
 0x875   :  { %2062 = vmatpush.msrb.mxu3 %v1659_v33  ;;  %v4287_v33 = vperm.slane %v2094_v23, 0 }
 0x877   :  { %2063 = vmatpush.msrb.mxu3 %v1655_v29 }
 0x878   :  { %2064 = vmatmul.f32.vlgmr.msrb.gmra.mxu3 %v4141_v25  ;;  %v4273_v25 = vperm.slane %v2091_v1, 0 }
 0x8b4   :  { %v1965_v7 = vpop.f32.mrf.mxu1 }
 0x8cb   :  { %v2005_v31 = vpop.f32.mrf.mxu1 }
 0x8db   :  { %v1945_v18 = vpop.f32.mrf.mxu3 }
 0x8dc   :  { %v1946_v49 = vadd.f32 %v1945_v18, %v1923_v44 }
 0x8dd   :  { %v2045_v16 = vpop.f32.mrf.mxu1 }
 0x8de   :  { %v1966_v30 = vadd.f32 %v1965_v7, %v1946_v49 }
 0x8e0   :  { %v2103_v28 = vmul.f32 %v4273_v25, %v1966_v30  ;;  %v2133_v43 = vmul.f32 %v4275_v2, %v1966_v30 }
 0x8e1   :  { %v2025_v20 = vpop.f32.mrf.mxu0 }
 0x8e2   :  { %v2026_v57 = vadd.f32 %v2025_v20, %v1923_v44 }
 0x8e4   :  { %v1985_v41 = vpop.f32.mrf.mxu2  ;;  %v2046_v26 = vadd.f32 %v2045_v16, %v2026_v57 }
 0x8e5   :  { %v1986_v60 = vadd.f32 %v1985_v41, %v1923_v44  ;;  %v2085_v54 = vpop.f32.mrf.mxu1 }
 0x8e6   :  { %v2105_v7 = vmul.f32 %v4279_v34, %v2046_v26 }
 0x8e7   :  { %v2006_v45 = vadd.f32 %v2005_v31, %v1986_v60  ;;  %v2135_v31 = vmul.f32 %v4283_v38, %v2046_v26 }
 0x8e9   :  { %v2104_v24 = vmul.f32 %v4269_v17, %v2006_v45  ;;  %v2134_v61 = vmul.f32 %v4271_v48, %v2006_v45 }
 0x8eb   :  { %v2137_v32 = vadd.f32 %v2134_v61, %v2133_v43  ;;  %v2107_v29 = vadd.f32 %v2104_v24, %v2103_v28 }
 0x8ed   :  { %v2138_v18 = vadd.f32 %v2137_v32, %v2135_v31  ;;  %v2108_v47 = vadd.f32 %v2107_v29, %v2105_v7 }
 0x8fb   :  { %v2065_v3 = vpop.f32.mrf.mxu3 }
 0x8fc   :  { %v2066_v50 = vadd.f32 %v2065_v3, %v1923_v44  ;;  %v2088_v44 = vld [vmem:[%s4653_s15] sm:$0xff] }
 0x8fe   :  { %v2086_v41 = vadd.f32 %v2085_v54, %v2066_v50 }
 0x900   :  { %v2136_v53 = vmul.f32 %v4285_v42, %v2086_v41  ;;  %v2106_v60 = vmul.f32 %v4287_v33, %v2086_v41 }
 0x902   :  { %v2139_v56 = vadd.f32 %v2138_v18, %v2136_v53  ;;  %v2109_v1 = vadd.f32 %v2108_v47, %v2106_v60 }
 0x904   :  { %2140 = vadd.xlane.f32.xlu2 %v2139_v56  ;;  %2110 = vadd.xlane.f32.xlu1 %v2109_v1 }
 0x91c   :  { %2245 = vperm.xlu2 %2911, %v2088_v44  }
 0x977   :  { %v2141_v49 = vpop.xlane.xlu2 %2140  ;;  %v2111_v8 = vpop.xlane.xlu1 %2110 }
 0x978   :  { %v2142_v20 = vmul.f32 0.00390625, %v2141_v49  ;;  %v2112_v16 = vmul.f32 0.00390625, %v2111_v8 }
 0x97a   :  { %v2143_v40 = vmul.f32 %v2142_v20, %v4275_v2  ;;  %v2144_v57 = vmul.f32 %v2142_v20, %v4271_v48  ;;  %v2145_v6 = vmul.f32 %v2142_v20, %v4283_v38  ;;  %v2146_v55 = vmul.f32 %v2142_v20, %v4285_v42 }
 0x97b   :  { %v2113_v24 = vmul.f32 %v2112_v16, %v4273_v25  ;;  %v2114_v61 = vmul.f32 %v2112_v16, %v4269_v17  ;;  %v2115_v23 = vmul.f32 %v2112_v16, %v4279_v34  ;;  %v2116_v28 = vmul.f32 %v2112_v16, %v4287_v33 }
 0x97d   :  { %v2147_v43 = vadd.f32 %v2143_v40, %v2113_v24  ;;  %v2148_v3 = vadd.f32 %v2144_v57, %v2114_v61  ;;  %v2149_v54 = vadd.f32 %v2145_v6, %v2115_v23  ;;  %v2150_v50 = vadd.f32 %v2146_v55, %v2116_v28  ;;  %v4326_v55 = vpop.permute.xlu0 %2254 }
 0x97f   :  { %v4302_v32 = vsub.f32 %v1966_v30, %v2147_v43  ;;  %v4304_v29 = vsub.f32 %v2006_v45, %v2148_v3  ;;  %v4306_v7 = vsub.f32 %v2046_v26, %v2149_v54  ;;  %v4308_v31 = vsub.f32 %v2086_v41, %v2150_v50 }
 0x981   :  { %v2155_v53 = vmul.f32 %v4302_v32, %v4302_v32  ;;  %v2156_v18 = vmul.f32 %v4304_v29, %v4304_v29  ;;  %v2157_v60 = vmul.f32 %v4306_v7, %v4306_v7  ;;  %v2158_v47 = vmul.f32 %v4308_v31, %v4308_v31 }
 0x983   :  { %v2177_v30 = vmul.f32 %v2155_v53, %v4275_v2  ;;  %v2178_v45 = vmul.f32 %v2156_v18, %v4271_v48  ;;  %v2159_v26 = vmul.f32 %v2155_v53, %v4273_v25  ;;  %v2160_v41 = vmul.f32 %v2156_v18, %v4269_v17 }
 0x984   :  { %v2179_v56 = vmul.f32 %v2157_v60, %v4283_v38  ;;  %v2161_v44 = vmul.f32 %v2157_v60, %v4279_v34  ;;  %v2180_v8 = vmul.f32 %v2158_v47, %v4285_v42  ;;  %v2162_v16 = vmul.f32 %v2158_v47, %v4287_v33 }
 0x985   :  { %v2181_v1 = vadd.f32 %v2178_v45, %v2177_v30  ;;  %v2163_v49 = vadd.f32 %v2160_v41, %v2159_v26 }
 0x987   :  { %v2182_v20 = vadd.f32 %v2181_v1, %v2179_v56  ;;  %v2164_v40 = vadd.f32 %v2163_v49, %v2161_v44 }
 0x989   :  { %v2183_v57 = vadd.f32 %v2182_v20, %v2180_v8  ;;  %v2165_v6 = vadd.f32 %v2164_v40, %v2162_v16 }
 0x98b   :  { %2184 = vadd.xlane.f32.xlu1 %v2183_v57  ;;  %2166 = vadd.xlane.f32.xlu0 %v2165_v6 }
 0x9fe   :  { %v2185_v24 = vpop.xlane.xlu1 %2184  ;;  %v2167_v23 = vpop.xlane.xlu0 %2166 }
 0x9ff   :  { %v2186_v61 = vmul.f32 0.00390625, %v2185_v24  ;;  %v2168_v28 = vmul.f32 0.00390625, %v2167_v23 }
 0xa01   :  { %v2187_v43 = vmul.f32 %v2186_v61, %v4275_v2  ;;  %v2188_v3 = vmul.f32 %v2186_v61, %v4271_v48  ;;  %v2189_v54 = vmul.f32 %v2186_v61, %v4283_v38  ;;  %v2190_v50 = vmul.f32 %v2186_v61, %v4285_v42 }
 0xa02   :  { %v2169_v53 = vmul.f32 %v2168_v28, %v4273_v25  ;;  %v2170_v18 = vmul.f32 %v2168_v28, %v4269_v17  ;;  %v2171_v60 = vmul.f32 %v2168_v28, %v4279_v34  ;;  %v2172_v47 = vmul.f32 %v2168_v28, %v4287_v33 }
 0xa04   :  { %v2191_v30 = vadd.f32 %v2187_v43, %v2169_v53  ;;  %v2192_v45 = vadd.f32 %v2188_v3, %v2170_v18  ;;  %v2193_v26 = vadd.f32 %v2189_v54, %v2171_v60  ;;  %v2194_v41 = vadd.f32 %v2190_v50, %v2172_v47 }
 0xa06   :  { %v2195_v56 = vadd.f32 1e-05, %v2191_v30  ;;  %v2196_v1 = vadd.f32 1e-05, %v2192_v45  ;;  %v2197_v44 = vadd.f32 1e-05, %v2193_v26 }
 0xa07   :  { %v2198_v49 = vadd.f32 1e-05, %v2194_v41 }
 0xa08   :  { %2925 = vrsqrt.f32 %v2195_v56  ;;  %vm2215_vm12 = vweird.f32 %v2196_v1  ;;  %vm2225_vm14 = vweird.f32 %v2197_v44  ;;  %vm2205_vm10 = vweird.f32 %v2195_v56 }
 0xa09   :  { %2927 = vrsqrt.f32 %v2196_v1 }
 0xa0a   :  { %2929 = vrsqrt.f32 %v2197_v44 }
 0xa0b   :  { %2931 = vrsqrt.f32 %v2198_v49 }
 0xa0e   :  { %v2926_v8 = vpop.eup %2925 }
 0xa0f   :  { %v2928_v20 = vpop.eup %2927  ;;  %v2200_v16 = vmul.f32 %v2926_v8, %v2195_v56  ;;  %vm2206_vm0 = vweird.f32 %v2926_v8 }
 0xa10   :  { %v2930_v40 = vpop.eup %2929  ;;  %v2210_v57 = vmul.f32 %v2928_v20, %v2196_v1  ;;  %vm2216_vm9 = vweird.f32 %v2928_v20  ;;  %vm2207_vm8 = vmor %vm2205_vm10, %vm2206_vm0 }
 0xa11   :  { %v2932_v6 = vpop.eup %2931  ;;  %v2201_v24 = vmul.f32 %v2926_v8, %v2200_v16  ;;  %v2220_v61 = vmul.f32 %v2930_v40, %v2197_v44  ;;  %vm2226_vm11 = vweird.f32 %v2930_v40  ;;  %vm2217_vm13 = vmor %vm2215_vm12, %vm2216_vm9  ;;  %vm2235_vm9 = vweird.f32 %v2198_v49 }
 0xa12   :  { %v2211_v23 = vmul.f32 %v2928_v20, %v2210_v57  ;;  %v2230_v28 = vmul.f32 %v2932_v6, %v2198_v49  ;;  %vm2227_vm15 = vmor %vm2225_vm14, %vm2226_vm11  ;;  %vm2236_vm1 = vweird.f32 %v2932_v6 }
 0xa13   :  { %v2221_v43 = vmul.f32 %v2930_v40, %v2220_v61  ;;  %v2202_v3 = vmul.f32 0.5, %v2201_v24  ;;  %v2246_v61 = vpop.permute.xlu2 %2245  ;;  %vm2237_vm12 = vmor %vm2235_vm9, %vm2236_vm1 }
 0xa14   :  { %v2212_v54 = vmul.f32 0.5, %v2211_v23  ;;  %v2231_v50 = vmul.f32 %v2932_v6, %v2230_v28 }
 0xa15   :  { %v2222_v53 = vmul.f32 0.5, %v2221_v43  ;;  %v2203_v30 = vsub.f32 1.5, %v2202_v3 }
 0xa16   :  { %v2213_v18 = vsub.f32 1.5, %v2212_v54  ;;  %v2232_v60 = vmul.f32 0.5, %v2231_v50 }
 0xa17   :  { %v2223_v47 = vsub.f32 1.5, %v2222_v53  ;;  %v2204_v23 = vmul.f32 %v2926_v8, %v2203_v30 }
 0xa18   :  { %v2214_v45 = vmul.f32 %v2928_v20, %v2213_v18  ;;  %v2233_v41 = vsub.f32 1.5, %v2232_v60 }
 0xa19   :  { %v2224_v26 = vmul.f32 %v2930_v40, %v2223_v47  ;;  %v2208_v44 = vsel %vm2207_vm8, %v2926_v8, %v2204_v23 }
 0xa1a   :  { %v2218_v16 = vsel %vm2217_vm13, %v2928_v20, %v2214_v45  ;;  %v2234_v43 = vmul.f32 %v2932_v6, %v2233_v41 }
 0xa1b   :  { %v2228_v57 = vsel %vm2227_vm15, %v2930_v40, %v2224_v26  ;;  %v2240_v24 = vmul.f32 %v2218_v16, %v4304_v29 }
 0xa1c   :  { %v2241_v28 = vmul.f32 %v2228_v57, %v4306_v7  ;;  %v2238_v40 = vsel %vm2237_vm12, %v2932_v6, %v2234_v43  ;;  %v2239_v7 = vmul.f32 %v2208_v44, %v4302_v32 }
 0xa1d   :  { %v2249_v54 = vmul.f32 %v2246_v61, %v2240_v24  ;;  %v2242_v56 = vmul.f32 %v2238_v40, %v4308_v31 }
 0xa1e   :  { %v2250_v3 = vmul.f32 %v2246_v61, %v2241_v28  ;;  %v2248_v49 = vmul.f32 %v2246_v61, %v2239_v7 }
 0xa1f   :  { %v2258_v1 = vadd.f32 %v4326_v55, %v2249_v54  ;;  %v2251_v8 = vmul.f32 %v2246_v61, %v2242_v56 }
 0xa20   :  { %v2259_v20 = vadd.f32 %v4326_v55, %v2250_v3  ;;  %v2257_v6 = vadd.f32 %v4326_v55, %v2248_v49 }
 0xa21   :  { %vm2262_vm11 = vcmp.gt.f32.partialorder %v2258_v1, 0.0  ;;  %v2266_v29 = vmul.f32 0.01, %v2258_v1  ;;  %v2260_v32 = vadd.f32 %v4326_v55, %v2251_v8  ;;  %v2402_v55 = vld [vmem:[%s4654_s16] sm:$0xff]  ;;  %v2941_v8 = vld [vmem:[#allocation8 + $0x20] ss:$0 sm:$0xff] }
 0xa22   :  { %vm2263_vm13 = vcmp.gt.f32.partialorder %v2259_v20, 0.0  ;;  %v2267_v50 = vmul.f32 0.01, %v2259_v20  ;;  %v2265_v31 = vmul.f32 0.01, %v2257_v6  ;;  %vm2261_vm8 = vcmp.gt.f32.partialorder %v2257_v6, 0.0 }
 0xa23   :  { %v4341_v53 = vsel %vm2262_vm11, %v2258_v1, %v2266_v29  ;;  %v2268_v60 = vmul.f32 0.01, %v2260_v32  ;;  %vm2264_vm10 = vcmp.gt.f32.partialorder %v2260_v32, 0.0  ;;  %v4655_v1 = vld [vmem:[#allocation31_spill] sm:$0xff] }
 0xa24   :  { %v4344_v18 = vsel %vm2263_vm13, %v2259_v20, %v2267_v50  ;;  %2372 = vrot.lane.b32.xlu2 %v4341_v53, %s3118_s23  ;;  %2388 = vrot.lane.b32.xlu1 %v4341_v53, %s3121_s2  ;;  %v4360_v47 = vsel %vm2261_vm8, %v2257_v6, %v2265_v31  ;;  %v4656_v31 = vld [vmem:[#allocation32_spill] sm:$0xff] }
 0xa25   :  { %2390 = vrot.lane.b32.xlu0 %v4344_v18, %s3121_s2  ;;  %v4362_v30 = vsel %vm2264_vm10, %v2260_v32, %v2268_v60 }
 0xa2c   :  { %2358 = vrot.lane.b32.xlu2 %v4344_v18, %s3119_s26  ;;  %2374 = vrot.lane.b32.xlu1 %v4344_v18, %s3118_s23 }
 0xa2d   :  { %2356 = vrot.lane.b32.xlu0 %v4341_v53, %s3119_s26 }
 0xa34   :  { %2340 = vrot.lane.b32.xlu2 %v4341_v53, %s3115_s9  ;;  %2386 = vrot.lane.b32.xlu1 %v4360_v47, %s3121_s2 }
 0xa35   :  { %2392 = vrot.lane.b32.xlu0 %v4362_v30, %s3121_s2 }
 0xa3c   :  { %2376 = vrot.lane.b32.xlu2 %v4362_v30, %s3118_s23  ;;  %2342 = vrot.lane.b32.xlu1 %v4344_v18, %s3115_s9 }
 0xa3d   :  { %2370 = vrot.lane.b32.xlu0 %v4360_v47, %s3118_s23 }
 0xa44   :  { %2322 = vrot.lane.b32.xlu2 %v4360_v47, %s3111_s13  ;;  %2354 = vrot.lane.b32.xlu1 %v4360_v47, %s3119_s26 }
 0xa45   :  { %2360 = vrot.lane.b32.xlu0 %v4362_v30, %s3119_s26 }
 0xa4c   :  { %2344 = vrot.lane.b32.xlu2 %v4362_v30, %s3115_s9  ;;  %2324 = vrot.lane.b32.xlu1 %v4341_v53, %s3111_s13 }
 0xa4d   :  { %2338 = vrot.lane.b32.xlu0 %v4360_v47, %s3115_s9 }
 0xa54   :  { %2290 = vrot.lane.b32.xlu2 %v4360_v47, %s3122_s3  ;;  %2306 = vrot.lane.b32.xlu1 %v4360_v47, %s3120_s1 }
 0xa55   :  { %2308 = vrot.lane.b32.xlu0 %v4341_v53, %s3120_s1 }
 0xa5c   :  { %2328 = vrot.lane.b32.xlu2 %v4362_v30, %s3111_s13  ;;  %2292 = vrot.lane.b32.xlu1 %v4341_v53, %s3122_s3 }
 0xa5d   :  { %2326 = vrot.lane.b32.xlu0 %v4344_v18, %s3111_s13 }
 0xa64   :  { %2310 = vrot.lane.b32.xlu2 %v4344_v18, %s3120_s1  ;;  %2274 = vrot.lane.b32.xlu1 %v4360_v47, %s3123_s0 }
 0xa65   :  { %2276 = vrot.lane.b32.xlu0 %v4341_v53, %s3123_s0 }
 0xa6c   :  { %2296 = vrot.lane.b32.xlu2 %v4362_v30, %s3122_s3  ;;  %2312 = vrot.lane.b32.xlu1 %v4362_v30, %s3120_s1 }
 0xa6d   :  { %2294 = vrot.lane.b32.xlu0 %v4344_v18, %s3122_s3 }
 0xa74   :  { %2405 = vperm.xlu2 %2911, %v2402_v55   ;;  %2278 = vrot.lane.b32.xlu1 %v4344_v18, %s3123_s0 }
 0xa75   :  { %2280 = vrot.lane.b32.xlu0 %v4362_v30, %s3123_s0 }
 0xa7e   :  { %v2373_v45 = vpop.permute.xlu2 %2372 }
 0xa86   :  { %v2359_v26 = vpop.permute.xlu2 %2358 }
 0xa8e   :  { %v4417_v41 = vpop.permute.xlu2 %2340 }
 0xa96   :  { %v2389_v16 = vpop.permute.xlu1 %2388  ;;  %v2377_v24 = vpop.permute.xlu2 %2376 }
 0xa97   :  { %v2391_v57 = vpop.permute.xlu0 %2390 }
 0xa98   :  { %v2395_v61 = vsel %vm1898_vm7, %v2389_v16, %v2391_v57 }
 0xa99   :  { %v2399_v23 = vmul.f32 %v3919_v58, %v2395_v61 }
 0xa9b   :  { %2439 = vmatpush.msra.mxu2 %v2399_v23 }
 0xa9e   :  { %v2375_v28 = vpop.permute.xlu1 %2374  ;;  %v2323_v20 = vpop.permute.xlu2 %2322 }
 0xa9f   :  { %v2357_v43 = vpop.permute.xlu0 %2356  ;;  %v2379_v54 = vsel %vm1861_vm3, %v2373_v45, %v2375_v28  ;;  %v2378_v7 = vsel %vm1861_vm3, %v2375_v28, %v2377_v24 }
 0xaa0   :  { %v2363_v3 = vsel %vm1824_vm2, %v2357_v43, %v2359_v26  ;;  %v2383_v44 = vmul.f32 %v2379_v54, %v4655_v1  ;;  %v2384_v60 = vmul.f32 %v2378_v7, %v4656_v31 }
 0xaa1   :  { %v2367_v40 = vmul.f32 %v2363_v3, %v3881_v39 }
 0xaa2   :  { %2440 = vmatpush.msra.mxu2 %v2383_v44 }
 0xaa4   :  { %2441 = vmatpush.msra.mxu2 %v2367_v40  ;;  %v4657_v40 = vld [vmem:[#allocation37_spill] sm:$0xff] }
 0xaa6   :  { %v2387_v29 = vpop.permute.xlu1 %2386  ;;  %v2345_v55 = vpop.permute.xlu2 %2344 }
 0xaa7   :  { %v2393_v50 = vpop.permute.xlu0 %2392  ;;  %v2396_v58 = vsel %vm1898_vm7, %v2387_v29, %v2389_v16 }
 0xaa8   :  { %v2394_v56 = vsel %vm1898_vm7, %v2391_v57, %v2393_v50  ;;  %v2397_v49 = vsel %vm1898_vm7, %v2393_v50, %v2387_v29  ;;  %v2398_v6 = vmul.f32 %v2941_v8, %v2396_v58  ;;  %v4658_v50 = vld [vmem:[#allocation38_spill] sm:$0xff]  ;;  %v4659_v8 = vld [vmem:[#allocation39_spill] sm:$0xff] }
 0xaa9   :  { %v2400_v39 = vmul.f32 %v4059_v4, %v2394_v56  ;;  %v2401_v32 = vmul.f32 %v4148_v15, %v2397_v49 }
 0xaaa   :  { %2419 = vmatpush.msra.mxu1 %v2398_v6 }
 0xaab   :  { %2459 = vmatpush.msrb.mxu0 %v2400_v39  ;;  %2479 = vmatpush.msra.mxu3 %v2401_v32 }
 0xaad   :  { %2460 = vmatpush.msrb.mxu0 %v2384_v60 }
 0xaae   :  { %v2343_v16 = vpop.permute.xlu1 %2342  ;;  %v4450_v3 = vpop.permute.xlu2 %2290 }
 0xaaf   :  { %v2371_v61 = vpop.permute.xlu0 %2370  ;;  %v2347_v57 = vsel %vm1787_vm4, %v4417_v41, %v2343_v16 }
 0xab0   :  { %v2380_v23 = vsel %vm1861_vm3, %v2371_v61, %v2373_v45  ;;  %v2381_v4 = vsel %vm1861_vm3, %v2377_v24, %v2371_v61  ;;  %v2351_v15 = vmul.f32 %v2347_v57, %v3926_v19  ;;  %v2346_v24 = vsel %vm1787_vm4, %v2343_v16, %v2345_v55 }
 0xab1   :  { %v2382_v28 = vmul.f32 %v2380_v23, %v3666_v46  ;;  %v2385_v54 = vmul.f32 %v2381_v4, %v4092_v63  ;;  %v2352_v58 = vmul.f32 %v2346_v24, %v4658_v50  ;;  %vm4663_vm3 = vcmp.lt.s32.totalorder %v3659_v51, 17 }
 0xab2   :  { %2442 = vmatpush.msra.mxu2 %v2351_v15  ;;  %vm4669_vm15 = vmmov %vm4663_vm3 }
 0xab3   :  { %2420 = vmatpush.msra.mxu1 %v2382_v28  ;;  %2480 = vmatpush.msra.mxu3 %v2385_v54  ;;  %vm4670_vm0 = vmmov %vm4663_vm3 }
 0xab4   :  { %2443 = vmatpush.msra.mxu2 %v4341_v53 }
 0xab6   :  { %v2355_v1 = vpop.permute.xlu1 %2354  ;;  %v2329_v7 = vpop.permute.xlu2 %2328 }
 0xab7   :  { %v2361_v44 = vpop.permute.xlu0 %2360  ;;  %v2364_v45 = vsel %vm1824_vm2, %v2355_v1, %v2357_v43  ;;  %v2333_v32 = vsel %vm1750_vm5, %v2329_v7, %v2323_v20 }
 0xab8   :  { %v2362_v46 = vsel %vm1824_vm2, %v2359_v26, %v2361_v44  ;;  %v2365_v19 = vsel %vm1824_vm2, %v2361_v44, %v2355_v1  ;;  %v2366_v63 = vmul.f32 %v2364_v45, %v3956_v36  ;;  %vm4661_vm2 = vcmp.lt.s32.totalorder %v3659_v51, 16  ;;  %v2273_v45 = vld [vmem:[%s4662_s20] sm:$0xff] }
 0xab9   :  { %v2368_v53 = vmul.f32 %v2362_v46, %v4657_v40  ;;  %v2369_v29 = vmul.f32 %v2365_v19, %v4129_v12  ;;  %vm4665_vm7 = vmmov %vm4661_vm2 }
 0xaba   :  { %2421 = vmatpush.msra.mxu1 %v2366_v63  ;;  %vm4666_vm14 = vmmov %vm4661_vm2  ;;  %v4667_v63 = vld [vmem:[#allocation41_spill] sm:$0xff] }
 0xabb   :  { %2461 = vmatpush.msrb.mxu0 %v2368_v53  ;;  %2481 = vmatpush.msra.mxu3 %v2369_v29 }
 0xabd   :  { %2462 = vmatpush.msrb.mxu0 %v2352_v58 }
 0xabe   :  { %v2325_v43 = vpop.permute.xlu1 %2324 }
 0xabf   :  { %v2339_v56 = vpop.permute.xlu0 %2338  ;;  %2463 = vmatpush.msrb.mxu0 %v4344_v18  ;;  %v2332_v26 = vsel %vm1750_vm5, %v2323_v20, %v2325_v43  ;;  %v4660_v18 = vld [vmem:[#allocation40_spill] sm:$0xff]  ;;  %v2311_v20 = vpop.permute.xlu2 %2310 }
 0xac0   :  { %v2348_v36 = vsel %vm1787_vm4, %v2339_v56, %v4417_v41  ;;  %v2349_v12 = vsel %vm1787_vm4, %v2345_v55, %v2339_v56  ;;  %v2335_v49 = vmul.f32 %v2332_v26, %v4029_v59  ;;  %v2334_v31 = vmul.f32 %v2333_v32, %v4660_v18 }
 0xac1   :  { %v2350_v6 = vmul.f32 %v2348_v36, %v4659_v8  ;;  %v2353_v39 = vmul.f32 %v2349_v12, %v4196_v27  ;;  %vm2408_vm4 = vcmask 588800  }
 0xac2   :  { %2444 = vmatpush.msra.mxu2 %v2335_v49 }
 0xac3   :  { %2422 = vmatpush.msra.mxu1 %v2350_v6  ;;  %2482 = vmatpush.msra.mxu3 %v2353_v39 }
 0xac5   :  { %2423 = vmatpush.msra.mxu1 %v4360_v47  ;;  %2483 = vmatpush.msra.mxu3 %v4362_v30 }
 0xac6   :  { %v2307_v41 = vpop.permute.xlu1 %2306 }
 0xac7   :  { %v2309_v60 = vpop.permute.xlu0 %2308  ;;  %2424 = vmatpush.msra.mxu1 %v2334_v31 }
 0xac8   :  { %v2316_v59 = vsel %vm1713_vm6, %v2307_v41, %v2309_v60  ;;  %v2315_v47 = vsel %vm1713_vm6, %v2309_v60, %v2311_v20 }
 0xac9   :  { %v2319_v27 = vmul.f32 %v2316_v59, %v4046_v0  ;;  %v2320_v15 = vmul.f32 %v2315_v47, %v4083_v22 }
 0xacb   :  { %2445 = vmatpush.msra.mxu2 %v2319_v27 }
 0xace   :  { %v2293_v55 = vpop.permute.xlu1 %2292 }
 0xacf   :  { %v2327_v16 = vpop.permute.xlu0 %2326  ;;  %v2300_v61 = vsel %vm4661_vm2, %v4450_v3, %v2293_v55 }
 0xad0   :  { %v2330_v30 = vsel %vm1750_vm5, %v2327_v16, %v2329_v7  ;;  %v2331_v57 = vsel %vm1750_vm5, %v2325_v43, %v2327_v16  ;;  %v2303_v0 = vmul.f32 %v2300_v61, %v4110_v9  ;;  %v2297_v9 = vpop.permute.xlu2 %2296  ;;  %vm4664_vm5 = vmmov %vm4661_vm2 }
 0xad1   :  { %v2336_v23 = vmul.f32 %v2331_v57, %v4035_v5  ;;  %v2337_v4 = vmul.f32 %v2330_v30, %v4219_v62  ;;  %v2301_v22 = vsel %vm4664_vm5, %v2297_v9, %v4450_v3  ;;  %v2492_v30 = vld [vmem:[%s4671_s5] sm:$0xff] }
 0xad2   :  { %2446 = vmatpush.msra.mxu2 %v2303_v0  ;;  %v2302_v3 = vmul.f32 %v2301_v22, %v4032_v52 }
 0xad3   :  { %2464 = vmatpush.msrb.mxu0 %v2336_v23  ;;  %2484 = vmatpush.msra.mxu3 %v2337_v4 }
 0xad5   :  { %2465 = vmatpush.msrb.mxu0 %v2320_v15 }
 0xad6   :  { %v2275_v28 = vpop.permute.xlu1 %2274 }
 0xad7   :  { %v2277_v54 = vpop.permute.xlu0 %2276 }
 0xad8   :  { %v2284_v1 = vsel %vm4663_vm3, %v2275_v28, %v2277_v54  ;;  %v2406_v36 = vpop.permute.xlu2 %2405 }
 0xad9   :  { %v2287_v44 = vmul.f32 %v2284_v1, %v4175_v13 }
 0xadb   :  { %2447 = vmatpush.msra.mxu2 %v2287_v44 }
 0xadc   :  { %2847 = vmatmul.msk.f32.vlgmr.msra.gmra.mxu2 %vm2408_vm4, %v2273_v45 }
 0xade   :  { %v2313_v5 = vpop.permute.xlu1 %2312 }
 0xadf   :  { %v2295_v62 = vpop.permute.xlu0 %2294  ;;  %v2314_v24 = vsel %vm1713_vm6, %v2311_v20, %v2313_v5  ;;  %v2317_v46 = vsel %vm1713_vm6, %v2313_v5, %v2307_v41  ;;  %vm4668_vm6 = vmmov %vm4663_vm3 }
 0xae0   :  { %v2298_v13 = vsel %vm4665_vm7, %v2295_v62, %v2297_v9  ;;  %v2299_v19 = vsel %vm4666_vm14, %v2293_v55, %v2295_v62  ;;  %v2318_v40 = vmul.f32 %v2317_v46, %v4667_v63  ;;  %v2321_v53 = vmul.f32 %v2314_v24, %v4229_v21 }
 0xae1   :  { %v2304_v29 = vmul.f32 %v2299_v19, %v4113_v14  ;;  %v2305_v50 = vmul.f32 %v2298_v13, %v4242_v35 }
 0xae2   :  { %2425 = vmatpush.msra.mxu1 %v2318_v40  ;;  %2485 = vmatpush.msra.mxu3 %v2321_v53 }
 0xae3   :  { %2466 = vmatpush.msrb.mxu0 %v2304_v29 }
 0xae4   :  { %2426 = vmatpush.msra.mxu1 %v2302_v3  ;;  %2486 = vmatpush.msra.mxu3 %v2305_v50 }
 0xae6   :  { %v2279_v58 = vpop.permute.xlu1 %2278 }
 0xae7   :  { %v2281_v43 = vpop.permute.xlu0 %2280  ;;  %v2283_v7 = vsel %vm4668_vm6, %v2277_v54, %v2279_v58 }
 0xae8   :  { %v2285_v56 = vsel %vm4669_vm15, %v2281_v43, %v2275_v28  ;;  %v2282_v14 = vsel %vm4670_vm0, %v2279_v58, %v2281_v43  ;;  %v2288_v52 = vmul.f32 %v2283_v7, %v4165_v11  ;;  %vm2659_vm15 = vcmask 64512  }
 0xae9   :  { %v2286_v21 = vmul.f32 %v2285_v56, %v4066_v37  ;;  %v2289_v35 = vmul.f32 %v2282_v14, %v4255_v10 }
 0xaea   :  { %2467 = vmatpush.msrb.mxu0 %v2288_v52 }
 0xaeb   :  { %2427 = vmatpush.msra.mxu1 %v2286_v21  ;;  %2487 = vmatpush.msra.mxu3 %v2289_v35 }
 0xaec   :  { %2846 = vmatmul.msk.f32.vlgmr.msra.gmra.mxu1 %vm2408_vm4, %v2273_v45  ;;  %2848 = vmatmul.msk.f32.vlgmr.msrb.gmra.mxu0 %vm2408_vm4, %v2273_v45 }
 0xaed   :  { %2849 = vmatmul.msk.f32.vlgmr.msra.gmra.mxu3 %vm2408_vm4, %v2273_v45 }
 0xb5f   :  { %v2449_v26 = vpop.f32.mrf.mxu2 }
 0xb60   :  { %v2450_v12 = vadd.f32 %v2449_v26, %v2406_v36 }
 0xb62   :  { %v2495_v10 = vmul.f32 %v2450_v12, %v4269_v17  ;;  %v2513_v6 = vmul.f32 %v2450_v12, %v4271_v48 }
 0xb69   :  { %v2429_v51 = vpop.f32.mrf.mxu1  ;;  %v2469_v8 = vpop.f32.mrf.mxu0 }
 0xb6a   :  { %v2430_v49 = vadd.f32 %v2429_v51, %v2406_v36  ;;  %v2470_v39 = vadd.f32 %v2469_v8, %v2406_v36 }
 0xb6c   :  { %v2494_v11 = vmul.f32 %v2430_v49, %v4273_v25  ;;  %v2512_v37 = vmul.f32 %v2430_v49, %v4275_v2  ;;  %v2496_v41 = vmul.f32 %v2470_v39, %v4279_v34  ;;  %v2514_v60 = vmul.f32 %v2470_v39, %v4283_v38 }
 0xb6e   :  { %v2498_v32 = vadd.f32 %v2495_v10, %v2494_v11  ;;  %v2516_v18 = vadd.f32 %v2513_v6, %v2512_v37  ;;  %v2493_v11 = vld [vmem:[%s3273_s27] sm:$0xff] }
 0xb6f   :  { %v2653_v37 = vld [vmem:[%s3283_s24] sm:$0xf]  ;;  %s3124_s24 = smov [#allocation10]  }
 0xb70   :  { %v2489_v31 = vpop.f32.mrf.mxu3  ;;  %v2517_v20 = vadd.f32 %v2516_v18, %v2514_v60  ;;  %v2499_v16 = vadd.f32 %v2498_v32, %v2496_v41  ;;  %s2761_s27 = sshll.u32 %s3124_s24, 4  ;;  %s2762_s27 = int_to_ptr.vmem [resolvable:$true] %s2761_s27 }
 0xb71   :  { %v2490_v59 = vadd.f32 %v2489_v31, %v2406_v36 }
 0xb73   :  { %v2497_v27 = vmul.f32 %v2490_v59, %v4287_v33  ;;  %v2515_v55 = vmul.f32 %v2490_v59, %v4285_v42 }
 0xb75   :  { %v2518_v61 = vadd.f32 %v2517_v20, %v2515_v55  ;;  %v2500_v47 = vadd.f32 %v2499_v16, %v2497_v27 }
 0xb77   :  { %2519 = vadd.xlane.f32.xlu0 %v2518_v61  ;;  %2501 = vadd.xlane.f32.xlu1 %v2500_v47 }
 0xb8b   :  { %2624 = vperm.xlu0 %2909, %v2492_v30  }
 0xbea   :  { %v2520_v57 = vpop.xlane.xlu0 %2519  ;;  %v2502_v0 = vpop.xlane.xlu1 %2501 }
 0xbeb   :  { %v2521_v23 = vmul.f32 0.00390625, %v2520_v57  ;;  %v2503_v4 = vmul.f32 0.00390625, %v2502_v0 }
 0xbed   :  { %v2522_v15 = vmul.f32 %v2521_v23, %v4275_v2  ;;  %v2523_v28 = vmul.f32 %v2521_v23, %v4271_v48  ;;  %v2524_v54 = vmul.f32 %v2521_v23, %v4283_v38  ;;  %v2525_v1 = vmul.f32 %v2521_v23, %v4285_v42 }
 0xbee   :  { %v2504_v44 = vmul.f32 %v2503_v4, %v4273_v25  ;;  %v2505_v45 = vmul.f32 %v2503_v4, %v4269_v17  ;;  %v2506_v9 = vmul.f32 %v2503_v4, %v4279_v34  ;;  %v2507_v5 = vmul.f32 %v2503_v4, %v4287_v33 }
 0xbf0   :  { %v2526_v22 = vadd.f32 %v2522_v15, %v2504_v44  ;;  %v2527_v62 = vadd.f32 %v2523_v28, %v2505_v45  ;;  %v2528_v24 = vadd.f32 %v2524_v54, %v2506_v9  ;;  %v2529_v46 = vadd.f32 %v2525_v1, %v2507_v5 }
 0xbf2   :  { %v4546_v13 = vsub.f32 %v2430_v49, %v2526_v22  ;;  %v4548_v19 = vsub.f32 %v2450_v12, %v2527_v62  ;;  %v4550_v63 = vsub.f32 %v2470_v39, %v2528_v24  ;;  %v4552_v40 = vsub.f32 %v2490_v59, %v2529_v46 }
 0xbf4   :  { %v2534_v53 = vmul.f32 %v4546_v13, %v4546_v13  ;;  %v2535_v29 = vmul.f32 %v4548_v19, %v4548_v19  ;;  %v2536_v3 = vmul.f32 %v4550_v63, %v4550_v63  ;;  %v2537_v50 = vmul.f32 %v4552_v40, %v4552_v40 }
 0xbf6   :  { %v2556_v58 = vmul.f32 %v2534_v53, %v4275_v2  ;;  %v2557_v43 = vmul.f32 %v2535_v29, %v4271_v48  ;;  %v2538_v7 = vmul.f32 %v2534_v53, %v4273_v25  ;;  %v2539_v56 = vmul.f32 %v2535_v29, %v4269_v17 }
 0xbf7   :  { %v2558_v14 = vmul.f32 %v2536_v3, %v4283_v38  ;;  %v2540_v21 = vmul.f32 %v2536_v3, %v4279_v34  ;;  %v2559_v26 = vmul.f32 %v2537_v50, %v4285_v42  ;;  %v2541_v12 = vmul.f32 %v2537_v50, %v4287_v33 }
 0xbf8   :  { %v2560_v52 = vadd.f32 %v2557_v43, %v2556_v58  ;;  %v2542_v35 = vadd.f32 %v2539_v56, %v2538_v7 }
 0xbfa   :  { %v2561_v36 = vadd.f32 %v2560_v52, %v2558_v14  ;;  %v2543_v51 = vadd.f32 %v2542_v35, %v2540_v21 }
 0xbfc   :  { %v2562_v49 = vadd.f32 %v2561_v36, %v2559_v26  ;;  %v2544_v8 = vadd.f32 %v2543_v51, %v2541_v12 }
 0xbfd   :  { %v2625_v56 = vpop.permute.xlu0 %2624 }
 0xbfe   :  { %2563 = vadd.xlane.f32.xlu1 %v2562_v49  ;;  %2545 = vadd.xlane.f32.xlu2 %v2544_v8 }
 0xc16   :  { %2633 = vperm.xlu2 %2911, %v2493_v11  }
 0xc17   :  { %2656 = vperm.xlu1 %2910, %v2653_v37  }
 0xc71   :  { %v2564_v10 = vpop.xlane.xlu1 %2563  ;;  %v2546_v39 = vpop.xlane.xlu2 %2545 }
 0xc72   :  { %v2565_v6 = vmul.f32 0.00390625, %v2564_v10  ;;  %v2547_v32 = vmul.f32 0.00390625, %v2546_v39 }
 0xc74   :  { %v2566_v18 = vmul.f32 %v2565_v6, %v4275_v2  ;;  %v2567_v31 = vmul.f32 %v2565_v6, %v4271_v48  ;;  %v2568_v41 = vmul.f32 %v2565_v6, %v4283_v38  ;;  %v2569_v60 = vmul.f32 %v2565_v6, %v4285_v42 }
 0xc75   :  { %v2548_v59 = vmul.f32 %v2547_v32, %v4273_v25  ;;  %v2549_v27 = vmul.f32 %v2547_v32, %v4269_v17  ;;  %v2550_v55 = vmul.f32 %v2547_v32, %v4279_v34  ;;  %v2551_v20 = vmul.f32 %v2547_v32, %v4287_v33 }
 0xc77   :  { %v2570_v16 = vadd.f32 %v2566_v18, %v2548_v59  ;;  %v2571_v61 = vadd.f32 %v2567_v31, %v2549_v27  ;;  %v2572_v47 = vadd.f32 %v2568_v41, %v2550_v55  ;;  %v2573_v30 = vadd.f32 %v2569_v60, %v2551_v20 }
 0xc79   :  { %v2574_v57 = vadd.f32 1e-05, %v2570_v16  ;;  %v2575_v2 = vadd.f32 1e-05, %v2571_v61  ;;  %v2576_v0 = vadd.f32 1e-05, %v2572_v47  ;;  %v2634_v51 = vpop.permute.xlu2 %2633 }
 0xc7a   :  { %v2577_v48 = vadd.f32 1e-05, %v2573_v30 }
 0xc7b   :  { %2933 = vrsqrt.f32 %v2574_v57  ;;  %vm2584_vm12 = vweird.f32 %v2574_v57  ;;  %vm2594_vm8 = vweird.f32 %v2575_v2  ;;  %vm2604_vm3 = vweird.f32 %v2576_v0 }
 0xc7c   :  { %2935 = vrsqrt.f32 %v2575_v2  ;;  %vm2614_vm5 = vweird.f32 %v2577_v48 }
 0xc7d   :  { %2937 = vrsqrt.f32 %v2576_v0 }
 0xc7e   :  { %2939 = vrsqrt.f32 %v2577_v48 }
 0xc81   :  { %v2934_v38 = vpop.eup %2933 }
 0xc82   :  { %v2936_v25 = vpop.eup %2935  ;;  %v2579_v42 = vmul.f32 %v2934_v38, %v2574_v57  ;;  %vm2585_vm1 = vweird.f32 %v2934_v38 }
 0xc83   :  { %v2938_v17 = vpop.eup %2937  ;;  %v2589_v23 = vmul.f32 %v2936_v25, %v2575_v2  ;;  %vm2595_vm9 = vweird.f32 %v2936_v25  ;;  %vm2586_vm13 = vmor %vm2584_vm12, %vm2585_vm1 }
 0xc84   :  { %v2940_v34 = vpop.eup %2939  ;;  %v2599_v4 = vmul.f32 %v2938_v17, %v2576_v0  ;;  %v2580_v33 = vmul.f32 %v2934_v38, %v2579_v42  ;;  %vm2605_vm11 = vweird.f32 %v2938_v17  ;;  %vm2596_vm2 = vmor %vm2594_vm8, %vm2595_vm9  ;;  %vm2749_vm9 = vcmask 1043456  }
 0xc85   :  { %v2609_v15 = vmul.f32 %v2940_v34, %v2577_v48  ;;  %v2590_v28 = vmul.f32 %v2936_v25, %v2589_v23  ;;  %vm2615_vm10 = vweird.f32 %v2940_v34  ;;  %vm2606_vm4 = vmor %vm2604_vm3, %vm2605_vm11 }
 0xc86   :  { %v2581_v54 = vmul.f32 0.5, %v2580_v33  ;;  %v2600_v1 = vmul.f32 %v2938_v17, %v2599_v4  ;;  %vm2616_vm7 = vmor %vm2614_vm5, %vm2615_vm10 }
 0xc87   :  { %v2591_v44 = vmul.f32 0.5, %v2590_v28  ;;  %v2610_v45 = vmul.f32 %v2940_v34, %v2609_v15 }
 0xc88   :  { %v2582_v9 = vsub.f32 1.5, %v2581_v54  ;;  %v2601_v5 = vmul.f32 0.5, %v2600_v1 }
 0xc89   :  { %v2592_v22 = vsub.f32 1.5, %v2591_v44  ;;  %v2611_v62 = vmul.f32 0.5, %v2610_v45  ;;  %v2657_v59 = vpop.permute.xlu1 %2656 }
 0xc8a   :  { %v2583_v24 = vmul.f32 %v2934_v38, %v2582_v9  ;;  %v2602_v46 = vsub.f32 1.5, %v2601_v5 }
 0xc8b   :  { %v2593_v53 = vmul.f32 %v2936_v25, %v2592_v22  ;;  %v2612_v29 = vsub.f32 1.5, %v2611_v62 }
 0xc8c   :  { %v2587_v3 = vsel %vm2586_vm13, %v2934_v38, %v2583_v24  ;;  %v2603_v50 = vmul.f32 %v2938_v17, %v2602_v46 }
 0xc8d   :  { %v2597_v58 = vsel %vm2596_vm2, %v2936_v25, %v2593_v53  ;;  %v2613_v43 = vmul.f32 %v2940_v34, %v2612_v29  ;;  %v2618_v7 = vmul.f32 %v2587_v3, %v4546_v13 }
 0xc8e   :  { %v2607_v14 = vsel %vm2606_vm4, %v2938_v17, %v2603_v50  ;;  %v2619_v52 = vmul.f32 %v2597_v58, %v4548_v19  ;;  %v2652_v19 = vld [vmem:[%s3278_s4] sm:$0xf]  ;;  %s2763_s4 = sshll.u32 %s3288_s30, 4  ;;  %s2764_s4 = int_to_ptr.hbm [resolvable:$true] %s2763_s4 }
 0xc8f   :  { %v2617_v21 = vsel %vm2616_vm7, %v2940_v34, %v2613_v43  ;;  %v2620_v35 = vmul.f32 %v2607_v14, %v4550_v63  ;;  %v2627_v26 = vmul.f32 %v2625_v56, %v2618_v7  ;;  %s3050_s13 = sshra.s32 %s2764_s4, 4  ;;  %s3051_s13 = int_to_ptr.hbm [resolvable:$true] %s3050_s13 }
 0xc90   :  { %v2621_v36 = vmul.f32 %v2617_v21, %v4552_v40  ;;  %v2628_v12 = vmul.f32 %v2625_v56, %v2619_v52  ;;  %s3052_s17 = scalar_lea.hbm %s3051_s13, 16  ;;  %p3055_p7 = scmp.lt.s32.totalorder %s3051_s13, %s3288_s30 }
 0xc91   :  { %v2629_v49 = vmul.f32 %v2625_v56, %v2620_v35  ;;  %v2636_v8 = vadd.f32 %v2634_v51, %v2627_v26  ;;  %p3053_p6 = scmp.ne.s32.totalorder %s3051_s13, %s3052_s17  ;;  %p3056_p8 = scmp.lt.s32.totalorder %s3054_s21, %s3052_s17 }
 0xc92   :  { %v2630_v11 = vmul.f32 %v2625_v56, %v2621_v36  ;;  %v2637_v37 = vadd.f32 %v2634_v51, %v2628_v12 }
 0xc93   :  { %v2638_v10 = vadd.f32 %v2634_v51, %v2629_v49  ;;  %vm2640_vm14 = vcmp.gt.f32.partialorder %v2636_v8, 0.0  ;;  %v2644_v13 = vmul.f32 0.01, %v2636_v8  ;;  %p3057_p9 = por %p3056_p8, %p3055_p7 }
 0xc94   :  { %v2639_v6 = vadd.f32 %v2634_v51, %v2630_v11  ;;  %vm2641_vm6 = vcmp.gt.f32.partialorder %v2637_v37, 0.0  ;;  %v2645_v39 = vmul.f32 0.01, %v2637_v37 }
 0xc95   :  { %v2648_v32 = vsel %vm2640_vm14, %v2636_v8, %v2644_v13  ;;  %vm2642_vm0 = vcmp.gt.f32.partialorder %v2638_v10, 0.0  ;;  %v2646_v63 = vmul.f32 0.01, %v2638_v10  ;;  %p3058_p10 = pnand %p3057_p9, %p3053_p6 }
 0xc96   :  { %2678 = vmatpush.msrb.mxu1 %v2648_v32  ;;  %v2649_v18 = vsel %vm2641_vm6, %v2637_v37, %v2645_v39  ;;  %vm2643_vm1 = vcmp.gt.f32.partialorder %v2639_v6, 0.0  ;;  %v2647_v40 = vmul.f32 0.01, %v2639_v6 }
 0xc97   :  { %2698 = vmatpush.msrb.mxu2 %v2649_v18  ;;  %2850 = vmatmul.msk.f32.vlgmr.msrb.gmra.mxu1 %vm2659_vm15, %v2652_v19  ;;  %v2650_v31 = vsel %vm2642_vm0, %v2638_v10, %v2646_v63 }
 0xc98   :  { %2851 = vmatmul.msk.f32.vlgmr.msrb.gmra.mxu2 %vm2659_vm15, %v2652_v19  ;;  %2718 = vmatpush.msra.mxu1 %v2650_v31  ;;  %v2651_v41 = vsel %vm2643_vm1, %v2639_v6, %v2647_v40 }
 0xc99   :  { %2738 = vmatpush.msra.mxu2 %v2651_v41 }
 0xc9f   :  { %2852 = vmatmul.msk.f32.vlgmr.msra.gmra.mxu1 %vm2659_vm15, %v2652_v19 }
 0xca0   :  { %2853 = vmatmul.msk.f32.vlgmr.msra.gmra.mxu2 %vm2659_vm15, %v2652_v19 }
 0xd14   :  { %v2680_v60 = vpop.f32.mrf.mxu1 }
 0xd15   :  { %v2681_v20 = vadd.f32 %v2680_v60, %v2657_v59 }
 0xd1b   :  { %v2700_v27 = vpop.f32.mrf.mxu2 }
 0xd1c   :  { %v2701_v55 = vadd.f32 %v2700_v27, %v2657_v59  ;;  %v2720_v47 = vpop.f32.mrf.mxu1 }
 0xd1d   :  { %v2721_v2 = vadd.f32 %v2720_v47, %v2657_v59 }
 0xd1e   :  { %v2747_v16 = vrot.slane %v2701_v55, 4 }
 0xd20   :  { %v2750_v61 = vsel %vm2749_vm9, %v2681_v20, %v2747_v16 }
 0xd21   :  { %2754 = vst [vmem:[#allocation10] sm:$0xff] %v2750_v61 }
 0xd23   :  { %v2740_v30 = vpop.f32.mrf.mxu2 }
 0xd24   :  { %v2741_v57 = vadd.f32 %v2740_v30, %v2657_v59 }
 0xd26   :  { %v2748_v0 = vrot.slane %v2741_v57, 4 }
 0xd28   :  { %v2751_v48 = vsel %vm2749_vm9, %v2721_v2, %v2748_v0 }
 0xd29   :  { %2755 = vst [vmem:[#allocation10 + $0x8] sm:$0xff] %v2751_v48 }
 0xd2a   :  { %3061 = shalt.err (!%p3058_p10)
}
 0xd2b   :  { %2766 = dma.vmem_to_hbm [thread:$0]  %s2762_s27, 256, %s2764_s4, [#allocation4]  }
 0xd2c   :  { %3068 = dma.done.wait [#allocation4], 256  }
 0xd2d   :  { %3069 = vsyncadd [#allocation4], 4294967040 }
 0xd2e   :  { %2771 = vsyncpa [#allocation3], 1 }
 0xd2f   :  { %2772 = vsyncpa [#allocation6], 1 }
 0xd30   :  { %2773 = vsyncpa [#allocation9], 1 }
 0xd31   :  { %2774 = vsyncpa [#allocation4], 1 }

</bundles_post_ra>
